<compile_context>
chip_gen: v6e
topology: v6e:2x2x1
jax: 0.10.0
libtpu: 0.0.40
codegen_flags: <defaults>
</compile_context>

<pallas_src>
import math
import functools

import numpy as np
import jax
import jax.numpy as jnp
from jax.experimental import pallas as pl
from jax.experimental.pallas import tpu as pltpu


OUT_LANES = 128                 # lane-dense width of the padded output / FFN hidden
MATMUL_DTYPE = jnp.bfloat16     # operands of every learned-weight matmul (f32 accum)
VEC_PER_LAYER = 6               # ln1_g, ln1_b, bo_eff, ln2_g, ln2_b, b2


# ----------------------------------------------------------------------------
# In-kernel math helpers (pure jnp, traced inside the single Pallas kernel)
# ----------------------------------------------------------------------------

def _layernorm(x, g, b):
    # LayerNorm over last dim, eps=1e-5 (PyTorch default); g, b are (1, E).
    mean = jnp.mean(x, axis=-1, keepdims=True)
    xc = x - mean
    var = jnp.mean(xc * xc, axis=-1, keepdims=True)
    return xc * jax.lax.rsqrt(var + 1e-5) * g + b


def _gelu_exact(x):
    # Exact (erf-based) GELU matching F.gelu default; erf via Abramowitz-Stegun
    # 7.1.26 polynomial (|err| < 1.5e-7) so only exp/mul/add lower in Mosaic.
    z = x * (1.0 / math.sqrt(2.0))
    az = jnp.abs(z)
    t = 1.0 / (1.0 + 0.3275911 * az)
    poly = t * (0.254829592 + t * (-0.284496736 + t * (1.421413741
             + t * (-1.453152027 + t * 1.061405429))))
    em = poly * jnp.exp(-az * az)                    # = 1 - erf(|z|)
    erf_z = jnp.where(z >= 0.0, 1.0 - em, em - 1.0)
    return 0.5 * x * (1.0 + erf_z)


# ----------------------------------------------------------------------------
# The fused kernel (one grid step == one chunk of TB batch elements)
# ----------------------------------------------------------------------------

def _slotmae_kernel(tok_ref, wcomb_ref, penc_ref, encbase_ref, maskenc_ref,
                    seldec_ref, decbase_ref, maskdec_ref, osel_ref,
                    vec_ref, qw_ref, qb_ref, wo_ref, wA_ref, bA_ref, w2_ref,
                    out_ref, *, n_head, n_enc, n_dec):
    n_layers = n_enc + n_dec
    f32 = jnp.float32
    mmt = MATMUL_DTYPE

    def bdot(a, b):                     # learned-weight matmul: bf16 in, f32 out
        return jnp.dot(a.astype(mmt), b.astype(mmt), preferred_element_type=f32)

    def fdot(a, b):                     # exact f32 matmul for 0/1 permutation glue
        return jnp.dot(a, b, preferred_element_type=f32)

    def attention(xn, li, mask):
        # xn: (R, E) f32 after LayerNorm; mask: (R, R) block-diagonal additive.
        xb = xn.astype(mmt)
        acc = None
        for h in range(n_head):
            r = li * n_head + h
            # Per-head weights pre-split on host (no lane slices); scale folded
            # into Wq/bq; K bias dropped (softmax-invariant); V bias folded
            # into bo_eff on the host.
            q = jnp.dot(xb, qw_ref[(li * 3 + 0) * n_head + h],
                        preferred_element_type=f32) + qb_ref[r:r + 1]
            k = jnp.dot(xb, qw_ref[(li * 3 + 1) * n_head + h],
                        preferred_element_type=f32)
            v = jnp.dot(xb, qw_ref[(li * 3 + 2) * n_head + h],
                        preferred_element_type=f32)
            s = jax.lax.dot_general(q.astype(mmt), k.astype(mmt),
                                    (((1,), (1,)), ((), ())),
                                    preferred_element_type=f32) + mask   # (R, R)
            s = s - jnp.max(s, axis=-1, keepdims=True)
            e = jnp.exp(s)
            p = e * pl.reciprocal(jnp.sum(e, axis=-1, keepdims=True), approx=True)
            oh = bdot(p, v)                                  # (R, dh)
            c = bdot(oh, wo_ref[r])                          # (R, E)
            acc = c if acc is None else acc + c
        return acc

    def layer(x, li, mask):
        # nn.TransformerEncoderLayer, norm_first=True, eval (dropout = identity).
        base = VEC_PER_LAYER * li
        h = _layernorm(x, vec_ref[base + 0:base + 1], vec_ref[base + 1:base + 2])
        x = x + attention(h, li, mask) + vec_ref[base + 2:base + 3]       # + bo_eff
        h = _layernorm(x, vec_ref[base + 3:base + 4], vec_ref[base + 4:base + 5])
        h1 = bdot(h, wA_ref[li]) + bA_ref[li:li + 1]                      # (R, W)
        h1 = _gelu_exact(h1)
        h2 = bdot(h1, w2_ref[li]) + vec_ref[base + 5:base + 6]            # (R, E)
        return x + h2

    mask_e = maskenc_ref[...]
    mask_d = maskdec_ref[...]

    # ---------------- encode -------------------------------------------------
    # Combined goal/obs embedding (bias + mask-zeroing encoded in the token
    # matrix columns), then one permutation matmul scatters tokens into the
    # interleaved encoder sequence; enc_base already holds slots + PE.
    emb = bdot(tok_ref[0], wcomb_ref[...])                   # (R_tok, E)
    x = fdot(penc_ref[...], emb) + encbase_ref[...]          # (R_enc, E)

    for li in range(n_enc):   # static: depth 2. Use lax.fori_loop if this grows.
        x = layer(x, li, mask_e)
    nrm = VEC_PER_LAYER * n_layers
    x = _layernorm(x, vec_ref[nrm + 0:nrm + 1], vec_ref[nrm + 1:nrm + 2])

    # ---------------- decode -------------------------------------------------
    # Bottleneck gather + decoder-input scatter folded into one host-built
    # selector; dec_base holds bottleneck PE + mask-token + PE rows.
    y = fdot(seldec_ref[...], x) + decbase_ref[...]          # (R_dec, E)
    for li in range(n_dec):
        y = layer(y, n_enc + li, mask_d)
    y = _layernorm(y, vec_ref[nrm + 2:nrm + 3], vec_ref[nrm + 3:nrm + 4])

    # Gather observation rows, lane-dense padded output projection.
    obs_out = fdot(osel_ref[...], y)                         # (R_out, E)
    out_ref[0] = bdot(obs_out, wA_ref[n_layers]) + bA_ref[n_layers:n_layers + 1]


# ----------------------------------------------------------------------------
# Host-side builder: packs weights once and returns a jitted forward function
# ----------------------------------------------------------------------------

def make_slotmae_forward(params, *, obs_dim, goal_dim, L, Lg, ctx, n_head, B):
    E = params["slots"].shape[1]
    n_enc = len(params["enc_layers"])
    n_dec = len(params["dec_layers"])
    NL = n_enc + n_dec
    assert E % n_head == 0 and L >= ctx and params["slots"].shape[0] >= ctx
    dh = E // n_head
    S_enc = Lg + 2 * ctx
    S_dec = ctx + L
    TB = min(B, 8)                              # batch elements folded per grid step
    nc = -(-B // TB)                            # number of grid steps (chunks)
    B_pad = nc * TB
    R_tok = TB * (Lg + ctx)
    R_enc = TB * S_enc
    R_dec = TB * S_dec
    R_out = -(-(TB * L) // 8) * 8               # sublane-padded rows -> unmasked stores
    W = max(4 * E, OUT_LANES)                   # shared lane-dense FFN-hidden/out width
    D_comb = obs_dim + goal_dim + 2
    f32 = np.float32
    pe = np.asarray(params["pe"][0], f32)       # (max_len, E)

    # ---- combined token embedding weight: [obs_w; goal_w; obs_b; goal_b] ------
    w_comb = np.concatenate(
        [np.asarray(params["obs_w"], f32), np.asarray(params["goal_w"], f32),
         np.asarray(params["obs_b"], f32)[None], np.asarray(params["goal_b"], f32)[None]],
        axis=0)

    # ---- permutation / selection matrices + block-diagonal attention masks ----
    p_enc = np.zeros((R_enc, R_tok), f32)
    sel_dec = np.zeros((R_dec, R_enc), f32)
    o_sel = np.zeros((R_out, R_dec), f32)
    mask_enc = np.full((R_enc, R_enc), -1e9, f32)
    mask_dec = np.full((R_dec, R_dec), -1e9, f32)
    for e in range(TB):
        te, ee, de = e * (Lg + ctx), e * S_enc, e * S_dec
        mask_enc[ee:ee + S_enc, ee:ee + S_enc] = 0.0
        mask_dec[de:de + S_dec, de:de + S_dec] = 0.0
        for g in range(Lg):
            p_enc[ee + g, te + g] = 1.0                        # goal rows
        for j in range(ctx):
            p_enc[ee + Lg + 2 * j + 1, te + Lg + j] = 1.0      # past-obs rows
            sel_dec[de + 2 * j, ee + Lg + 2 * j] = 1.0         # bottleneck -> decoder slot
        for t in range(L):
            col = 2 * t + 1 if t < ctx else ctx + t
            o_sel[e * L + t, de + col] = 1.0                   # decoder obs rows -> output

    # ---- batch-independent additive bases (slots / PE / mask token) -----------
    slots = np.asarray(params["slots"], f32)
    enc_b = pe[:S_enc].copy()
    for j in range(ctx):
        enc_b[Lg + 2 * j] += slots[j]
    enc_base = np.tile(enc_b, (TB, 1)).astype(f32)

    mask_tok = np.asarray(params["obs_mask_token"], f32)[0, 0]
    dec_b = np.zeros((S_dec, E), f32)
    for j in range(ctx):
        dec_b[2 * j] = pe[j]                                   # bottleneck PE
        dec_b[2 * j + 1] = mask_tok + pe[ctx + j]              # mask token + PE
    for t in range(L - ctx):
        dec_b[2 * ctx + t] = mask_tok + pe[2 * ctx + t]
    dec_base = np.tile(dec_b, (TB, 1)).astype(f32)

    # ---- per-layer weights: pre-split per head, biases folded, stacks packed --
    layers = list(params["enc_layers"]) + list(params["dec_layers"])
    scale = 1.0 / math.sqrt(dh)
    qw_l, qb_l, wo_l, wA_l, bA_l, w2_l, vec_l = [], [], [], [], [], [], []
    for lp in layers:
        wqkv = np.asarray(lp["wqkv"], f32)
        bqkv = np.asarray(lp["bqkv"], f32)
        wo = np.asarray(lp["wo"], f32)
        bo = np.asarray(lp["bo"], f32)
        for qi in range(3):                       # q, k, v -- per head slabs
            for h in range(n_head):
                blk = wqkv[:, qi * E + h * dh: qi * E + (h + 1) * dh]
                qw_l.append(blk * scale if qi == 0 else blk)
        for h in range(n_head):
            qb_l.append(bqkv[h * dh:(h + 1) * dh] * scale)     # scaled q bias
            wo_l.append(wo[h * dh:(h + 1) * dh, :])
        bo_eff = bo + bqkv[2 * E:] @ wo            # fold V bias; K bias is a no-op
        wA_l.append(np.pad(np.asarray(lp["w1"], f32), ((0, 0), (0, W - 4 * E))))
        bA_l.append(np.pad(np.asarray(lp["b1"], f32), (0, W - 4 * E)))
        w2_l.append(np.pad(np.asarray(lp["w2"], f32), ((0, W - 4 * E), (0, 0))))
        vec_l += [lp["ln1_g"], lp["ln1_b"], bo_eff, lp["ln2_g"], lp["ln2_b"], lp["b2"]]
    vec_l += [params["enc_norm_g"], params["enc_norm_b"],
              params["dec_norm_g"], params["dec_norm_b"]]
    # final obs projection shares the (E, W) / (W,) stacks with the FFN w1 / b1
    wA_l.append(np.pad(np.asarray(params["obs_dec_w"], f32), ((0, 0), (0, W - obs_dim))))
    bA_l.append(np.pad(np.asarray(params["obs_dec_b"], f32), (0, W - obs_dim)))

    mmt = MATMUL_DTYPE
    const_list = [
        jnp.asarray(w_comb, mmt),                              # (D_comb, E)
        jnp.asarray(p_enc), jnp.asarray(enc_base), jnp.asarray(mask_enc),
        jnp.asarray(sel_dec), jnp.asarray(dec_base), jnp.asarray(mask_dec),
        jnp.asarray(o_sel),
        jnp.asarray(np.stack([np.asarray(v, f32) for v in vec_l])),        # (nvec, E)
        jnp.asarray(np.stack(qw_l), mmt),                      # (NL*3*n_head, E, dh)
        jnp.asarray(np.stack(qb_l)),                           # (NL*n_head, dh)
        jnp.asarray(np.stack(wo_l), mmt),                      # (NL*n_head, dh, E)
        jnp.asarray(np.stack(wA_l), mmt),                      # (NL+1, E, W)
        jnp.asarray(np.stack(bA_l)),                           # (NL+1, W)
        jnp.asarray(np.stack(w2_l), mmt),                      # (NL, W, E)
    ]

    def const_spec(a):
        # Full-array block, same index every grid step -> DMA'd once, VMEM resident.
        # TODO(synk): for scaled-up configs on v7x (64 MiB VMEM) consider
        # pipeline_mode=pl.Buffered(1) here to avoid double-buffering constants.
        return pl.BlockSpec(a.shape, lambda c, _nd=a.ndim: (0,) * _nd)

    in_specs = [pl.BlockSpec((1, R_tok, D_comb), lambda c: (c, 0, 0))]
    in_specs += [const_spec(a) for a in const_list]
    out_spec = pl.BlockSpec((1, R_out, W), lambda c: (c, 0, 0))

    kernel = functools.partial(_slotmae_kernel, n_head=n_head,
                               n_enc=n_enc, n_dec=n_dec)
    call = pl.pallas_call(
        kernel,
        out_shape=jax.ShapeDtypeStruct((nc, R_out, W), jnp.float32),
        grid=(nc,),
        in_specs=in_specs,
        out_specs=out_spec,
        compiler_params=pltpu.CompilerParams(dimension_semantics=("arbitrary",)),
    )

    def forward(observations, goal, obs_mask):
        assert observations.shape[0] == B
        # Token matrix: per element [Lg goal rows ; ctx past-obs rows], columns =
        # [obs features | goal features | obs-bias indicator | goal-bias indicator].
        # Masked past-obs rows are zeroed entirely (padding_zeros path: embedding
        # zeroed BEFORE positional encoding, which the kernel adds via enc_base).
        keep = (1.0 - obs_mask[:, :ctx].astype(jnp.float32))[..., None]   # (B, ctx, 1)
        obs_part = jnp.concatenate(
            [observations[:, :ctx, :].astype(jnp.float32) * keep,
             jnp.zeros((B, ctx, goal_dim), jnp.float32),
             keep,
             jnp.zeros((B, ctx, 1), jnp.float32)], axis=-1)
        goal_part = jnp.concatenate(
            [jnp.zeros((B, Lg, obs_dim), jnp.float32),
             goal.astype(jnp.float32),
             jnp.zeros((B, Lg, 1), jnp.float32),
             jnp.ones((B, Lg, 1), jnp.float32)], axis=-1)
        tok = jnp.concatenate([goal_part, obs_part], axis=1)              # (B, Lg+ctx, D)
        tok = jnp.pad(tok, ((0, B_pad - B), (0, 0), (0, 0)))
        tok = tok.reshape(nc, R_tok, D_comb)

        pred_pad = call(tok, *const_list)                                 # (nc, R_out, W)
        pred = pred_pad[:, :TB * L, :obs_dim].reshape(B_pad, L, obs_dim)
        return pred[:B]

    return jax.jit(forward)

# TODO(synk): the use_new_stack_so=False / padding_zeros=False branches use
# boolean-mask gathers with data-dependent output shapes (o[obs_mask==0],
# nonzero + argsort restore); those have no static-shape Pallas equivalent and
# are not implemented here.  Dropout (pdrop) is treated as eval-mode identity.
# TODO(synk): on v7x, an explicit 2-TensorCore split (CORE_PARALLEL grid axis or
# pl.core_map) over batch chunks would use both cores; left out to keep the
# single-step kernel maximally portable across v5e/v6e/v7x.


# ----------------------------------------------------------------------------
# Parameters (deterministic, synthetic) & PE
# ----------------------------------------------------------------------------

def sinusoid_pe(max_len, d_model):
    pos = jnp.arange(max_len, dtype=jnp.float32)[:, None]
    div = jnp.exp(jnp.arange(0, d_model, 2, dtype=jnp.float32)
                  * (-math.log(10000.0) / d_model))
    pe = jnp.zeros((max_len, d_model), jnp.float32)
    pe = pe.at[:, 0::2].set(jnp.sin(pos * div))
    pe = pe.at[:, 1::2].set(jnp.cos(pos * div))
    return pe[None]  # (1, max_len, d_model)


def init_params(key, obs_dim, goal_dim, n_slots, E, n_enc, n_dec, max_len=5000):
    keys = iter(jax.random.split(key, 64))

    def nrm(shape, scale=0.02):
        return scale * jax.random.normal(next(keys), shape, dtype=jnp.float32)

    def layer():
        return dict(
            ln1_g=jnp.ones((E,), jnp.float32), ln1_b=jnp.zeros((E,), jnp.float32),
            wqkv=nrm((E, 3 * E)), bqkv=nrm((3 * E,)),
            wo=nrm((E, E)), bo=nrm((E,)),
            ln2_g=jnp.ones((E,), jnp.float32), ln2_b=jnp.zeros((E,), jnp.float32),
            w1=nrm((E, 4 * E)), b1=nrm((4 * E,)),
            w2=nrm((4 * E, E)), b2=nrm((E,)),
        )

    return dict(
        pe=sinusoid_pe(max_len, E),
        slots=jax.random.normal(next(keys), (n_slots, E), dtype=jnp.float32),
        obs_w=nrm((obs_dim, E)), obs_b=nrm((E,)),
        goal_w=nrm((goal_dim, E)), goal_b=nrm((E,)),
        enc_layers=[layer() for _ in range(n_enc)],
        enc_norm_g=jnp.ones((E,), jnp.float32), enc_norm_b=jnp.zeros((E,), jnp.float32),
        obs_mask_token=jnp.zeros((1, 1, E), jnp.float32),   # nn.Parameter(zeros)
        dec_layers=[layer() for _ in range(n_dec)],
        dec_norm_g=jnp.ones((E,), jnp.float32), dec_norm_b=jnp.zeros((E,), jnp.float32),
        obs_dec_w=nrm((E, obs_dim)), obs_dec_b=nrm((obs_dim,)),
    )


# ----------------------------------------------------------------------------
# Main
# ----------------------------------------------------------------------------

if __name__ == "__main__":
    B, L, Lg = 2, 6, 1
    obs_dim, goal_dim = 11, 3
    ctx = n_slots = 4              # module asserts n_slots == ctx_size
    E, n_head = 32, 2
    n_enc, n_dec = 2, 2

    key = jax.random.PRNGKey(0)
    kp, ko, kg, km = jax.random.split(key, 4)
    params = init_params(kp, obs_dim, goal_dim, n_slots, E, n_enc, n_dec)

    observations = jax.random.normal(ko, (B, L, obs_dim), dtype=jnp.float32)
    goal = jax.random.normal(kg, (B, Lg, goal_dim), dtype=jnp.float32)
    obs_mask = jax.random.bernoulli(km, 0.5, (B, L)).astype(jnp.int32)  # 1 = masked

    fwd = make_slotmae_forward(params, obs_dim=obs_dim, goal_dim=goal_dim,
                               L=L, Lg=Lg, ctx=ctx, n_head=n_head, B=B)
    pred = fwd(observations, goal, obs_mask)
    jax.block_until_ready(pred)
    assert pred.shape == (B, L, obs_dim) and pred.dtype == jnp.float32
    print("KERNEL_OK")
</pallas_src>

<mosaic_0001>
module attributes {stable_mosaic.version = 11 : i64} {
  func.func @_slotmae_kernel(%arg0: i32, %arg1: memref<1x10x16xf32, #tpu.memory_space<vmem>>, %arg2: memref<16x32xbf16, #tpu.memory_space<vmem>>, %arg3: memref<18x10xf32, #tpu.memory_space<vmem>>, %arg4: memref<18x32xf32, #tpu.memory_space<vmem>>, %arg5: memref<18x18xf32, #tpu.memory_space<vmem>>, %arg6: memref<20x18xf32, #tpu.memory_space<vmem>>, %arg7: memref<20x32xf32, #tpu.memory_space<vmem>>, %arg8: memref<20x20xf32, #tpu.memory_space<vmem>>, %arg9: memref<16x20xf32, #tpu.memory_space<vmem>>, %arg10: memref<28x32xf32, #tpu.memory_space<vmem>>, %arg11: memref<24x32x16xbf16, #tpu.memory_space<vmem>>, %arg12: memref<8x16xf32, #tpu.memory_space<vmem>>, %arg13: memref<8x16x32xbf16, #tpu.memory_space<vmem>>, %arg14: memref<5x32x128xbf16, #tpu.memory_space<vmem>>, %arg15: memref<5x128xf32, #tpu.memory_space<vmem>>, %arg16: memref<4x128x32xbf16, #tpu.memory_space<vmem>>, %arg17: memref<1x16x128xf32, #tpu.memory_space<vmem>>) attributes {dimension_semantics = [#tpu.dimension_semantics<arbitrary>], iteration_bounds = array<i64: 1>, scalar_prefetch = 0 : i64, scratch_operands = 0 : i64, tpu.core_type = #tpu.core_type<tc>, window_params = [{transform_indices = @transform_0, window_bounds = array<i64: 1, 10, 16>}, {pipeline_mode = #tpu.pipeline_mode<synchronous>, transform_indices = @transform_1, window_bounds = array<i64: 16, 32>}, {pipeline_mode = #tpu.pipeline_mode<synchronous>, transform_indices = @transform_2, window_bounds = array<i64: 18, 10>}, {pipeline_mode = #tpu.pipeline_mode<synchronous>, transform_indices = @transform_3, window_bounds = array<i64: 18, 32>}, {pipeline_mode = #tpu.pipeline_mode<synchronous>, transform_indices = @transform_4, window_bounds = array<i64: 18, 18>}, {pipeline_mode = #tpu.pipeline_mode<synchronous>, transform_indices = @transform_5, window_bounds = array<i64: 20, 18>}, {pipeline_mode = #tpu.pipeline_mode<synchronous>, transform_indices = @transform_6, window_bounds = array<i64: 20, 32>}, {pipeline_mode = #tpu.pipeline_mode<synchronous>, transform_indices = @transform_7, window_bounds = array<i64: 20, 20>}, {pipeline_mode = #tpu.pipeline_mode<synchronous>, transform_indices = @transform_8, window_bounds = array<i64: 16, 20>}, {pipeline_mode = #tpu.pipeline_mode<synchronous>, transform_indices = @transform_9, window_bounds = array<i64: 28, 32>}, {pipeline_mode = #tpu.pipeline_mode<synchronous>, transform_indices = @transform_10, window_bounds = array<i64: 24, 32, 16>}, {pipeline_mode = #tpu.pipeline_mode<synchronous>, transform_indices = @transform_11, window_bounds = array<i64: 8, 16>}, {pipeline_mode = #tpu.pipeline_mode<synchronous>, transform_indices = @transform_12, window_bounds = array<i64: 8, 16, 32>}, {pipeline_mode = #tpu.pipeline_mode<synchronous>, transform_indices = @transform_13, window_bounds = array<i64: 5, 32, 128>}, {pipeline_mode = #tpu.pipeline_mode<synchronous>, transform_indices = @transform_14, window_bounds = array<i64: 5, 128>}, {pipeline_mode = #tpu.pipeline_mode<synchronous>, transform_indices = @transform_15, window_bounds = array<i64: 4, 128, 32>}, {transform_indices = @transform_16, window_bounds = array<i64: 1, 16, 128>}]} {
    %c0 = arith.constant 0 : index
    %c0_0 = arith.constant 0 : index
    %0 = vector.load %arg5[%c0, %c0_0] : memref<18x18xf32, #tpu.memory_space<vmem>>, vector<18x18xf32>
    %c0_1 = arith.constant 0 : index
    %c0_2 = arith.constant 0 : index
    %1 = vector.load %arg8[%c0_1, %c0_2] : memref<20x20xf32, #tpu.memory_space<vmem>>, vector<20x20xf32>
    %c0_3 = arith.constant 0 : index
    %c0_4 = arith.constant 0 : index
    %c0_5 = arith.constant 0 : index
    %2 = vector.load %arg1[%c0_3, %c0_4, %c0_5] : memref<1x10x16xf32, #tpu.memory_space<vmem>>, vector<1x10x16xf32>
    %3 = vector.shape_cast %2 : vector<1x10x16xf32> to vector<10x16xf32>
    %c0_6 = arith.constant 0 : index
    %c0_7 = arith.constant 0 : index
    %4 = vector.load %arg2[%c0_6, %c0_7] : memref<16x32xbf16, #tpu.memory_space<vmem>>, vector<16x32xbf16>
    %5 = arith.truncf %3 : vector<10x16xf32> to vector<10x16xbf16>
    %cst = arith.constant dense<0.000000e+00> : vector<10x32xf32>
    %6 = tpu.matmul %5, %4, %cst {dimension_numbers = #tpu.dot_dimension_numbers<[1], [0], [0], [1], [0, 0, 1, 1], [], []>} : vector<10x16xbf16>, vector<16x32xbf16>, vector<10x32xf32> -> vector<10x32xf32>
    %c0_8 = arith.constant 0 : index
    %c0_9 = arith.constant 0 : index
    %7 = vector.load %arg3[%c0_8, %c0_9] : memref<18x10xf32, #tpu.memory_space<vmem>>, vector<18x10xf32>
    %cst_10 = arith.constant dense<0.000000e+00> : vector<18x32xf32>
    %8 = tpu.matmul %7, %6, %cst_10 {dimension_numbers = #tpu.dot_dimension_numbers<[1], [0], [0], [1], [0, 0, 1, 1], [], []>} : vector<18x10xf32>, vector<10x32xf32>, vector<18x32xf32> -> vector<18x32xf32>
    %c0_11 = arith.constant 0 : index
    %c0_12 = arith.constant 0 : index
    %9 = vector.load %arg4[%c0_11, %c0_12] : memref<18x32xf32, #tpu.memory_space<vmem>>, vector<18x32xf32>
    %10 = arith.addf %8, %9 : vector<18x32xf32>
    %c0_13 = arith.constant 0 : index
    %c0_14 = arith.constant 0 : index
    %11 = vector.load %arg10[%c0_13, %c0_14] : memref<28x32xf32, #tpu.memory_space<vmem>>, vector<1x32xf32>
    %c1 = arith.constant 1 : index
    %c0_15 = arith.constant 0 : index
    %12 = vector.load %arg10[%c1, %c0_15] : memref<28x32xf32, #tpu.memory_space<vmem>>, vector<1x32xf32>
    %cst_16 = arith.constant dense<0.000000e+00> : vector<18xf32>
    %13 = vector.multi_reduction <add>, %10, %cst_16 [1] : vector<18x32xf32> to vector<18xf32>
    %14 = vector.shape_cast %13 : vector<18xf32> to vector<18x1xf32>
    %cst_17 = arith.constant 3.200000e+01 : f32
    %15 = vector.broadcast %cst_17 : f32 to vector<18x1xf32>
    %16 = arith.divf %14, %15 : vector<18x1xf32>
    %17 = vector.broadcast %16 : vector<18x1xf32> to vector<18x32xf32>
    %18 = arith.subf %10, %17 : vector<18x32xf32>
    %19 = arith.mulf %18, %18 : vector<18x32xf32>
    %cst_18 = arith.constant dense<0.000000e+00> : vector<18xf32>
    %20 = vector.multi_reduction <add>, %19, %cst_18 [1] : vector<18x32xf32> to vector<18xf32>
    %21 = vector.shape_cast %20 : vector<18xf32> to vector<18x1xf32>
    %cst_19 = arith.constant 3.200000e+01 : f32
    %22 = vector.broadcast %cst_19 : f32 to vector<18x1xf32>
    %23 = arith.divf %21, %22 : vector<18x1xf32>
    %cst_20 = arith.constant 9.99999974E-6 : f32
    %24 = vector.broadcast %cst_20 : f32 to vector<18x1xf32>
    %25 = arith.addf %23, %24 : vector<18x1xf32>
    %26 = math.rsqrt %25 : vector<18x1xf32>
    %27 = vector.broadcast %26 : vector<18x1xf32> to vector<18x32xf32>
    %28 = arith.mulf %18, %27 : vector<18x32xf32>
    %29 = vector.broadcast %11 : vector<1x32xf32> to vector<18x32xf32>
    %30 = arith.mulf %28, %29 : vector<18x32xf32>
    %31 = vector.broadcast %12 : vector<1x32xf32> to vector<18x32xf32>
    %32 = arith.addf %30, %31 : vector<18x32xf32>
    %33 = arith.truncf %32 : vector<18x32xf32> to vector<18x32xbf16>
    %c0_21 = arith.constant 0 : index
    %c0_22 = arith.constant 0 : index
    %c0_23 = arith.constant 0 : index
    %34 = vector.load %arg11[%c0_21, %c0_22, %c0_23] : memref<24x32x16xbf16, #tpu.memory_space<vmem>>, vector<1x32x16xbf16>
    %35 = vector.shape_cast %34 : vector<1x32x16xbf16> to vector<32x16xbf16>
    %cst_24 = arith.constant dense<0.000000e+00> : vector<18x16xf32>
    %36 = tpu.matmul %33, %35, %cst_24 {dimension_numbers = #tpu.dot_dimension_numbers<[1], [0], [0], [1], [0, 0, 1, 1], [], []>} : vector<18x32xbf16>, vector<32x16xbf16>, vector<18x16xf32> -> vector<18x16xf32>
    %c0_25 = arith.constant 0 : index
    %c0_26 = arith.constant 0 : index
    %37 = vector.load %arg12[%c0_25, %c0_26] : memref<8x16xf32, #tpu.memory_space<vmem>>, vector<1x16xf32>
    %38 = vector.broadcast %37 : vector<1x16xf32> to vector<18x16xf32>
    %39 = arith.addf %36, %38 : vector<18x16xf32>
    %c2 = arith.constant 2 : index
    %c0_27 = arith.constant 0 : index
    %c0_28 = arith.constant 0 : index
    %40 = vector.load %arg11[%c2, %c0_27, %c0_28] : memref<24x32x16xbf16, #tpu.memory_space<vmem>>, vector<1x32x16xbf16>
    %41 = vector.shape_cast %40 : vector<1x32x16xbf16> to vector<32x16xbf16>
    %cst_29 = arith.constant dense<0.000000e+00> : vector<18x16xf32>
    %42 = tpu.matmul %33, %41, %cst_29 {dimension_numbers = #tpu.dot_dimension_numbers<[1], [0], [0], [1], [0, 0, 1, 1], [], []>} : vector<18x32xbf16>, vector<32x16xbf16>, vector<18x16xf32> -> vector<18x16xf32>
    %c4 = arith.constant 4 : index
    %c0_30 = arith.constant 0 : index
    %c0_31 = arith.constant 0 : index
    %43 = vector.load %arg11[%c4, %c0_30, %c0_31] : memref<24x32x16xbf16, #tpu.memory_space<vmem>>, vector<1x32x16xbf16>
    %44 = vector.shape_cast %43 : vector<1x32x16xbf16> to vector<32x16xbf16>
    %cst_32 = arith.constant dense<0.000000e+00> : vector<18x16xf32>
    %45 = tpu.matmul %33, %44, %cst_32 {dimension_numbers = #tpu.dot_dimension_numbers<[1], [0], [0], [1], [0, 0, 1, 1], [], []>} : vector<18x32xbf16>, vector<32x16xbf16>, vector<18x16xf32> -> vector<18x16xf32>
    %46 = arith.truncf %39 : vector<18x16xf32> to vector<18x16xbf16>
    %47 = arith.truncf %42 : vector<18x16xf32> to vector<18x16xbf16>
    %cst_33 = arith.constant dense<0.000000e+00> : vector<18x18xf32>
    %48 = tpu.matmul %46, %47, %cst_33 {dimension_numbers = #tpu.dot_dimension_numbers<[1], [1], [0], [0], [0, 0, 1, 0], [], []>} : vector<18x16xbf16>, vector<18x16xbf16>, vector<18x18xf32> -> vector<18x18xf32>
    %49 = arith.addf %48, %0 : vector<18x18xf32>
    %cst_34 = arith.constant dense<0xFF800000> : vector<18xf32>
    %50 = vector.multi_reduction <maximumf>, %49, %cst_34 [1] : vector<18x18xf32> to vector<18xf32>
    %51 = vector.shape_cast %50 : vector<18xf32> to vector<18x1xf32>
    %52 = vector.broadcast %51 : vector<18x1xf32> to vector<18x18xf32>
    %53 = arith.subf %49, %52 : vector<18x18xf32>
    %54 = math.exp %53 : vector<18x18xf32>
    %cst_35 = arith.constant dense<0.000000e+00> : vector<18xf32>
    %55 = vector.multi_reduction <add>, %54, %cst_35 [1] : vector<18x18xf32> to vector<18xf32>
    %56 = vector.shape_cast %55 : vector<18xf32> to vector<18x1xf32>
    %57 = tpu.reciprocal %56 {approx = true} : vector<18x1xf32> -> vector<18x1xf32>
    %58 = vector.broadcast %57 : vector<18x1xf32> to vector<18x18xf32>
    %59 = arith.mulf %54, %58 : vector<18x18xf32>
    %60 = arith.truncf %59 : vector<18x18xf32> to vector<18x18xbf16>
    %61 = arith.truncf %45 : vector<18x16xf32> to vector<18x16xbf16>
    %cst_36 = arith.constant dense<0.000000e+00> : vector<18x16xf32>
    %62 = tpu.matmul %60, %61, %cst_36 {dimension_numbers = #tpu.dot_dimension_numbers<[1], [0], [0], [1], [0, 0, 1, 1], [], []>} : vector<18x18xbf16>, vector<18x16xbf16>, vector<18x16xf32> -> vector<18x16xf32>
    %c0_37 = arith.constant 0 : index
    %c0_38 = arith.constant 0 : index
    %c0_39 = arith.constant 0 : index
    %63 = vector.load %arg13[%c0_37, %c0_38, %c0_39] : memref<8x16x32xbf16, #tpu.memory_space<vmem>>, vector<1x16x32xbf16>
    %64 = vector.shape_cast %63 : vector<1x16x32xbf16> to vector<16x32xbf16>
    %65 = arith.truncf %62 : vector<18x16xf32> to vector<18x16xbf16>
    %cst_40 = arith.constant dense<0.000000e+00> : vector<18x32xf32>
    %66 = tpu.matmul %65, %64, %cst_40 {dimension_numbers = #tpu.dot_dimension_numbers<[1], [0], [0], [1], [0, 0, 1, 1], [], []>} : vector<18x16xbf16>, vector<16x32xbf16>, vector<18x32xf32> -> vector<18x32xf32>
    %c1_41 = arith.constant 1 : index
    %c0_42 = arith.constant 0 : index
    %c0_43 = arith.constant 0 : index
    %67 = vector.load %arg11[%c1_41, %c0_42, %c0_43] : memref<24x32x16xbf16, #tpu.memory_space<vmem>>, vector<1x32x16xbf16>
    %68 = vector.shape_cast %67 : vector<1x32x16xbf16> to vector<32x16xbf16>
    %cst_44 = arith.constant dense<0.000000e+00> : vector<18x16xf32>
    %69 = tpu.matmul %33, %68, %cst_44 {dimension_numbers = #tpu.dot_dimension_numbers<[1], [0], [0], [1], [0, 0, 1, 1], [], []>} : vector<18x32xbf16>, vector<32x16xbf16>, vector<18x16xf32> -> vector<18x16xf32>
    %c1_45 = arith.constant 1 : index
    %c0_46 = arith.constant 0 : index
    %70 = vector.load %arg12[%c1_45, %c0_46] : memref<8x16xf32, #tpu.memory_space<vmem>>, vector<1x16xf32>
    %71 = vector.broadcast %70 : vector<1x16xf32> to vector<18x16xf32>
    %72 = arith.addf %69, %71 : vector<18x16xf32>
    %c3 = arith.constant 3 : index
    %c0_47 = arith.constant 0 : index
    %c0_48 = arith.constant 0 : index
    %73 = vector.load %arg11[%c3, %c0_47, %c0_48] : memref<24x32x16xbf16, #tpu.memory_space<vmem>>, vector<1x32x16xbf16>
    %74 = vector.shape_cast %73 : vector<1x32x16xbf16> to vector<32x16xbf16>
    %cst_49 = arith.constant dense<0.000000e+00> : vector<18x16xf32>
    %75 = tpu.matmul %33, %74, %cst_49 {dimension_numbers = #tpu.dot_dimension_numbers<[1], [0], [0], [1], [0, 0, 1, 1], [], []>} : vector<18x32xbf16>, vector<32x16xbf16>, vector<18x16xf32> -> vector<18x16xf32>
    %c5 = arith.constant 5 : index
    %c0_50 = arith.constant 0 : index
    %c0_51 = arith.constant 0 : index
    %76 = vector.load %arg11[%c5, %c0_50, %c0_51] : memref<24x32x16xbf16, #tpu.memory_space<vmem>>, vector<1x32x16xbf16>
    %77 = vector.shape_cast %76 : vector<1x32x16xbf16> to vector<32x16xbf16>
    %cst_52 = arith.constant dense<0.000000e+00> : vector<18x16xf32>
    %78 = tpu.matmul %33, %77, %cst_52 {dimension_numbers = #tpu.dot_dimension_numbers<[1], [0], [0], [1], [0, 0, 1, 1], [], []>} : vector<18x32xbf16>, vector<32x16xbf16>, vector<18x16xf32> -> vector<18x16xf32>
    %79 = arith.truncf %72 : vector<18x16xf32> to vector<18x16xbf16>
    %80 = arith.truncf %75 : vector<18x16xf32> to vector<18x16xbf16>
    %cst_53 = arith.constant dense<0.000000e+00> : vector<18x18xf32>
    %81 = tpu.matmul %79, %80, %cst_53 {dimension_numbers = #tpu.dot_dimension_numbers<[1], [1], [0], [0], [0, 0, 1, 0], [], []>} : vector<18x16xbf16>, vector<18x16xbf16>, vector<18x18xf32> -> vector<18x18xf32>
    %82 = arith.addf %81, %0 : vector<18x18xf32>
    %cst_54 = arith.constant dense<0xFF800000> : vector<18xf32>
    %83 = vector.multi_reduction <maximumf>, %82, %cst_54 [1] : vector<18x18xf32> to vector<18xf32>
    %84 = vector.shape_cast %83 : vector<18xf32> to vector<18x1xf32>
    %85 = vector.broadcast %84 : vector<18x1xf32> to vector<18x18xf32>
    %86 = arith.subf %82, %85 : vector<18x18xf32>
    %87 = math.exp %86 : vector<18x18xf32>
    %cst_55 = arith.constant dense<0.000000e+00> : vector<18xf32>
    %88 = vector.multi_reduction <add>, %87, %cst_55 [1] : vector<18x18xf32> to vector<18xf32>
    %89 = vector.shape_cast %88 : vector<18xf32> to vector<18x1xf32>
    %90 = tpu.reciprocal %89 {approx = true} : vector<18x1xf32> -> vector<18x1xf32>
    %91 = vector.broadcast %90 : vector<18x1xf32> to vector<18x18xf32>
    %92 = arith.mulf %87, %91 : vector<18x18xf32>
    %93 = arith.truncf %92 : vector<18x18xf32> to vector<18x18xbf16>
    %94 = arith.truncf %78 : vector<18x16xf32> to vector<18x16xbf16>
    %cst_56 = arith.constant dense<0.000000e+00> : vector<18x16xf32>
    %95 = tpu.matmul %93, %94, %cst_56 {dimension_numbers = #tpu.dot_dimension_numbers<[1], [0], [0], [1], [0, 0, 1, 1], [], []>} : vector<18x18xbf16>, vector<18x16xbf16>, vector<18x16xf32> -> vector<18x16xf32>
    %c1_57 = arith.constant 1 : index
    %c0_58 = arith.constant 0 : index
    %c0_59 = arith.constant 0 : index
    %96 = vector.load %arg13[%c1_57, %c0_58, %c0_59] : memref<8x16x32xbf16, #tpu.memory_space<vmem>>, vector<1x16x32xbf16>
    %97 = vector.shape_cast %96 : vector<1x16x32xbf16> to vector<16x32xbf16>
    %98 = arith.truncf %95 : vector<18x16xf32> to vector<18x16xbf16>
    %cst_60 = arith.constant dense<0.000000e+00> : vector<18x32xf32>
    %99 = tpu.matmul %98, %97, %cst_60 {dimension_numbers = #tpu.dot_dimension_numbers<[1], [0], [0], [1], [0, 0, 1, 1], [], []>} : vector<18x16xbf16>, vector<16x32xbf16>, vector<18x32xf32> -> vector<18x32xf32>
    %100 = arith.addf %66, %99 : vector<18x32xf32>
    %101 = arith.addf %10, %100 : vector<18x32xf32>
    %c2_61 = arith.constant 2 : index
    %c0_62 = arith.constant 0 : index
    %102 = vector.load %arg10[%c2_61, %c0_62] : memref<28x32xf32, #tpu.memory_space<vmem>>, vector<1x32xf32>
    %103 = vector.broadcast %102 : vector<1x32xf32> to vector<18x32xf32>
    %104 = arith.addf %101, %103 : vector<18x32xf32>
    %c3_63 = arith.constant 3 : index
    %c0_64 = arith.constant 0 : index
    %105 = vector.load %arg10[%c3_63, %c0_64] : memref<28x32xf32, #tpu.memory_space<vmem>>, vector<1x32xf32>
    %c4_65 = arith.constant 4 : index
    %c0_66 = arith.constant 0 : index
    %106 = vector.load %arg10[%c4_65, %c0_66] : memref<28x32xf32, #tpu.memory_space<vmem>>, vector<1x32xf32>
    %cst_67 = arith.constant dense<0.000000e+00> : vector<18xf32>
    %107 = vector.multi_reduction <add>, %104, %cst_67 [1] : vector<18x32xf32> to vector<18xf32>
    %108 = vector.shape_cast %107 : vector<18xf32> to vector<18x1xf32>
    %cst_68 = arith.constant 3.200000e+01 : f32
    %109 = vector.broadcast %cst_68 : f32 to vector<18x1xf32>
    %110 = arith.divf %108, %109 : vector<18x1xf32>
    %111 = vector.broadcast %110 : vector<18x1xf32> to vector<18x32xf32>
    %112 = arith.subf %104, %111 : vector<18x32xf32>
    %113 = arith.mulf %112, %112 : vector<18x32xf32>
    %cst_69 = arith.constant dense<0.000000e+00> : vector<18xf32>
    %114 = vector.multi_reduction <add>, %113, %cst_69 [1] : vector<18x32xf32> to vector<18xf32>
    %115 = vector.shape_cast %114 : vector<18xf32> to vector<18x1xf32>
    %cst_70 = arith.constant 3.200000e+01 : f32
    %116 = vector.broadcast %cst_70 : f32 to vector<18x1xf32>
    %117 = arith.divf %115, %116 : vector<18x1xf32>
    %cst_71 = arith.constant 9.99999974E-6 : f32
    %118 = vector.broadcast %cst_71 : f32 to vector<18x1xf32>
    %119 = arith.addf %117, %118 : vector<18x1xf32>
    %120 = math.rsqrt %119 : vector<18x1xf32>
    %121 = vector.broadcast %120 : vector<18x1xf32> to vector<18x32xf32>
    %122 = arith.mulf %112, %121 : vector<18x32xf32>
    %123 = vector.broadcast %105 : vector<1x32xf32> to vector<18x32xf32>
    %124 = arith.mulf %122, %123 : vector<18x32xf32>
    %125 = vector.broadcast %106 : vector<1x32xf32> to vector<18x32xf32>
    %126 = arith.addf %124, %125 : vector<18x32xf32>
    %c0_72 = arith.constant 0 : index
    %c0_73 = arith.constant 0 : index
    %c0_74 = arith.constant 0 : index
    %127 = vector.load %arg14[%c0_72, %c0_73, %c0_74] : memref<5x32x128xbf16, #tpu.memory_space<vmem>>, vector<1x32x128xbf16>
    %128 = vector.shape_cast %127 : vector<1x32x128xbf16> to vector<32x128xbf16>
    %129 = arith.truncf %126 : vector<18x32xf32> to vector<18x32xbf16>
    %cst_75 = arith.constant dense<0.000000e+00> : vector<18x128xf32>
    %130 = tpu.matmul %129, %128, %cst_75 {dimension_numbers = #tpu.dot_dimension_numbers<[1], [0], [0], [1], [0, 0, 1, 1], [], []>} : vector<18x32xbf16>, vector<32x128xbf16>, vector<18x128xf32> -> vector<18x128xf32>
    %c0_76 = arith.constant 0 : index
    %c0_77 = arith.constant 0 : index
    %131 = vector.load %arg15[%c0_76, %c0_77] : memref<5x128xf32, #tpu.memory_space<vmem>>, vector<1x128xf32>
    %132 = vector.broadcast %131 : vector<1x128xf32> to vector<18x128xf32>
    %133 = arith.addf %130, %132 : vector<18x128xf32>
    %cst_78 = arith.constant 0.707106769 : f32
    %134 = vector.broadcast %cst_78 : f32 to vector<18x128xf32>
    %135 = arith.mulf %133, %134 : vector<18x128xf32>
    %136 = math.absf %135 : vector<18x128xf32>
    %cst_79 = arith.constant 0.327591091 : f32
    %137 = vector.broadcast %cst_79 : f32 to vector<18x128xf32>
    %138 = arith.mulf %137, %136 : vector<18x128xf32>
    %cst_80 = arith.constant 1.000000e+00 : f32
    %139 = vector.broadcast %cst_80 : f32 to vector<18x128xf32>
    %140 = arith.addf %139, %138 : vector<18x128xf32>
    %cst_81 = arith.constant 1.000000e+00 : f32
    %141 = vector.broadcast %cst_81 : f32 to vector<18x128xf32>
    %142 = arith.divf %141, %140 : vector<18x128xf32>
    %cst_82 = arith.constant 1.06140542 : f32
    %143 = vector.broadcast %cst_82 : f32 to vector<18x128xf32>
    %144 = arith.mulf %142, %143 : vector<18x128xf32>
    %cst_83 = arith.constant -1.45315206 : f32
    %145 = vector.broadcast %cst_83 : f32 to vector<18x128xf32>
    %146 = arith.addf %145, %144 : vector<18x128xf32>
    %147 = arith.mulf %142, %146 : vector<18x128xf32>
    %cst_84 = arith.constant 1.42141378 : f32
    %148 = vector.broadcast %cst_84 : f32 to vector<18x128xf32>
    %149 = arith.addf %148, %147 : vector<18x128xf32>
    %150 = arith.mulf %142, %149 : vector<18x128xf32>
    %cst_85 = arith.constant -0.284496725 : f32
    %151 = vector.broadcast %cst_85 : f32 to vector<18x128xf32>
    %152 = arith.addf %151, %150 : vector<18x128xf32>
    %153 = arith.mulf %142, %152 : vector<18x128xf32>
    %cst_86 = arith.constant 0.254829586 : f32
    %154 = vector.broadcast %cst_86 : f32 to vector<18x128xf32>
    %155 = arith.addf %154, %153 : vector<18x128xf32>
    %156 = arith.mulf %142, %155 : vector<18x128xf32>
    %cst_87 = arith.constant 0.000000e+00 : f32
    %157 = vector.broadcast %cst_87 : f32 to vector<18x128xf32>
    %158 = arith.subf %157, %136 : vector<18x128xf32>
    %159 = arith.mulf %158, %136 : vector<18x128xf32>
    %160 = math.exp %159 : vector<18x128xf32>
    %161 = arith.mulf %156, %160 : vector<18x128xf32>
    %cst_88 = arith.constant 0.000000e+00 : f32
    %162 = vector.broadcast %cst_88 : f32 to vector<18x128xf32>
    %163 = arith.cmpf oge, %135, %162 : vector<18x128xf32>
    %cst_89 = arith.constant 1.000000e+00 : f32
    %164 = vector.broadcast %cst_89 : f32 to vector<18x128xf32>
    %165 = arith.subf %164, %161 : vector<18x128xf32>
    %cst_90 = arith.constant 1.000000e+00 : f32
    %166 = vector.broadcast %cst_90 : f32 to vector<18x128xf32>
    %167 = arith.subf %161, %166 : vector<18x128xf32>
    %168 = arith.select %163, %165, %167 : vector<18x128xi1>, vector<18x128xf32>
    %cst_91 = arith.constant 5.000000e-01 : f32
    %169 = vector.broadcast %cst_91 : f32 to vector<18x128xf32>
    %170 = arith.mulf %169, %133 : vector<18x128xf32>
    %cst_92 = arith.constant 1.000000e+00 : f32
    %171 = vector.broadcast %cst_92 : f32 to vector<18x128xf32>
    %172 = arith.addf %171, %168 : vector<18x128xf32>
    %173 = arith.mulf %170, %172 : vector<18x128xf32>
    %c0_93 = arith.constant 0 : index
    %c0_94 = arith.constant 0 : index
    %c0_95 = arith.constant 0 : index
    %174 = vector.load %arg16[%c0_93, %c0_94, %c0_95] : memref<4x128x32xbf16, #tpu.memory_space<vmem>>, vector<1x128x32xbf16>
    %175 = vector.shape_cast %174 : vector<1x128x32xbf16> to vector<128x32xbf16>
    %176 = arith.truncf %173 : vector<18x128xf32> to vector<18x128xbf16>
    %cst_96 = arith.constant dense<0.000000e+00> : vector<18x32xf32>
    %177 = tpu.matmul %176, %175, %cst_96 {dimension_numbers = #tpu.dot_dimension_numbers<[1], [0], [0], [1], [0, 0, 1, 1], [], []>} : vector<18x128xbf16>, vector<128x32xbf16>, vector<18x32xf32> -> vector<18x32xf32>
    %c5_97 = arith.constant 5 : index
    %c0_98 = arith.constant 0 : index
    %178 = vector.load %arg10[%c5_97, %c0_98] : memref<28x32xf32, #tpu.memory_space<vmem>>, vector<1x32xf32>
    %179 = vector.broadcast %178 : vector<1x32xf32> to vector<18x32xf32>
    %180 = arith.addf %177, %179 : vector<18x32xf32>
    %181 = arith.addf %104, %180 : vector<18x32xf32>
    %c6 = arith.constant 6 : index
    %c0_99 = arith.constant 0 : index
    %182 = vector.load %arg10[%c6, %c0_99] : memref<28x32xf32, #tpu.memory_space<vmem>>, vector<1x32xf32>
    %c7 = arith.constant 7 : index
    %c0_100 = arith.constant 0 : index
    %183 = vector.load %arg10[%c7, %c0_100] : memref<28x32xf32, #tpu.memory_space<vmem>>, vector<1x32xf32>
    %cst_101 = arith.constant dense<0.000000e+00> : vector<18xf32>
    %184 = vector.multi_reduction <add>, %181, %cst_101 [1] : vector<18x32xf32> to vector<18xf32>
    %185 = vector.shape_cast %184 : vector<18xf32> to vector<18x1xf32>
    %cst_102 = arith.constant 3.200000e+01 : f32
    %186 = vector.broadcast %cst_102 : f32 to vector<18x1xf32>
    %187 = arith.divf %185, %186 : vector<18x1xf32>
    %188 = vector.broadcast %187 : vector<18x1xf32> to vector<18x32xf32>
    %189 = arith.subf %181, %188 : vector<18x32xf32>
    %190 = arith.mulf %189, %189 : vector<18x32xf32>
    %cst_103 = arith.constant dense<0.000000e+00> : vector<18xf32>
    %191 = vector.multi_reduction <add>, %190, %cst_103 [1] : vector<18x32xf32> to vector<18xf32>
    %192 = vector.shape_cast %191 : vector<18xf32> to vector<18x1xf32>
    %cst_104 = arith.constant 3.200000e+01 : f32
    %193 = vector.broadcast %cst_104 : f32 to vector<18x1xf32>
    %194 = arith.divf %192, %193 : vector<18x1xf32>
    %cst_105 = arith.constant 9.99999974E-6 : f32
    %195 = vector.broadcast %cst_105 : f32 to vector<18x1xf32>
    %196 = arith.addf %194, %195 : vector<18x1xf32>
    %197 = math.rsqrt %196 : vector<18x1xf32>
    %198 = vector.broadcast %197 : vector<18x1xf32> to vector<18x32xf32>
    %199 = arith.mulf %189, %198 : vector<18x32xf32>
    %200 = vector.broadcast %182 : vector<1x32xf32> to vector<18x32xf32>
    %201 = arith.mulf %199, %200 : vector<18x32xf32>
    %202 = vector.broadcast %183 : vector<1x32xf32> to vector<18x32xf32>
    %203 = arith.addf %201, %202 : vector<18x32xf32>
    %204 = arith.truncf %203 : vector<18x32xf32> to vector<18x32xbf16>
    %c6_106 = arith.constant 6 : index
    %c0_107 = arith.constant 0 : index
    %c0_108 = arith.constant 0 : index
    %205 = vector.load %arg11[%c6_106, %c0_107, %c0_108] : memref<24x32x16xbf16, #tpu.memory_space<vmem>>, vector<1x32x16xbf16>
    %206 = vector.shape_cast %205 : vector<1x32x16xbf16> to vector<32x16xbf16>
    %cst_109 = arith.constant dense<0.000000e+00> : vector<18x16xf32>
    %207 = tpu.matmul %204, %206, %cst_109 {dimension_numbers = #tpu.dot_dimension_numbers<[1], [0], [0], [1], [0, 0, 1, 1], [], []>} : vector<18x32xbf16>, vector<32x16xbf16>, vector<18x16xf32> -> vector<18x16xf32>
    %c2_110 = arith.constant 2 : index
    %c0_111 = arith.constant 0 : index
    %208 = vector.load %arg12[%c2_110, %c0_111] : memref<8x16xf32, #tpu.memory_space<vmem>>, vector<1x16xf32>
    %209 = vector.broadcast %208 : vector<1x16xf32> to vector<18x16xf32>
    %210 = arith.addf %207, %209 : vector<18x16xf32>
    %c8 = arith.constant 8 : index
    %c0_112 = arith.constant 0 : index
    %c0_113 = arith.constant 0 : index
    %211 = vector.load %arg11[%c8, %c0_112, %c0_113] : memref<24x32x16xbf16, #tpu.memory_space<vmem>>, vector<1x32x16xbf16>
    %212 = vector.shape_cast %211 : vector<1x32x16xbf16> to vector<32x16xbf16>
    %cst_114 = arith.constant dense<0.000000e+00> : vector<18x16xf32>
    %213 = tpu.matmul %204, %212, %cst_114 {dimension_numbers = #tpu.dot_dimension_numbers<[1], [0], [0], [1], [0, 0, 1, 1], [], []>} : vector<18x32xbf16>, vector<32x16xbf16>, vector<18x16xf32> -> vector<18x16xf32>
    %c10 = arith.constant 10 : index
    %c0_115 = arith.constant 0 : index
    %c0_116 = arith.constant 0 : index
    %214 = vector.load %arg11[%c10, %c0_115, %c0_116] : memref<24x32x16xbf16, #tpu.memory_space<vmem>>, vector<1x32x16xbf16>
    %215 = vector.shape_cast %214 : vector<1x32x16xbf16> to vector<32x16xbf16>
    %cst_117 = arith.constant dense<0.000000e+00> : vector<18x16xf32>
    %216 = tpu.matmul %204, %215, %cst_117 {dimension_numbers = #tpu.dot_dimension_numbers<[1], [0], [0], [1], [0, 0, 1, 1], [], []>} : vector<18x32xbf16>, vector<32x16xbf16>, vector<18x16xf32> -> vector<18x16xf32>
    %217 = arith.truncf %210 : vector<18x16xf32> to vector<18x16xbf16>
    %218 = arith.truncf %213 : vector<18x16xf32> to vector<18x16xbf16>
    %cst_118 = arith.constant dense<0.000000e+00> : vector<18x18xf32>
    %219 = tpu.matmul %217, %218, %cst_118 {dimension_numbers = #tpu.dot_dimension_numbers<[1], [1], [0], [0], [0, 0, 1, 0], [], []>} : vector<18x16xbf16>, vector<18x16xbf16>, vector<18x18xf32> -> vector<18x18xf32>
    %220 = arith.addf %219, %0 : vector<18x18xf32>
    %cst_119 = arith.constant dense<0xFF800000> : vector<18xf32>
    %221 = vector.multi_reduction <maximumf>, %220, %cst_119 [1] : vector<18x18xf32> to vector<18xf32>
    %222 = vector.shape_cast %221 : vector<18xf32> to vector<18x1xf32>
    %223 = vector.broadcast %222 : vector<18x1xf32> to vector<18x18xf32>
    %224 = arith.subf %220, %223 : vector<18x18xf32>
    %225 = math.exp %224 : vector<18x18xf32>
    %cst_120 = arith.constant dense<0.000000e+00> : vector<18xf32>
    %226 = vector.multi_reduction <add>, %225, %cst_120 [1] : vector<18x18xf32> to vector<18xf32>
    %227 = vector.shape_cast %226 : vector<18xf32> to vector<18x1xf32>
    %228 = tpu.reciprocal %227 {approx = true} : vector<18x1xf32> -> vector<18x1xf32>
    %229 = vector.broadcast %228 : vector<18x1xf32> to vector<18x18xf32>
    %230 = arith.mulf %225, %229 : vector<18x18xf32>
    %231 = arith.truncf %230 : vector<18x18xf32> to vector<18x18xbf16>
    %232 = arith.truncf %216 : vector<18x16xf32> to vector<18x16xbf16>
    %cst_121 = arith.constant dense<0.000000e+00> : vector<18x16xf32>
    %233 = tpu.matmul %231, %232, %cst_121 {dimension_numbers = #tpu.dot_dimension_numbers<[1], [0], [0], [1], [0, 0, 1, 1], [], []>} : vector<18x18xbf16>, vector<18x16xbf16>, vector<18x16xf32> -> vector<18x16xf32>
    %c2_122 = arith.constant 2 : index
    %c0_123 = arith.constant 0 : index
    %c0_124 = arith.constant 0 : index
    %234 = vector.load %arg13[%c2_122, %c0_123, %c0_124] : memref<8x16x32xbf16, #tpu.memory_space<vmem>>, vector<1x16x32xbf16>
    %235 = vector.shape_cast %234 : vector<1x16x32xbf16> to vector<16x32xbf16>
    %236 = arith.truncf %233 : vector<18x16xf32> to vector<18x16xbf16>
    %cst_125 = arith.constant dense<0.000000e+00> : vector<18x32xf32>
    %237 = tpu.matmul %236, %235, %cst_125 {dimension_numbers = #tpu.dot_dimension_numbers<[1], [0], [0], [1], [0, 0, 1, 1], [], []>} : vector<18x16xbf16>, vector<16x32xbf16>, vector<18x32xf32> -> vector<18x32xf32>
    %c7_126 = arith.constant 7 : index
    %c0_127 = arith.constant 0 : index
    %c0_128 = arith.constant 0 : index
    %238 = vector.load %arg11[%c7_126, %c0_127, %c0_128] : memref<24x32x16xbf16, #tpu.memory_space<vmem>>, vector<1x32x16xbf16>
    %239 = vector.shape_cast %238 : vector<1x32x16xbf16> to vector<32x16xbf16>
    %cst_129 = arith.constant dense<0.000000e+00> : vector<18x16xf32>
    %240 = tpu.matmul %204, %239, %cst_129 {dimension_numbers = #tpu.dot_dimension_numbers<[1], [0], [0], [1], [0, 0, 1, 1], [], []>} : vector<18x32xbf16>, vector<32x16xbf16>, vector<18x16xf32> -> vector<18x16xf32>
    %c3_130 = arith.constant 3 : index
    %c0_131 = arith.constant 0 : index
    %241 = vector.load %arg12[%c3_130, %c0_131] : memref<8x16xf32, #tpu.memory_space<vmem>>, vector<1x16xf32>
    %242 = vector.broadcast %241 : vector<1x16xf32> to vector<18x16xf32>
    %243 = arith.addf %240, %242 : vector<18x16xf32>
    %c9 = arith.constant 9 : index
    %c0_132 = arith.constant 0 : index
    %c0_133 = arith.constant 0 : index
    %244 = vector.load %arg11[%c9, %c0_132, %c0_133] : memref<24x32x16xbf16, #tpu.memory_space<vmem>>, vector<1x32x16xbf16>
    %245 = vector.shape_cast %244 : vector<1x32x16xbf16> to vector<32x16xbf16>
    %cst_134 = arith.constant dense<0.000000e+00> : vector<18x16xf32>
    %246 = tpu.matmul %204, %245, %cst_134 {dimension_numbers = #tpu.dot_dimension_numbers<[1], [0], [0], [1], [0, 0, 1, 1], [], []>} : vector<18x32xbf16>, vector<32x16xbf16>, vector<18x16xf32> -> vector<18x16xf32>
    %c11 = arith.constant 11 : index
    %c0_135 = arith.constant 0 : index
    %c0_136 = arith.constant 0 : index
    %247 = vector.load %arg11[%c11, %c0_135, %c0_136] : memref<24x32x16xbf16, #tpu.memory_space<vmem>>, vector<1x32x16xbf16>
    %248 = vector.shape_cast %247 : vector<1x32x16xbf16> to vector<32x16xbf16>
    %cst_137 = arith.constant dense<0.000000e+00> : vector<18x16xf32>
    %249 = tpu.matmul %204, %248, %cst_137 {dimension_numbers = #tpu.dot_dimension_numbers<[1], [0], [0], [1], [0, 0, 1, 1], [], []>} : vector<18x32xbf16>, vector<32x16xbf16>, vector<18x16xf32> -> vector<18x16xf32>
    %250 = arith.truncf %243 : vector<18x16xf32> to vector<18x16xbf16>
    %251 = arith.truncf %246 : vector<18x16xf32> to vector<18x16xbf16>
    %cst_138 = arith.constant dense<0.000000e+00> : vector<18x18xf32>
    %252 = tpu.matmul %250, %251, %cst_138 {dimension_numbers = #tpu.dot_dimension_numbers<[1], [1], [0], [0], [0, 0, 1, 0], [], []>} : vector<18x16xbf16>, vector<18x16xbf16>, vector<18x18xf32> -> vector<18x18xf32>
    %253 = arith.addf %252, %0 : vector<18x18xf32>
    %cst_139 = arith.constant dense<0xFF800000> : vector<18xf32>
    %254 = vector.multi_reduction <maximumf>, %253, %cst_139 [1] : vector<18x18xf32> to vector<18xf32>
    %255 = vector.shape_cast %254 : vector<18xf32> to vector<18x1xf32>
    %256 = vector.broadcast %255 : vector<18x1xf32> to vector<18x18xf32>
    %257 = arith.subf %253, %256 : vector<18x18xf32>
    %258 = math.exp %257 : vector<18x18xf32>
    %cst_140 = arith.constant dense<0.000000e+00> : vector<18xf32>
    %259 = vector.multi_reduction <add>, %258, %cst_140 [1] : vector<18x18xf32> to vector<18xf32>
    %260 = vector.shape_cast %259 : vector<18xf32> to vector<18x1xf32>
    %261 = tpu.reciprocal %260 {approx = true} : vector<18x1xf32> -> vector<18x1xf32>
    %262 = vector.broadcast %261 : vector<18x1xf32> to vector<18x18xf32>
    %263 = arith.mulf %258, %262 : vector<18x18xf32>
    %264 = arith.truncf %263 : vector<18x18xf32> to vector<18x18xbf16>
    %265 = arith.truncf %249 : vector<18x16xf32> to vector<18x16xbf16>
    %cst_141 = arith.constant dense<0.000000e+00> : vector<18x16xf32>
    %266 = tpu.matmul %264, %265, %cst_141 {dimension_numbers = #tpu.dot_dimension_numbers<[1], [0], [0], [1], [0, 0, 1, 1], [], []>} : vector<18x18xbf16>, vector<18x16xbf16>, vector<18x16xf32> -> vector<18x16xf32>
    %c3_142 = arith.constant 3 : index
    %c0_143 = arith.constant 0 : index
    %c0_144 = arith.constant 0 : index
    %267 = vector.load %arg13[%c3_142, %c0_143, %c0_144] : memref<8x16x32xbf16, #tpu.memory_space<vmem>>, vector<1x16x32xbf16>
    %268 = vector.shape_cast %267 : vector<1x16x32xbf16> to vector<16x32xbf16>
    %269 = arith.truncf %266 : vector<18x16xf32> to vector<18x16xbf16>
    %cst_145 = arith.constant dense<0.000000e+00> : vector<18x32xf32>
    %270 = tpu.matmul %269, %268, %cst_145 {dimension_numbers = #tpu.dot_dimension_numbers<[1], [0], [0], [1], [0, 0, 1, 1], [], []>} : vector<18x16xbf16>, vector<16x32xbf16>, vector<18x32xf32> -> vector<18x32xf32>
    %271 = arith.addf %237, %270 : vector<18x32xf32>
    %272 = arith.addf %181, %271 : vector<18x32xf32>
    %c8_146 = arith.constant 8 : index
    %c0_147 = arith.constant 0 : index
    %273 = vector.load %arg10[%c8_146, %c0_147] : memref<28x32xf32, #tpu.memory_space<vmem>>, vector<1x32xf32>
    %274 = vector.broadcast %273 : vector<1x32xf32> to vector<18x32xf32>
    %275 = arith.addf %272, %274 : vector<18x32xf32>
    %c9_148 = arith.constant 9 : index
    %c0_149 = arith.constant 0 : index
    %276 = vector.load %arg10[%c9_148, %c0_149] : memref<28x32xf32, #tpu.memory_space<vmem>>, vector<1x32xf32>
    %c10_150 = arith.constant 10 : index
    %c0_151 = arith.constant 0 : index
    %277 = vector.load %arg10[%c10_150, %c0_151] : memref<28x32xf32, #tpu.memory_space<vmem>>, vector<1x32xf32>
    %cst_152 = arith.constant dense<0.000000e+00> : vector<18xf32>
    %278 = vector.multi_reduction <add>, %275, %cst_152 [1] : vector<18x32xf32> to vector<18xf32>
    %279 = vector.shape_cast %278 : vector<18xf32> to vector<18x1xf32>
    %cst_153 = arith.constant 3.200000e+01 : f32
    %280 = vector.broadcast %cst_153 : f32 to vector<18x1xf32>
    %281 = arith.divf %279, %280 : vector<18x1xf32>
    %282 = vector.broadcast %281 : vector<18x1xf32> to vector<18x32xf32>
    %283 = arith.subf %275, %282 : vector<18x32xf32>
    %284 = arith.mulf %283, %283 : vector<18x32xf32>
    %cst_154 = arith.constant dense<0.000000e+00> : vector<18xf32>
    %285 = vector.multi_reduction <add>, %284, %cst_154 [1] : vector<18x32xf32> to vector<18xf32>
    %286 = vector.shape_cast %285 : vector<18xf32> to vector<18x1xf32>
    %cst_155 = arith.constant 3.200000e+01 : f32
    %287 = vector.broadcast %cst_155 : f32 to vector<18x1xf32>
    %288 = arith.divf %286, %287 : vector<18x1xf32>
    %cst_156 = arith.constant 9.99999974E-6 : f32
    %289 = vector.broadcast %cst_156 : f32 to vector<18x1xf32>
    %290 = arith.addf %288, %289 : vector<18x1xf32>
    %291 = math.rsqrt %290 : vector<18x1xf32>
    %292 = vector.broadcast %291 : vector<18x1xf32> to vector<18x32xf32>
    %293 = arith.mulf %283, %292 : vector<18x32xf32>
    %294 = vector.broadcast %276 : vector<1x32xf32> to vector<18x32xf32>
    %295 = arith.mulf %293, %294 : vector<18x32xf32>
    %296 = vector.broadcast %277 : vector<1x32xf32> to vector<18x32xf32>
    %297 = arith.addf %295, %296 : vector<18x32xf32>
    %c1_157 = arith.constant 1 : index
    %c0_158 = arith.constant 0 : index
    %c0_159 = arith.constant 0 : index
    %298 = vector.load %arg14[%c1_157, %c0_158, %c0_159] : memref<5x32x128xbf16, #tpu.memory_space<vmem>>, vector<1x32x128xbf16>
    %299 = vector.shape_cast %298 : vector<1x32x128xbf16> to vector<32x128xbf16>
    %300 = arith.truncf %297 : vector<18x32xf32> to vector<18x32xbf16>
    %cst_160 = arith.constant dense<0.000000e+00> : vector<18x128xf32>
    %301 = tpu.matmul %300, %299, %cst_160 {dimension_numbers = #tpu.dot_dimension_numbers<[1], [0], [0], [1], [0, 0, 1, 1], [], []>} : vector<18x32xbf16>, vector<32x128xbf16>, vector<18x128xf32> -> vector<18x128xf32>
    %c1_161 = arith.constant 1 : index
    %c0_162 = arith.constant 0 : index
    %302 = vector.load %arg15[%c1_161, %c0_162] : memref<5x128xf32, #tpu.memory_space<vmem>>, vector<1x128xf32>
    %303 = vector.broadcast %302 : vector<1x128xf32> to vector<18x128xf32>
    %304 = arith.addf %301, %303 : vector<18x128xf32>
    %cst_163 = arith.constant 0.707106769 : f32
    %305 = vector.broadcast %cst_163 : f32 to vector<18x128xf32>
    %306 = arith.mulf %304, %305 : vector<18x128xf32>
    %307 = math.absf %306 : vector<18x128xf32>
    %cst_164 = arith.constant 0.327591091 : f32
    %308 = vector.broadcast %cst_164 : f32 to vector<18x128xf32>
    %309 = arith.mulf %308, %307 : vector<18x128xf32>
    %cst_165 = arith.constant 1.000000e+00 : f32
    %310 = vector.broadcast %cst_165 : f32 to vector<18x128xf32>
    %311 = arith.addf %310, %309 : vector<18x128xf32>
    %cst_166 = arith.constant 1.000000e+00 : f32
    %312 = vector.broadcast %cst_166 : f32 to vector<18x128xf32>
    %313 = arith.divf %312, %311 : vector<18x128xf32>
    %cst_167 = arith.constant 1.06140542 : f32
    %314 = vector.broadcast %cst_167 : f32 to vector<18x128xf32>
    %315 = arith.mulf %313, %314 : vector<18x128xf32>
    %cst_168 = arith.constant -1.45315206 : f32
    %316 = vector.broadcast %cst_168 : f32 to vector<18x128xf32>
    %317 = arith.addf %316, %315 : vector<18x128xf32>
    %318 = arith.mulf %313, %317 : vector<18x128xf32>
    %cst_169 = arith.constant 1.42141378 : f32
    %319 = vector.broadcast %cst_169 : f32 to vector<18x128xf32>
    %320 = arith.addf %319, %318 : vector<18x128xf32>
    %321 = arith.mulf %313, %320 : vector<18x128xf32>
    %cst_170 = arith.constant -0.284496725 : f32
    %322 = vector.broadcast %cst_170 : f32 to vector<18x128xf32>
    %323 = arith.addf %322, %321 : vector<18x128xf32>
    %324 = arith.mulf %313, %323 : vector<18x128xf32>
    %cst_171 = arith.constant 0.254829586 : f32
    %325 = vector.broadcast %cst_171 : f32 to vector<18x128xf32>
    %326 = arith.addf %325, %324 : vector<18x128xf32>
    %327 = arith.mulf %313, %326 : vector<18x128xf32>
    %cst_172 = arith.constant 0.000000e+00 : f32
    %328 = vector.broadcast %cst_172 : f32 to vector<18x128xf32>
    %329 = arith.subf %328, %307 : vector<18x128xf32>
    %330 = arith.mulf %329, %307 : vector<18x128xf32>
    %331 = math.exp %330 : vector<18x128xf32>
    %332 = arith.mulf %327, %331 : vector<18x128xf32>
    %cst_173 = arith.constant 0.000000e+00 : f32
    %333 = vector.broadcast %cst_173 : f32 to vector<18x128xf32>
    %334 = arith.cmpf oge, %306, %333 : vector<18x128xf32>
    %cst_174 = arith.constant 1.000000e+00 : f32
    %335 = vector.broadcast %cst_174 : f32 to vector<18x128xf32>
    %336 = arith.subf %335, %332 : vector<18x128xf32>
    %cst_175 = arith.constant 1.000000e+00 : f32
    %337 = vector.broadcast %cst_175 : f32 to vector<18x128xf32>
    %338 = arith.subf %332, %337 : vector<18x128xf32>
    %339 = arith.select %334, %336, %338 : vector<18x128xi1>, vector<18x128xf32>
    %cst_176 = arith.constant 5.000000e-01 : f32
    %340 = vector.broadcast %cst_176 : f32 to vector<18x128xf32>
    %341 = arith.mulf %340, %304 : vector<18x128xf32>
    %cst_177 = arith.constant 1.000000e+00 : f32
    %342 = vector.broadcast %cst_177 : f32 to vector<18x128xf32>
    %343 = arith.addf %342, %339 : vector<18x128xf32>
    %344 = arith.mulf %341, %343 : vector<18x128xf32>
    %c1_178 = arith.constant 1 : index
    %c0_179 = arith.constant 0 : index
    %c0_180 = arith.constant 0 : index
    %345 = vector.load %arg16[%c1_178, %c0_179, %c0_180] : memref<4x128x32xbf16, #tpu.memory_space<vmem>>, vector<1x128x32xbf16>
    %346 = vector.shape_cast %345 : vector<1x128x32xbf16> to vector<128x32xbf16>
    %347 = arith.truncf %344 : vector<18x128xf32> to vector<18x128xbf16>
    %cst_181 = arith.constant dense<0.000000e+00> : vector<18x32xf32>
    %348 = tpu.matmul %347, %346, %cst_181 {dimension_numbers = #tpu.dot_dimension_numbers<[1], [0], [0], [1], [0, 0, 1, 1], [], []>} : vector<18x128xbf16>, vector<128x32xbf16>, vector<18x32xf32> -> vector<18x32xf32>
    %c11_182 = arith.constant 11 : index
    %c0_183 = arith.constant 0 : index
    %349 = vector.load %arg10[%c11_182, %c0_183] : memref<28x32xf32, #tpu.memory_space<vmem>>, vector<1x32xf32>
    %350 = vector.broadcast %349 : vector<1x32xf32> to vector<18x32xf32>
    %351 = arith.addf %348, %350 : vector<18x32xf32>
    %352 = arith.addf %275, %351 : vector<18x32xf32>
    %c24 = arith.constant 24 : index
    %c0_184 = arith.constant 0 : index
    %353 = vector.load %arg10[%c24, %c0_184] : memref<28x32xf32, #tpu.memory_space<vmem>>, vector<1x32xf32>
    %c25 = arith.constant 25 : index
    %c0_185 = arith.constant 0 : index
    %354 = vector.load %arg10[%c25, %c0_185] : memref<28x32xf32, #tpu.memory_space<vmem>>, vector<1x32xf32>
    %cst_186 = arith.constant dense<0.000000e+00> : vector<18xf32>
    %355 = vector.multi_reduction <add>, %352, %cst_186 [1] : vector<18x32xf32> to vector<18xf32>
    %356 = vector.shape_cast %355 : vector<18xf32> to vector<18x1xf32>
    %cst_187 = arith.constant 3.200000e+01 : f32
    %357 = vector.broadcast %cst_187 : f32 to vector<18x1xf32>
    %358 = arith.divf %356, %357 : vector<18x1xf32>
    %359 = vector.broadcast %358 : vector<18x1xf32> to vector<18x32xf32>
    %360 = arith.subf %352, %359 : vector<18x32xf32>
    %361 = arith.mulf %360, %360 : vector<18x32xf32>
    %cst_188 = arith.constant dense<0.000000e+00> : vector<18xf32>
    %362 = vector.multi_reduction <add>, %361, %cst_188 [1] : vector<18x32xf32> to vector<18xf32>
    %363 = vector.shape_cast %362 : vector<18xf32> to vector<18x1xf32>
    %cst_189 = arith.constant 3.200000e+01 : f32
    %364 = vector.broadcast %cst_189 : f32 to vector<18x1xf32>
    %365 = arith.divf %363, %364 : vector<18x1xf32>
    %cst_190 = arith.constant 9.99999974E-6 : f32
    %366 = vector.broadcast %cst_190 : f32 to vector<18x1xf32>
    %367 = arith.addf %365, %366 : vector<18x1xf32>
    %368 = math.rsqrt %367 : vector<18x1xf32>
    %369 = vector.broadcast %368 : vector<18x1xf32> to vector<18x32xf32>
    %370 = arith.mulf %360, %369 : vector<18x32xf32>
    %371 = vector.broadcast %353 : vector<1x32xf32> to vector<18x32xf32>
    %372 = arith.mulf %370, %371 : vector<18x32xf32>
    %373 = vector.broadcast %354 : vector<1x32xf32> to vector<18x32xf32>
    %374 = arith.addf %372, %373 : vector<18x32xf32>
    %c0_191 = arith.constant 0 : index
    %c0_192 = arith.constant 0 : index
    %375 = vector.load %arg6[%c0_191, %c0_192] : memref<20x18xf32, #tpu.memory_space<vmem>>, vector<20x18xf32>
    %cst_193 = arith.constant dense<0.000000e+00> : vector<20x32xf32>
    %376 = tpu.matmul %375, %374, %cst_193 {dimension_numbers = #tpu.dot_dimension_numbers<[1], [0], [0], [1], [0, 0, 1, 1], [], []>} : vector<20x18xf32>, vector<18x32xf32>, vector<20x32xf32> -> vector<20x32xf32>
    %c0_194 = arith.constant 0 : index
    %c0_195 = arith.constant 0 : index
    %377 = vector.load %arg7[%c0_194, %c0_195] : memref<20x32xf32, #tpu.memory_space<vmem>>, vector<20x32xf32>
    %378 = arith.addf %376, %377 : vector<20x32xf32>
    %c12 = arith.constant 12 : index
    %c0_196 = arith.constant 0 : index
    %379 = vector.load %arg10[%c12, %c0_196] : memref<28x32xf32, #tpu.memory_space<vmem>>, vector<1x32xf32>
    %c13 = arith.constant 13 : index
    %c0_197 = arith.constant 0 : index
    %380 = vector.load %arg10[%c13, %c0_197] : memref<28x32xf32, #tpu.memory_space<vmem>>, vector<1x32xf32>
    %cst_198 = arith.constant dense<0.000000e+00> : vector<20xf32>
    %381 = vector.multi_reduction <add>, %378, %cst_198 [1] : vector<20x32xf32> to vector<20xf32>
    %382 = vector.shape_cast %381 : vector<20xf32> to vector<20x1xf32>
    %cst_199 = arith.constant 3.200000e+01 : f32
    %383 = vector.broadcast %cst_199 : f32 to vector<20x1xf32>
    %384 = arith.divf %382, %383 : vector<20x1xf32>
    %385 = vector.broadcast %384 : vector<20x1xf32> to vector<20x32xf32>
    %386 = arith.subf %378, %385 : vector<20x32xf32>
    %387 = arith.mulf %386, %386 : vector<20x32xf32>
    %cst_200 = arith.constant dense<0.000000e+00> : vector<20xf32>
    %388 = vector.multi_reduction <add>, %387, %cst_200 [1] : vector<20x32xf32> to vector<20xf32>
    %389 = vector.shape_cast %388 : vector<20xf32> to vector<20x1xf32>
    %cst_201 = arith.constant 3.200000e+01 : f32
    %390 = vector.broadcast %cst_201 : f32 to vector<20x1xf32>
    %391 = arith.divf %389, %390 : vector<20x1xf32>
    %cst_202 = arith.constant 9.99999974E-6 : f32
    %392 = vector.broadcast %cst_202 : f32 to vector<20x1xf32>
    %393 = arith.addf %391, %392 : vector<20x1xf32>
    %394 = math.rsqrt %393 : vector<20x1xf32>
    %395 = vector.broadcast %394 : vector<20x1xf32> to vector<20x32xf32>
    %396 = arith.mulf %386, %395 : vector<20x32xf32>
    %397 = vector.broadcast %379 : vector<1x32xf32> to vector<20x32xf32>
    %398 = arith.mulf %396, %397 : vector<20x32xf32>
    %399 = vector.broadcast %380 : vector<1x32xf32> to vector<20x32xf32>
    %400 = arith.addf %398, %399 : vector<20x32xf32>
    %401 = arith.truncf %400 : vector<20x32xf32> to vector<20x32xbf16>
    %c12_203 = arith.constant 12 : index
    %c0_204 = arith.constant 0 : index
    %c0_205 = arith.constant 0 : index
    %402 = vector.load %arg11[%c12_203, %c0_204, %c0_205] : memref<24x32x16xbf16, #tpu.memory_space<vmem>>, vector<1x32x16xbf16>
    %403 = vector.shape_cast %402 : vector<1x32x16xbf16> to vector<32x16xbf16>
    %cst_206 = arith.constant dense<0.000000e+00> : vector<20x16xf32>
    %404 = tpu.matmul %401, %403, %cst_206 {dimension_numbers = #tpu.dot_dimension_numbers<[1], [0], [0], [1], [0, 0, 1, 1], [], []>} : vector<20x32xbf16>, vector<32x16xbf16>, vector<20x16xf32> -> vector<20x16xf32>
    %c4_207 = arith.constant 4 : index
    %c0_208 = arith.constant 0 : index
    %405 = vector.load %arg12[%c4_207, %c0_208] : memref<8x16xf32, #tpu.memory_space<vmem>>, vector<1x16xf32>
    %406 = vector.broadcast %405 : vector<1x16xf32> to vector<20x16xf32>
    %407 = arith.addf %404, %406 : vector<20x16xf32>
    %c14 = arith.constant 14 : index
    %c0_209 = arith.constant 0 : index
    %c0_210 = arith.constant 0 : index
    %408 = vector.load %arg11[%c14, %c0_209, %c0_210] : memref<24x32x16xbf16, #tpu.memory_space<vmem>>, vector<1x32x16xbf16>
    %409 = vector.shape_cast %408 : vector<1x32x16xbf16> to vector<32x16xbf16>
    %cst_211 = arith.constant dense<0.000000e+00> : vector<20x16xf32>
    %410 = tpu.matmul %401, %409, %cst_211 {dimension_numbers = #tpu.dot_dimension_numbers<[1], [0], [0], [1], [0, 0, 1, 1], [], []>} : vector<20x32xbf16>, vector<32x16xbf16>, vector<20x16xf32> -> vector<20x16xf32>
    %c16 = arith.constant 16 : index
    %c0_212 = arith.constant 0 : index
    %c0_213 = arith.constant 0 : index
    %411 = vector.load %arg11[%c16, %c0_212, %c0_213] : memref<24x32x16xbf16, #tpu.memory_space<vmem>>, vector<1x32x16xbf16>
    %412 = vector.shape_cast %411 : vector<1x32x16xbf16> to vector<32x16xbf16>
    %cst_214 = arith.constant dense<0.000000e+00> : vector<20x16xf32>
    %413 = tpu.matmul %401, %412, %cst_214 {dimension_numbers = #tpu.dot_dimension_numbers<[1], [0], [0], [1], [0, 0, 1, 1], [], []>} : vector<20x32xbf16>, vector<32x16xbf16>, vector<20x16xf32> -> vector<20x16xf32>
    %414 = arith.truncf %407 : vector<20x16xf32> to vector<20x16xbf16>
    %415 = arith.truncf %410 : vector<20x16xf32> to vector<20x16xbf16>
    %cst_215 = arith.constant dense<0.000000e+00> : vector<20x20xf32>
    %416 = tpu.matmul %414, %415, %cst_215 {dimension_numbers = #tpu.dot_dimension_numbers<[1], [1], [0], [0], [0, 0, 1, 0], [], []>} : vector<20x16xbf16>, vector<20x16xbf16>, vector<20x20xf32> -> vector<20x20xf32>
    %417 = arith.addf %416, %1 : vector<20x20xf32>
    %cst_216 = arith.constant dense<0xFF800000> : vector<20xf32>
    %418 = vector.multi_reduction <maximumf>, %417, %cst_216 [1] : vector<20x20xf32> to vector<20xf32>
    %419 = vector.shape_cast %418 : vector<20xf32> to vector<20x1xf32>
    %420 = vector.broadcast %419 : vector<20x1xf32> to vector<20x20xf32>
    %421 = arith.subf %417, %420 : vector<20x20xf32>
    %422 = math.exp %421 : vector<20x20xf32>
    %cst_217 = arith.constant dense<0.000000e+00> : vector<20xf32>
    %423 = vector.multi_reduction <add>, %422, %cst_217 [1] : vector<20x20xf32> to vector<20xf32>
    %424 = vector.shape_cast %423 : vector<20xf32> to vector<20x1xf32>
    %425 = tpu.reciprocal %424 {approx = true} : vector<20x1xf32> -> vector<20x1xf32>
    %426 = vector.broadcast %425 : vector<20x1xf32> to vector<20x20xf32>
    %427 = arith.mulf %422, %426 : vector<20x20xf32>
    %428 = arith.truncf %427 : vector<20x20xf32> to vector<20x20xbf16>
    %429 = arith.truncf %413 : vector<20x16xf32> to vector<20x16xbf16>
    %cst_218 = arith.constant dense<0.000000e+00> : vector<20x16xf32>
    %430 = tpu.matmul %428, %429, %cst_218 {dimension_numbers = #tpu.dot_dimension_numbers<[1], [0], [0], [1], [0, 0, 1, 1], [], []>} : vector<20x20xbf16>, vector<20x16xbf16>, vector<20x16xf32> -> vector<20x16xf32>
    %c4_219 = arith.constant 4 : index
    %c0_220 = arith.constant 0 : index
    %c0_221 = arith.constant 0 : index
    %431 = vector.load %arg13[%c4_219, %c0_220, %c0_221] : memref<8x16x32xbf16, #tpu.memory_space<vmem>>, vector<1x16x32xbf16>
    %432 = vector.shape_cast %431 : vector<1x16x32xbf16> to vector<16x32xbf16>
    %433 = arith.truncf %430 : vector<20x16xf32> to vector<20x16xbf16>
    %cst_222 = arith.constant dense<0.000000e+00> : vector<20x32xf32>
    %434 = tpu.matmul %433, %432, %cst_222 {dimension_numbers = #tpu.dot_dimension_numbers<[1], [0], [0], [1], [0, 0, 1, 1], [], []>} : vector<20x16xbf16>, vector<16x32xbf16>, vector<20x32xf32> -> vector<20x32xf32>
    %c13_223 = arith.constant 13 : index
    %c0_224 = arith.constant 0 : index
    %c0_225 = arith.constant 0 : index
    %435 = vector.load %arg11[%c13_223, %c0_224, %c0_225] : memref<24x32x16xbf16, #tpu.memory_space<vmem>>, vector<1x32x16xbf16>
    %436 = vector.shape_cast %435 : vector<1x32x16xbf16> to vector<32x16xbf16>
    %cst_226 = arith.constant dense<0.000000e+00> : vector<20x16xf32>
    %437 = tpu.matmul %401, %436, %cst_226 {dimension_numbers = #tpu.dot_dimension_numbers<[1], [0], [0], [1], [0, 0, 1, 1], [], []>} : vector<20x32xbf16>, vector<32x16xbf16>, vector<20x16xf32> -> vector<20x16xf32>
    %c5_227 = arith.constant 5 : index
    %c0_228 = arith.constant 0 : index
    %438 = vector.load %arg12[%c5_227, %c0_228] : memref<8x16xf32, #tpu.memory_space<vmem>>, vector<1x16xf32>
    %439 = vector.broadcast %438 : vector<1x16xf32> to vector<20x16xf32>
    %440 = arith.addf %437, %439 : vector<20x16xf32>
    %c15 = arith.constant 15 : index
    %c0_229 = arith.constant 0 : index
    %c0_230 = arith.constant 0 : index
    %441 = vector.load %arg11[%c15, %c0_229, %c0_230] : memref<24x32x16xbf16, #tpu.memory_space<vmem>>, vector<1x32x16xbf16>
    %442 = vector.shape_cast %441 : vector<1x32x16xbf16> to vector<32x16xbf16>
    %cst_231 = arith.constant dense<0.000000e+00> : vector<20x16xf32>
    %443 = tpu.matmul %401, %442, %cst_231 {dimension_numbers = #tpu.dot_dimension_numbers<[1], [0], [0], [1], [0, 0, 1, 1], [], []>} : vector<20x32xbf16>, vector<32x16xbf16>, vector<20x16xf32> -> vector<20x16xf32>
    %c17 = arith.constant 17 : index
    %c0_232 = arith.constant 0 : index
    %c0_233 = arith.constant 0 : index
    %444 = vector.load %arg11[%c17, %c0_232, %c0_233] : memref<24x32x16xbf16, #tpu.memory_space<vmem>>, vector<1x32x16xbf16>
    %445 = vector.shape_cast %444 : vector<1x32x16xbf16> to vector<32x16xbf16>
    %cst_234 = arith.constant dense<0.000000e+00> : vector<20x16xf32>
    %446 = tpu.matmul %401, %445, %cst_234 {dimension_numbers = #tpu.dot_dimension_numbers<[1], [0], [0], [1], [0, 0, 1, 1], [], []>} : vector<20x32xbf16>, vector<32x16xbf16>, vector<20x16xf32> -> vector<20x16xf32>
    %447 = arith.truncf %440 : vector<20x16xf32> to vector<20x16xbf16>
    %448 = arith.truncf %443 : vector<20x16xf32> to vector<20x16xbf16>
    %cst_235 = arith.constant dense<0.000000e+00> : vector<20x20xf32>
    %449 = tpu.matmul %447, %448, %cst_235 {dimension_numbers = #tpu.dot_dimension_numbers<[1], [1], [0], [0], [0, 0, 1, 0], [], []>} : vector<20x16xbf16>, vector<20x16xbf16>, vector<20x20xf32> -> vector<20x20xf32>
    %450 = arith.addf %449, %1 : vector<20x20xf32>
    %cst_236 = arith.constant dense<0xFF800000> : vector<20xf32>
    %451 = vector.multi_reduction <maximumf>, %450, %cst_236 [1] : vector<20x20xf32> to vector<20xf32>
    %452 = vector.shape_cast %451 : vector<20xf32> to vector<20x1xf32>
    %453 = vector.broadcast %452 : vector<20x1xf32> to vector<20x20xf32>
    %454 = arith.subf %450, %453 : vector<20x20xf32>
    %455 = math.exp %454 : vector<20x20xf32>
    %cst_237 = arith.constant dense<0.000000e+00> : vector<20xf32>
    %456 = vector.multi_reduction <add>, %455, %cst_237 [1] : vector<20x20xf32> to vector<20xf32>
    %457 = vector.shape_cast %456 : vector<20xf32> to vector<20x1xf32>
    %458 = tpu.reciprocal %457 {approx = true} : vector<20x1xf32> -> vector<20x1xf32>
    %459 = vector.broadcast %458 : vector<20x1xf32> to vector<20x20xf32>
    %460 = arith.mulf %455, %459 : vector<20x20xf32>
    %461 = arith.truncf %460 : vector<20x20xf32> to vector<20x20xbf16>
    %462 = arith.truncf %446 : vector<20x16xf32> to vector<20x16xbf16>
    %cst_238 = arith.constant dense<0.000000e+00> : vector<20x16xf32>
    %463 = tpu.matmul %461, %462, %cst_238 {dimension_numbers = #tpu.dot_dimension_numbers<[1], [0], [0], [1], [0, 0, 1, 1], [], []>} : vector<20x20xbf16>, vector<20x16xbf16>, vector<20x16xf32> -> vector<20x16xf32>
    %c5_239 = arith.constant 5 : index
    %c0_240 = arith.constant 0 : index
    %c0_241 = arith.constant 0 : index
    %464 = vector.load %arg13[%c5_239, %c0_240, %c0_241] : memref<8x16x32xbf16, #tpu.memory_space<vmem>>, vector<1x16x32xbf16>
    %465 = vector.shape_cast %464 : vector<1x16x32xbf16> to vector<16x32xbf16>
    %466 = arith.truncf %463 : vector<20x16xf32> to vector<20x16xbf16>
    %cst_242 = arith.constant dense<0.000000e+00> : vector<20x32xf32>
    %467 = tpu.matmul %466, %465, %cst_242 {dimension_numbers = #tpu.dot_dimension_numbers<[1], [0], [0], [1], [0, 0, 1, 1], [], []>} : vector<20x16xbf16>, vector<16x32xbf16>, vector<20x32xf32> -> vector<20x32xf32>
    %468 = arith.addf %434, %467 : vector<20x32xf32>
    %469 = arith.addf %378, %468 : vector<20x32xf32>
    %c14_243 = arith.constant 14 : index
    %c0_244 = arith.constant 0 : index
    %470 = vector.load %arg10[%c14_243, %c0_244] : memref<28x32xf32, #tpu.memory_space<vmem>>, vector<1x32xf32>
    %471 = vector.broadcast %470 : vector<1x32xf32> to vector<20x32xf32>
    %472 = arith.addf %469, %471 : vector<20x32xf32>
    %c15_245 = arith.constant 15 : index
    %c0_246 = arith.constant 0 : index
    %473 = vector.load %arg10[%c15_245, %c0_246] : memref<28x32xf32, #tpu.memory_space<vmem>>, vector<1x32xf32>
    %c16_247 = arith.constant 16 : index
    %c0_248 = arith.constant 0 : index
    %474 = vector.load %arg10[%c16_247, %c0_248] : memref<28x32xf32, #tpu.memory_space<vmem>>, vector<1x32xf32>
    %cst_249 = arith.constant dense<0.000000e+00> : vector<20xf32>
    %475 = vector.multi_reduction <add>, %472, %cst_249 [1] : vector<20x32xf32> to vector<20xf32>
    %476 = vector.shape_cast %475 : vector<20xf32> to vector<20x1xf32>
    %cst_250 = arith.constant 3.200000e+01 : f32
    %477 = vector.broadcast %cst_250 : f32 to vector<20x1xf32>
    %478 = arith.divf %476, %477 : vector<20x1xf32>
    %479 = vector.broadcast %478 : vector<20x1xf32> to vector<20x32xf32>
    %480 = arith.subf %472, %479 : vector<20x32xf32>
    %481 = arith.mulf %480, %480 : vector<20x32xf32>
    %cst_251 = arith.constant dense<0.000000e+00> : vector<20xf32>
    %482 = vector.multi_reduction <add>, %481, %cst_251 [1] : vector<20x32xf32> to vector<20xf32>
    %483 = vector.shape_cast %482 : vector<20xf32> to vector<20x1xf32>
    %cst_252 = arith.constant 3.200000e+01 : f32
    %484 = vector.broadcast %cst_252 : f32 to vector<20x1xf32>
    %485 = arith.divf %483, %484 : vector<20x1xf32>
    %cst_253 = arith.constant 9.99999974E-6 : f32
    %486 = vector.broadcast %cst_253 : f32 to vector<20x1xf32>
    %487 = arith.addf %485, %486 : vector<20x1xf32>
    %488 = math.rsqrt %487 : vector<20x1xf32>
    %489 = vector.broadcast %488 : vector<20x1xf32> to vector<20x32xf32>
    %490 = arith.mulf %480, %489 : vector<20x32xf32>
    %491 = vector.broadcast %473 : vector<1x32xf32> to vector<20x32xf32>
    %492 = arith.mulf %490, %491 : vector<20x32xf32>
    %493 = vector.broadcast %474 : vector<1x32xf32> to vector<20x32xf32>
    %494 = arith.addf %492, %493 : vector<20x32xf32>
    %c2_254 = arith.constant 2 : index
    %c0_255 = arith.constant 0 : index
    %c0_256 = arith.constant 0 : index
    %495 = vector.load %arg14[%c2_254, %c0_255, %c0_256] : memref<5x32x128xbf16, #tpu.memory_space<vmem>>, vector<1x32x128xbf16>
    %496 = vector.shape_cast %495 : vector<1x32x128xbf16> to vector<32x128xbf16>
    %497 = arith.truncf %494 : vector<20x32xf32> to vector<20x32xbf16>
    %cst_257 = arith.constant dense<0.000000e+00> : vector<20x128xf32>
    %498 = tpu.matmul %497, %496, %cst_257 {dimension_numbers = #tpu.dot_dimension_numbers<[1], [0], [0], [1], [0, 0, 1, 1], [], []>} : vector<20x32xbf16>, vector<32x128xbf16>, vector<20x128xf32> -> vector<20x128xf32>
    %c2_258 = arith.constant 2 : index
    %c0_259 = arith.constant 0 : index
    %499 = vector.load %arg15[%c2_258, %c0_259] : memref<5x128xf32, #tpu.memory_space<vmem>>, vector<1x128xf32>
    %500 = vector.broadcast %499 : vector<1x128xf32> to vector<20x128xf32>
    %501 = arith.addf %498, %500 : vector<20x128xf32>
    %cst_260 = arith.constant 0.707106769 : f32
    %502 = vector.broadcast %cst_260 : f32 to vector<20x128xf32>
    %503 = arith.mulf %501, %502 : vector<20x128xf32>
    %504 = math.absf %503 : vector<20x128xf32>
    %cst_261 = arith.constant 0.327591091 : f32
    %505 = vector.broadcast %cst_261 : f32 to vector<20x128xf32>
    %506 = arith.mulf %505, %504 : vector<20x128xf32>
    %cst_262 = arith.constant 1.000000e+00 : f32
    %507 = vector.broadcast %cst_262 : f32 to vector<20x128xf32>
    %508 = arith.addf %507, %506 : vector<20x128xf32>
    %cst_263 = arith.constant 1.000000e+00 : f32
    %509 = vector.broadcast %cst_263 : f32 to vector<20x128xf32>
    %510 = arith.divf %509, %508 : vector<20x128xf32>
    %cst_264 = arith.constant 1.06140542 : f32
    %511 = vector.broadcast %cst_264 : f32 to vector<20x128xf32>
    %512 = arith.mulf %510, %511 : vector<20x128xf32>
    %cst_265 = arith.constant -1.45315206 : f32
    %513 = vector.broadcast %cst_265 : f32 to vector<20x128xf32>
    %514 = arith.addf %513, %512 : vector<20x128xf32>
    %515 = arith.mulf %510, %514 : vector<20x128xf32>
    %cst_266 = arith.constant 1.42141378 : f32
    %516 = vector.broadcast %cst_266 : f32 to vector<20x128xf32>
    %517 = arith.addf %516, %515 : vector<20x128xf32>
    %518 = arith.mulf %510, %517 : vector<20x128xf32>
    %cst_267 = arith.constant -0.284496725 : f32
    %519 = vector.broadcast %cst_267 : f32 to vector<20x128xf32>
    %520 = arith.addf %519, %518 : vector<20x128xf32>
    %521 = arith.mulf %510, %520 : vector<20x128xf32>
    %cst_268 = arith.constant 0.254829586 : f32
    %522 = vector.broadcast %cst_268 : f32 to vector<20x128xf32>
    %523 = arith.addf %522, %521 : vector<20x128xf32>
    %524 = arith.mulf %510, %523 : vector<20x128xf32>
    %cst_269 = arith.constant 0.000000e+00 : f32
    %525 = vector.broadcast %cst_269 : f32 to vector<20x128xf32>
    %526 = arith.subf %525, %504 : vector<20x128xf32>
    %527 = arith.mulf %526, %504 : vector<20x128xf32>
    %528 = math.exp %527 : vector<20x128xf32>
    %529 = arith.mulf %524, %528 : vector<20x128xf32>
    %cst_270 = arith.constant 0.000000e+00 : f32
    %530 = vector.broadcast %cst_270 : f32 to vector<20x128xf32>
    %531 = arith.cmpf oge, %503, %530 : vector<20x128xf32>
    %cst_271 = arith.constant 1.000000e+00 : f32
    %532 = vector.broadcast %cst_271 : f32 to vector<20x128xf32>
    %533 = arith.subf %532, %529 : vector<20x128xf32>
    %cst_272 = arith.constant 1.000000e+00 : f32
    %534 = vector.broadcast %cst_272 : f32 to vector<20x128xf32>
    %535 = arith.subf %529, %534 : vector<20x128xf32>
    %536 = arith.select %531, %533, %535 : vector<20x128xi1>, vector<20x128xf32>
    %cst_273 = arith.constant 5.000000e-01 : f32
    %537 = vector.broadcast %cst_273 : f32 to vector<20x128xf32>
    %538 = arith.mulf %537, %501 : vector<20x128xf32>
    %cst_274 = arith.constant 1.000000e+00 : f32
    %539 = vector.broadcast %cst_274 : f32 to vector<20x128xf32>
    %540 = arith.addf %539, %536 : vector<20x128xf32>
    %541 = arith.mulf %538, %540 : vector<20x128xf32>
    %c2_275 = arith.constant 2 : index
    %c0_276 = arith.constant 0 : index
    %c0_277 = arith.constant 0 : index
    %542 = vector.load %arg16[%c2_275, %c0_276, %c0_277] : memref<4x128x32xbf16, #tpu.memory_space<vmem>>, vector<1x128x32xbf16>
    %543 = vector.shape_cast %542 : vector<1x128x32xbf16> to vector<128x32xbf16>
    %544 = arith.truncf %541 : vector<20x128xf32> to vector<20x128xbf16>
    %cst_278 = arith.constant dense<0.000000e+00> : vector<20x32xf32>
    %545 = tpu.matmul %544, %543, %cst_278 {dimension_numbers = #tpu.dot_dimension_numbers<[1], [0], [0], [1], [0, 0, 1, 1], [], []>} : vector<20x128xbf16>, vector<128x32xbf16>, vector<20x32xf32> -> vector<20x32xf32>
    %c17_279 = arith.constant 17 : index
    %c0_280 = arith.constant 0 : index
    %546 = vector.load %arg10[%c17_279, %c0_280] : memref<28x32xf32, #tpu.memory_space<vmem>>, vector<1x32xf32>
    %547 = vector.broadcast %546 : vector<1x32xf32> to vector<20x32xf32>
    %548 = arith.addf %545, %547 : vector<20x32xf32>
    %549 = arith.addf %472, %548 : vector<20x32xf32>
    %c18 = arith.constant 18 : index
    %c0_281 = arith.constant 0 : index
    %550 = vector.load %arg10[%c18, %c0_281] : memref<28x32xf32, #tpu.memory_space<vmem>>, vector<1x32xf32>
    %c19 = arith.constant 19 : index
    %c0_282 = arith.constant 0 : index
    %551 = vector.load %arg10[%c19, %c0_282] : memref<28x32xf32, #tpu.memory_space<vmem>>, vector<1x32xf32>
    %cst_283 = arith.constant dense<0.000000e+00> : vector<20xf32>
    %552 = vector.multi_reduction <add>, %549, %cst_283 [1] : vector<20x32xf32> to vector<20xf32>
    %553 = vector.shape_cast %552 : vector<20xf32> to vector<20x1xf32>
    %cst_284 = arith.constant 3.200000e+01 : f32
    %554 = vector.broadcast %cst_284 : f32 to vector<20x1xf32>
    %555 = arith.divf %553, %554 : vector<20x1xf32>
    %556 = vector.broadcast %555 : vector<20x1xf32> to vector<20x32xf32>
    %557 = arith.subf %549, %556 : vector<20x32xf32>
    %558 = arith.mulf %557, %557 : vector<20x32xf32>
    %cst_285 = arith.constant dense<0.000000e+00> : vector<20xf32>
    %559 = vector.multi_reduction <add>, %558, %cst_285 [1] : vector<20x32xf32> to vector<20xf32>
    %560 = vector.shape_cast %559 : vector<20xf32> to vector<20x1xf32>
    %cst_286 = arith.constant 3.200000e+01 : f32
    %561 = vector.broadcast %cst_286 : f32 to vector<20x1xf32>
    %562 = arith.divf %560, %561 : vector<20x1xf32>
    %cst_287 = arith.constant 9.99999974E-6 : f32
    %563 = vector.broadcast %cst_287 : f32 to vector<20x1xf32>
    %564 = arith.addf %562, %563 : vector<20x1xf32>
    %565 = math.rsqrt %564 : vector<20x1xf32>
    %566 = vector.broadcast %565 : vector<20x1xf32> to vector<20x32xf32>
    %567 = arith.mulf %557, %566 : vector<20x32xf32>
    %568 = vector.broadcast %550 : vector<1x32xf32> to vector<20x32xf32>
    %569 = arith.mulf %567, %568 : vector<20x32xf32>
    %570 = vector.broadcast %551 : vector<1x32xf32> to vector<20x32xf32>
    %571 = arith.addf %569, %570 : vector<20x32xf32>
    %572 = arith.truncf %571 : vector<20x32xf32> to vector<20x32xbf16>
    %c18_288 = arith.constant 18 : index
    %c0_289 = arith.constant 0 : index
    %c0_290 = arith.constant 0 : index
    %573 = vector.load %arg11[%c18_288, %c0_289, %c0_290] : memref<24x32x16xbf16, #tpu.memory_space<vmem>>, vector<1x32x16xbf16>
    %574 = vector.shape_cast %573 : vector<1x32x16xbf16> to vector<32x16xbf16>
    %cst_291 = arith.constant dense<0.000000e+00> : vector<20x16xf32>
    %575 = tpu.matmul %572, %574, %cst_291 {dimension_numbers = #tpu.dot_dimension_numbers<[1], [0], [0], [1], [0, 0, 1, 1], [], []>} : vector<20x32xbf16>, vector<32x16xbf16>, vector<20x16xf32> -> vector<20x16xf32>
    %c6_292 = arith.constant 6 : index
    %c0_293 = arith.constant 0 : index
    %576 = vector.load %arg12[%c6_292, %c0_293] : memref<8x16xf32, #tpu.memory_space<vmem>>, vector<1x16xf32>
    %577 = vector.broadcast %576 : vector<1x16xf32> to vector<20x16xf32>
    %578 = arith.addf %575, %577 : vector<20x16xf32>
    %c20 = arith.constant 20 : index
    %c0_294 = arith.constant 0 : index
    %c0_295 = arith.constant 0 : index
    %579 = vector.load %arg11[%c20, %c0_294, %c0_295] : memref<24x32x16xbf16, #tpu.memory_space<vmem>>, vector<1x32x16xbf16>
    %580 = vector.shape_cast %579 : vector<1x32x16xbf16> to vector<32x16xbf16>
    %cst_296 = arith.constant dense<0.000000e+00> : vector<20x16xf32>
    %581 = tpu.matmul %572, %580, %cst_296 {dimension_numbers = #tpu.dot_dimension_numbers<[1], [0], [0], [1], [0, 0, 1, 1], [], []>} : vector<20x32xbf16>, vector<32x16xbf16>, vector<20x16xf32> -> vector<20x16xf32>
    %c22 = arith.constant 22 : index
    %c0_297 = arith.constant 0 : index
    %c0_298 = arith.constant 0 : index
    %582 = vector.load %arg11[%c22, %c0_297, %c0_298] : memref<24x32x16xbf16, #tpu.memory_space<vmem>>, vector<1x32x16xbf16>
    %583 = vector.shape_cast %582 : vector<1x32x16xbf16> to vector<32x16xbf16>
    %cst_299 = arith.constant dense<0.000000e+00> : vector<20x16xf32>
    %584 = tpu.matmul %572, %583, %cst_299 {dimension_numbers = #tpu.dot_dimension_numbers<[1], [0], [0], [1], [0, 0, 1, 1], [], []>} : vector<20x32xbf16>, vector<32x16xbf16>, vector<20x16xf32> -> vector<20x16xf32>
    %585 = arith.truncf %578 : vector<20x16xf32> to vector<20x16xbf16>
    %586 = arith.truncf %581 : vector<20x16xf32> to vector<20x16xbf16>
    %cst_300 = arith.constant dense<0.000000e+00> : vector<20x20xf32>
    %587 = tpu.matmul %585, %586, %cst_300 {dimension_numbers = #tpu.dot_dimension_numbers<[1], [1], [0], [0], [0, 0, 1, 0], [], []>} : vector<20x16xbf16>, vector<20x16xbf16>, vector<20x20xf32> -> vector<20x20xf32>
    %588 = arith.addf %587, %1 : vector<20x20xf32>
    %cst_301 = arith.constant dense<0xFF800000> : vector<20xf32>
    %589 = vector.multi_reduction <maximumf>, %588, %cst_301 [1] : vector<20x20xf32> to vector<20xf32>
    %590 = vector.shape_cast %589 : vector<20xf32> to vector<20x1xf32>
    %591 = vector.broadcast %590 : vector<20x1xf32> to vector<20x20xf32>
    %592 = arith.subf %588, %591 : vector<20x20xf32>
    %593 = math.exp %592 : vector<20x20xf32>
    %cst_302 = arith.constant dense<0.000000e+00> : vector<20xf32>
    %594 = vector.multi_reduction <add>, %593, %cst_302 [1] : vector<20x20xf32> to vector<20xf32>
    %595 = vector.shape_cast %594 : vector<20xf32> to vector<20x1xf32>
    %596 = tpu.reciprocal %595 {approx = true} : vector<20x1xf32> -> vector<20x1xf32>
    %597 = vector.broadcast %596 : vector<20x1xf32> to vector<20x20xf32>
    %598 = arith.mulf %593, %597 : vector<20x20xf32>
    %599 = arith.truncf %598 : vector<20x20xf32> to vector<20x20xbf16>
    %600 = arith.truncf %584 : vector<20x16xf32> to vector<20x16xbf16>
    %cst_303 = arith.constant dense<0.000000e+00> : vector<20x16xf32>
    %601 = tpu.matmul %599, %600, %cst_303 {dimension_numbers = #tpu.dot_dimension_numbers<[1], [0], [0], [1], [0, 0, 1, 1], [], []>} : vector<20x20xbf16>, vector<20x16xbf16>, vector<20x16xf32> -> vector<20x16xf32>
    %c6_304 = arith.constant 6 : index
    %c0_305 = arith.constant 0 : index
    %c0_306 = arith.constant 0 : index
    %602 = vector.load %arg13[%c6_304, %c0_305, %c0_306] : memref<8x16x32xbf16, #tpu.memory_space<vmem>>, vector<1x16x32xbf16>
    %603 = vector.shape_cast %602 : vector<1x16x32xbf16> to vector<16x32xbf16>
    %604 = arith.truncf %601 : vector<20x16xf32> to vector<20x16xbf16>
    %cst_307 = arith.constant dense<0.000000e+00> : vector<20x32xf32>
    %605 = tpu.matmul %604, %603, %cst_307 {dimension_numbers = #tpu.dot_dimension_numbers<[1], [0], [0], [1], [0, 0, 1, 1], [], []>} : vector<20x16xbf16>, vector<16x32xbf16>, vector<20x32xf32> -> vector<20x32xf32>
    %c19_308 = arith.constant 19 : index
    %c0_309 = arith.constant 0 : index
    %c0_310 = arith.constant 0 : index
    %606 = vector.load %arg11[%c19_308, %c0_309, %c0_310] : memref<24x32x16xbf16, #tpu.memory_space<vmem>>, vector<1x32x16xbf16>
    %607 = vector.shape_cast %606 : vector<1x32x16xbf16> to vector<32x16xbf16>
    %cst_311 = arith.constant dense<0.000000e+00> : vector<20x16xf32>
    %608 = tpu.matmul %572, %607, %cst_311 {dimension_numbers = #tpu.dot_dimension_numbers<[1], [0], [0], [1], [0, 0, 1, 1], [], []>} : vector<20x32xbf16>, vector<32x16xbf16>, vector<20x16xf32> -> vector<20x16xf32>
    %c7_312 = arith.constant 7 : index
    %c0_313 = arith.constant 0 : index
    %609 = vector.load %arg12[%c7_312, %c0_313] : memref<8x16xf32, #tpu.memory_space<vmem>>, vector<1x16xf32>
    %610 = vector.broadcast %609 : vector<1x16xf32> to vector<20x16xf32>
    %611 = arith.addf %608, %610 : vector<20x16xf32>
    %c21 = arith.constant 21 : index
    %c0_314 = arith.constant 0 : index
    %c0_315 = arith.constant 0 : index
    %612 = vector.load %arg11[%c21, %c0_314, %c0_315] : memref<24x32x16xbf16, #tpu.memory_space<vmem>>, vector<1x32x16xbf16>
    %613 = vector.shape_cast %612 : vector<1x32x16xbf16> to vector<32x16xbf16>
    %cst_316 = arith.constant dense<0.000000e+00> : vector<20x16xf32>
    %614 = tpu.matmul %572, %613, %cst_316 {dimension_numbers = #tpu.dot_dimension_numbers<[1], [0], [0], [1], [0, 0, 1, 1], [], []>} : vector<20x32xbf16>, vector<32x16xbf16>, vector<20x16xf32> -> vector<20x16xf32>
    %c23 = arith.constant 23 : index
    %c0_317 = arith.constant 0 : index
    %c0_318 = arith.constant 0 : index
    %615 = vector.load %arg11[%c23, %c0_317, %c0_318] : memref<24x32x16xbf16, #tpu.memory_space<vmem>>, vector<1x32x16xbf16>
    %616 = vector.shape_cast %615 : vector<1x32x16xbf16> to vector<32x16xbf16>
    %cst_319 = arith.constant dense<0.000000e+00> : vector<20x16xf32>
    %617 = tpu.matmul %572, %616, %cst_319 {dimension_numbers = #tpu.dot_dimension_numbers<[1], [0], [0], [1], [0, 0, 1, 1], [], []>} : vector<20x32xbf16>, vector<32x16xbf16>, vector<20x16xf32> -> vector<20x16xf32>
    %618 = arith.truncf %611 : vector<20x16xf32> to vector<20x16xbf16>
    %619 = arith.truncf %614 : vector<20x16xf32> to vector<20x16xbf16>
    %cst_320 = arith.constant dense<0.000000e+00> : vector<20x20xf32>
    %620 = tpu.matmul %618, %619, %cst_320 {dimension_numbers = #tpu.dot_dimension_numbers<[1], [1], [0], [0], [0, 0, 1, 0], [], []>} : vector<20x16xbf16>, vector<20x16xbf16>, vector<20x20xf32> -> vector<20x20xf32>
    %621 = arith.addf %620, %1 : vector<20x20xf32>
    %cst_321 = arith.constant dense<0xFF800000> : vector<20xf32>
    %622 = vector.multi_reduction <maximumf>, %621, %cst_321 [1] : vector<20x20xf32> to vector<20xf32>
    %623 = vector.shape_cast %622 : vector<20xf32> to vector<20x1xf32>
    %624 = vector.broadcast %623 : vector<20x1xf32> to vector<20x20xf32>
    %625 = arith.subf %621, %624 : vector<20x20xf32>
    %626 = math.exp %625 : vector<20x20xf32>
    %cst_322 = arith.constant dense<0.000000e+00> : vector<20xf32>
    %627 = vector.multi_reduction <add>, %626, %cst_322 [1] : vector<20x20xf32> to vector<20xf32>
    %628 = vector.shape_cast %627 : vector<20xf32> to vector<20x1xf32>
    %629 = tpu.reciprocal %628 {approx = true} : vector<20x1xf32> -> vector<20x1xf32>
    %630 = vector.broadcast %629 : vector<20x1xf32> to vector<20x20xf32>
    %631 = arith.mulf %626, %630 : vector<20x20xf32>
    %632 = arith.truncf %631 : vector<20x20xf32> to vector<20x20xbf16>
    %633 = arith.truncf %617 : vector<20x16xf32> to vector<20x16xbf16>
    %cst_323 = arith.constant dense<0.000000e+00> : vector<20x16xf32>
    %634 = tpu.matmul %632, %633, %cst_323 {dimension_numbers = #tpu.dot_dimension_numbers<[1], [0], [0], [1], [0, 0, 1, 1], [], []>} : vector<20x20xbf16>, vector<20x16xbf16>, vector<20x16xf32> -> vector<20x16xf32>
    %c7_324 = arith.constant 7 : index
    %c0_325 = arith.constant 0 : index
    %c0_326 = arith.constant 0 : index
    %635 = vector.load %arg13[%c7_324, %c0_325, %c0_326] : memref<8x16x32xbf16, #tpu.memory_space<vmem>>, vector<1x16x32xbf16>
    %636 = vector.shape_cast %635 : vector<1x16x32xbf16> to vector<16x32xbf16>
    %637 = arith.truncf %634 : vector<20x16xf32> to vector<20x16xbf16>
    %cst_327 = arith.constant dense<0.000000e+00> : vector<20x32xf32>
    %638 = tpu.matmul %637, %636, %cst_327 {dimension_numbers = #tpu.dot_dimension_numbers<[1], [0], [0], [1], [0, 0, 1, 1], [], []>} : vector<20x16xbf16>, vector<16x32xbf16>, vector<20x32xf32> -> vector<20x32xf32>
    %639 = arith.addf %605, %638 : vector<20x32xf32>
    %640 = arith.addf %549, %639 : vector<20x32xf32>
    %c20_328 = arith.constant 20 : index
    %c0_329 = arith.constant 0 : index
    %641 = vector.load %arg10[%c20_328, %c0_329] : memref<28x32xf32, #tpu.memory_space<vmem>>, vector<1x32xf32>
    %642 = vector.broadcast %641 : vector<1x32xf32> to vector<20x32xf32>
    %643 = arith.addf %640, %642 : vector<20x32xf32>
    %c21_330 = arith.constant 21 : index
    %c0_331 = arith.constant 0 : index
    %644 = vector.load %arg10[%c21_330, %c0_331] : memref<28x32xf32, #tpu.memory_space<vmem>>, vector<1x32xf32>
    %c22_332 = arith.constant 22 : index
    %c0_333 = arith.constant 0 : index
    %645 = vector.load %arg10[%c22_332, %c0_333] : memref<28x32xf32, #tpu.memory_space<vmem>>, vector<1x32xf32>
    %cst_334 = arith.constant dense<0.000000e+00> : vector<20xf32>
    %646 = vector.multi_reduction <add>, %643, %cst_334 [1] : vector<20x32xf32> to vector<20xf32>
    %647 = vector.shape_cast %646 : vector<20xf32> to vector<20x1xf32>
    %cst_335 = arith.constant 3.200000e+01 : f32
    %648 = vector.broadcast %cst_335 : f32 to vector<20x1xf32>
    %649 = arith.divf %647, %648 : vector<20x1xf32>
    %650 = vector.broadcast %649 : vector<20x1xf32> to vector<20x32xf32>
    %651 = arith.subf %643, %650 : vector<20x32xf32>
    %652 = arith.mulf %651, %651 : vector<20x32xf32>
    %cst_336 = arith.constant dense<0.000000e+00> : vector<20xf32>
    %653 = vector.multi_reduction <add>, %652, %cst_336 [1] : vector<20x32xf32> to vector<20xf32>
    %654 = vector.shape_cast %653 : vector<20xf32> to vector<20x1xf32>
    %cst_337 = arith.constant 3.200000e+01 : f32
    %655 = vector.broadcast %cst_337 : f32 to vector<20x1xf32>
    %656 = arith.divf %654, %655 : vector<20x1xf32>
    %cst_338 = arith.constant 9.99999974E-6 : f32
    %657 = vector.broadcast %cst_338 : f32 to vector<20x1xf32>
    %658 = arith.addf %656, %657 : vector<20x1xf32>
    %659 = math.rsqrt %658 : vector<20x1xf32>
    %660 = vector.broadcast %659 : vector<20x1xf32> to vector<20x32xf32>
    %661 = arith.mulf %651, %660 : vector<20x32xf32>
    %662 = vector.broadcast %644 : vector<1x32xf32> to vector<20x32xf32>
    %663 = arith.mulf %661, %662 : vector<20x32xf32>
    %664 = vector.broadcast %645 : vector<1x32xf32> to vector<20x32xf32>
    %665 = arith.addf %663, %664 : vector<20x32xf32>
    %c3_339 = arith.constant 3 : index
    %c0_340 = arith.constant 0 : index
    %c0_341 = arith.constant 0 : index
    %666 = vector.load %arg14[%c3_339, %c0_340, %c0_341] : memref<5x32x128xbf16, #tpu.memory_space<vmem>>, vector<1x32x128xbf16>
    %667 = vector.shape_cast %666 : vector<1x32x128xbf16> to vector<32x128xbf16>
    %668 = arith.truncf %665 : vector<20x32xf32> to vector<20x32xbf16>
    %cst_342 = arith.constant dense<0.000000e+00> : vector<20x128xf32>
    %669 = tpu.matmul %668, %667, %cst_342 {dimension_numbers = #tpu.dot_dimension_numbers<[1], [0], [0], [1], [0, 0, 1, 1], [], []>} : vector<20x32xbf16>, vector<32x128xbf16>, vector<20x128xf32> -> vector<20x128xf32>
    %c3_343 = arith.constant 3 : index
    %c0_344 = arith.constant 0 : index
    %670 = vector.load %arg15[%c3_343, %c0_344] : memref<5x128xf32, #tpu.memory_space<vmem>>, vector<1x128xf32>
    %671 = vector.broadcast %670 : vector<1x128xf32> to vector<20x128xf32>
    %672 = arith.addf %669, %671 : vector<20x128xf32>
    %cst_345 = arith.constant 0.707106769 : f32
    %673 = vector.broadcast %cst_345 : f32 to vector<20x128xf32>
    %674 = arith.mulf %672, %673 : vector<20x128xf32>
    %675 = math.absf %674 : vector<20x128xf32>
    %cst_346 = arith.constant 0.327591091 : f32
    %676 = vector.broadcast %cst_346 : f32 to vector<20x128xf32>
    %677 = arith.mulf %676, %675 : vector<20x128xf32>
    %cst_347 = arith.constant 1.000000e+00 : f32
    %678 = vector.broadcast %cst_347 : f32 to vector<20x128xf32>
    %679 = arith.addf %678, %677 : vector<20x128xf32>
    %cst_348 = arith.constant 1.000000e+00 : f32
    %680 = vector.broadcast %cst_348 : f32 to vector<20x128xf32>
    %681 = arith.divf %680, %679 : vector<20x128xf32>
    %cst_349 = arith.constant 1.06140542 : f32
    %682 = vector.broadcast %cst_349 : f32 to vector<20x128xf32>
    %683 = arith.mulf %681, %682 : vector<20x128xf32>
    %cst_350 = arith.constant -1.45315206 : f32
    %684 = vector.broadcast %cst_350 : f32 to vector<20x128xf32>
    %685 = arith.addf %684, %683 : vector<20x128xf32>
    %686 = arith.mulf %681, %685 : vector<20x128xf32>
    %cst_351 = arith.constant 1.42141378 : f32
    %687 = vector.broadcast %cst_351 : f32 to vector<20x128xf32>
    %688 = arith.addf %687, %686 : vector<20x128xf32>
    %689 = arith.mulf %681, %688 : vector<20x128xf32>
    %cst_352 = arith.constant -0.284496725 : f32
    %690 = vector.broadcast %cst_352 : f32 to vector<20x128xf32>
    %691 = arith.addf %690, %689 : vector<20x128xf32>
    %692 = arith.mulf %681, %691 : vector<20x128xf32>
    %cst_353 = arith.constant 0.254829586 : f32
    %693 = vector.broadcast %cst_353 : f32 to vector<20x128xf32>
    %694 = arith.addf %693, %692 : vector<20x128xf32>
    %695 = arith.mulf %681, %694 : vector<20x128xf32>
    %cst_354 = arith.constant 0.000000e+00 : f32
    %696 = vector.broadcast %cst_354 : f32 to vector<20x128xf32>
    %697 = arith.subf %696, %675 : vector<20x128xf32>
    %698 = arith.mulf %697, %675 : vector<20x128xf32>
    %699 = math.exp %698 : vector<20x128xf32>
    %700 = arith.mulf %695, %699 : vector<20x128xf32>
    %cst_355 = arith.constant 0.000000e+00 : f32
    %701 = vector.broadcast %cst_355 : f32 to vector<20x128xf32>
    %702 = arith.cmpf oge, %674, %701 : vector<20x128xf32>
    %cst_356 = arith.constant 1.000000e+00 : f32
    %703 = vector.broadcast %cst_356 : f32 to vector<20x128xf32>
    %704 = arith.subf %703, %700 : vector<20x128xf32>
    %cst_357 = arith.constant 1.000000e+00 : f32
    %705 = vector.broadcast %cst_357 : f32 to vector<20x128xf32>
    %706 = arith.subf %700, %705 : vector<20x128xf32>
    %707 = arith.select %702, %704, %706 : vector<20x128xi1>, vector<20x128xf32>
    %cst_358 = arith.constant 5.000000e-01 : f32
    %708 = vector.broadcast %cst_358 : f32 to vector<20x128xf32>
    %709 = arith.mulf %708, %672 : vector<20x128xf32>
    %cst_359 = arith.constant 1.000000e+00 : f32
    %710 = vector.broadcast %cst_359 : f32 to vector<20x128xf32>
    %711 = arith.addf %710, %707 : vector<20x128xf32>
    %712 = arith.mulf %709, %711 : vector<20x128xf32>
    %c3_360 = arith.constant 3 : index
    %c0_361 = arith.constant 0 : index
    %c0_362 = arith.constant 0 : index
    %713 = vector.load %arg16[%c3_360, %c0_361, %c0_362] : memref<4x128x32xbf16, #tpu.memory_space<vmem>>, vector<1x128x32xbf16>
    %714 = vector.shape_cast %713 : vector<1x128x32xbf16> to vector<128x32xbf16>
    %715 = arith.truncf %712 : vector<20x128xf32> to vector<20x128xbf16>
    %cst_363 = arith.constant dense<0.000000e+00> : vector<20x32xf32>
    %716 = tpu.matmul %715, %714, %cst_363 {dimension_numbers = #tpu.dot_dimension_numbers<[1], [0], [0], [1], [0, 0, 1, 1], [], []>} : vector<20x128xbf16>, vector<128x32xbf16>, vector<20x32xf32> -> vector<20x32xf32>
    %c23_364 = arith.constant 23 : index
    %c0_365 = arith.constant 0 : index
    %717 = vector.load %arg10[%c23_364, %c0_365] : memref<28x32xf32, #tpu.memory_space<vmem>>, vector<1x32xf32>
    %718 = vector.broadcast %717 : vector<1x32xf32> to vector<20x32xf32>
    %719 = arith.addf %716, %718 : vector<20x32xf32>
    %720 = arith.addf %643, %719 : vector<20x32xf32>
    %c26 = arith.constant 26 : index
    %c0_366 = arith.constant 0 : index
    %721 = vector.load %arg10[%c26, %c0_366] : memref<28x32xf32, #tpu.memory_space<vmem>>, vector<1x32xf32>
    %c27 = arith.constant 27 : index
    %c0_367 = arith.constant 0 : index
    %722 = vector.load %arg10[%c27, %c0_367] : memref<28x32xf32, #tpu.memory_space<vmem>>, vector<1x32xf32>
    %cst_368 = arith.constant dense<0.000000e+00> : vector<20xf32>
    %723 = vector.multi_reduction <add>, %720, %cst_368 [1] : vector<20x32xf32> to vector<20xf32>
    %724 = vector.shape_cast %723 : vector<20xf32> to vector<20x1xf32>
    %cst_369 = arith.constant 3.200000e+01 : f32
    %725 = vector.broadcast %cst_369 : f32 to vector<20x1xf32>
    %726 = arith.divf %724, %725 : vector<20x1xf32>
    %727 = vector.broadcast %726 : vector<20x1xf32> to vector<20x32xf32>
    %728 = arith.subf %720, %727 : vector<20x32xf32>
    %729 = arith.mulf %728, %728 : vector<20x32xf32>
    %cst_370 = arith.constant dense<0.000000e+00> : vector<20xf32>
    %730 = vector.multi_reduction <add>, %729, %cst_370 [1] : vector<20x32xf32> to vector<20xf32>
    %731 = vector.shape_cast %730 : vector<20xf32> to vector<20x1xf32>
    %cst_371 = arith.constant 3.200000e+01 : f32
    %732 = vector.broadcast %cst_371 : f32 to vector<20x1xf32>
    %733 = arith.divf %731, %732 : vector<20x1xf32>
    %cst_372 = arith.constant 9.99999974E-6 : f32
    %734 = vector.broadcast %cst_372 : f32 to vector<20x1xf32>
    %735 = arith.addf %733, %734 : vector<20x1xf32>
    %736 = math.rsqrt %735 : vector<20x1xf32>
    %737 = vector.broadcast %736 : vector<20x1xf32> to vector<20x32xf32>
    %738 = arith.mulf %728, %737 : vector<20x32xf32>
    %739 = vector.broadcast %721 : vector<1x32xf32> to vector<20x32xf32>
    %740 = arith.mulf %738, %739 : vector<20x32xf32>
    %741 = vector.broadcast %722 : vector<1x32xf32> to vector<20x32xf32>
    %742 = arith.addf %740, %741 : vector<20x32xf32>
    %c0_373 = arith.constant 0 : index
    %c0_374 = arith.constant 0 : index
    %743 = vector.load %arg9[%c0_373, %c0_374] : memref<16x20xf32, #tpu.memory_space<vmem>>, vector<16x20xf32>
    %cst_375 = arith.constant dense<0.000000e+00> : vector<16x32xf32>
    %744 = tpu.matmul %743, %742, %cst_375 {dimension_numbers = #tpu.dot_dimension_numbers<[1], [0], [0], [1], [0, 0, 1, 1], [], []>} : vector<16x20xf32>, vector<20x32xf32>, vector<16x32xf32> -> vector<16x32xf32>
    %c4_376 = arith.constant 4 : index
    %c0_377 = arith.constant 0 : index
    %c0_378 = arith.constant 0 : index
    %745 = vector.load %arg14[%c4_376, %c0_377, %c0_378] : memref<5x32x128xbf16, #tpu.memory_space<vmem>>, vector<1x32x128xbf16>
    %746 = vector.shape_cast %745 : vector<1x32x128xbf16> to vector<32x128xbf16>
    %747 = arith.truncf %744 : vector<16x32xf32> to vector<16x32xbf16>
    %cst_379 = arith.constant dense<0.000000e+00> : vector<16x128xf32>
    %748 = tpu.matmul %747, %746, %cst_379 {dimension_numbers = #tpu.dot_dimension_numbers<[1], [0], [0], [1], [0, 0, 1, 1], [], []>} : vector<16x32xbf16>, vector<32x128xbf16>, vector<16x128xf32> -> vector<16x128xf32>
    %c4_380 = arith.constant 4 : index
    %c0_381 = arith.constant 0 : index
    %749 = vector.load %arg15[%c4_380, %c0_381] : memref<5x128xf32, #tpu.memory_space<vmem>>, vector<1x128xf32>
    %750 = vector.broadcast %749 : vector<1x128xf32> to vector<16x128xf32>
    %751 = arith.addf %748, %750 : vector<16x128xf32>
    %c0_382 = arith.constant 0 : index
    %c0_383 = arith.constant 0 : index
    %c0_384 = arith.constant 0 : index
    %752 = vector.load %arg17[%c0_382, %c0_383, %c0_384] : memref<1x16x128xf32, #tpu.memory_space<vmem>>, vector<1x16x128xf32>
    %753 = vector.shape_cast %752 : vector<1x16x128xf32> to vector<16x128xf32>
    %754 = vector.shape_cast %751 : vector<16x128xf32> to vector<1x16x128xf32>
    tpu.vector_store %arg17[%c0_382, %c0_383, %c0_384], %754 {strides = array<i32>} : memref<1x16x128xf32, #tpu.memory_space<vmem>>, vector<1x16x128xf32>,
    return
  }
  func.func @transform_0(%arg0: i32) -> (i32, i32, i32) {
    %c0_i32 = arith.constant 0 : i32
    %c0_i32_0 = arith.constant 0 : i32
    %c0_i32_1 = arith.constant 0 : i32
    return %arg0, %c0_i32, %c0_i32_0 : i32, i32, i32
  }
  func.func @transform_1(%arg0: i32) -> (i32, i32) {
    %c0_i32 = arith.constant 0 : i32
    %c0_i32_0 = arith.constant 0 : i32
    %c0_i32_1 = arith.constant 0 : i32
    return %c0_i32, %c0_i32_0 : i32, i32
  }
  func.func @transform_2(%arg0: i32) -> (i32, i32) {
    %c0_i32 = arith.constant 0 : i32
    %c0_i32_0 = arith.constant 0 : i32
    %c0_i32_1 = arith.constant 0 : i32
    return %c0_i32, %c0_i32_0 : i32, i32
  }
  func.func @transform_3(%arg0: i32) -> (i32, i32) {
    %c0_i32 = arith.constant 0 : i32
    %c0_i32_0 = arith.constant 0 : i32
    %c0_i32_1 = arith.constant 0 : i32
    return %c0_i32, %c0_i32_0 : i32, i32
  }
  func.func @transform_4(%arg0: i32) -> (i32, i32) {
    %c0_i32 = arith.constant 0 : i32
    %c0_i32_0 = arith.constant 0 : i32
    %c0_i32_1 = arith.constant 0 : i32
    return %c0_i32, %c0_i32_0 : i32, i32
  }
  func.func @transform_5(%arg0: i32) -> (i32, i32) {
    %c0_i32 = arith.constant 0 : i32
    %c0_i32_0 = arith.constant 0 : i32
    %c0_i32_1 = arith.constant 0 : i32
    return %c0_i32, %c0_i32_0 : i32, i32
  }
  func.func @transform_6(%arg0: i32) -> (i32, i32) {
    %c0_i32 = arith.constant 0 : i32
    %c0_i32_0 = arith.constant 0 : i32
    %c0_i32_1 = arith.constant 0 : i32
    return %c0_i32, %c0_i32_0 : i32, i32
  }
  func.func @transform_7(%arg0: i32) -> (i32, i32) {
    %c0_i32 = arith.constant 0 : i32
    %c0_i32_0 = arith.constant 0 : i32
    %c0_i32_1 = arith.constant 0 : i32
    return %c0_i32, %c0_i32_0 : i32, i32
  }
  func.func @transform_8(%arg0: i32) -> (i32, i32) {
    %c0_i32 = arith.constant 0 : i32
    %c0_i32_0 = arith.constant 0 : i32
    %c0_i32_1 = arith.constant 0 : i32
    return %c0_i32, %c0_i32_0 : i32, i32
  }
  func.func @transform_9(%arg0: i32) -> (i32, i32) {
    %c0_i32 = arith.constant 0 : i32
    %c0_i32_0 = arith.constant 0 : i32
    %c0_i32_1 = arith.constant 0 : i32
    return %c0_i32, %c0_i32_0 : i32, i32
  }
  func.func @transform_10(%arg0: i32) -> (i32, i32, i32) {
    %c0_i32 = arith.constant 0 : i32
    %c0_i32_0 = arith.constant 0 : i32
    %c0_i32_1 = arith.constant 0 : i32
    %c0_i32_2 = arith.constant 0 : i32
    return %c0_i32, %c0_i32_0, %c0_i32_1 : i32, i32, i32
  }
  func.func @transform_11(%arg0: i32) -> (i32, i32) {
    %c0_i32 = arith.constant 0 : i32
    %c0_i32_0 = arith.constant 0 : i32
    %c0_i32_1 = arith.constant 0 : i32
    return %c0_i32, %c0_i32_0 : i32, i32
  }
  func.func @transform_12(%arg0: i32) -> (i32, i32, i32) {
    %c0_i32 = arith.constant 0 : i32
    %c0_i32_0 = arith.constant 0 : i32
    %c0_i32_1 = arith.constant 0 : i32
    %c0_i32_2 = arith.constant 0 : i32
    return %c0_i32, %c0_i32_0, %c0_i32_1 : i32, i32, i32
  }
  func.func @transform_13(%arg0: i32) -> (i32, i32, i32) {
    %c0_i32 = arith.constant 0 : i32
    %c0_i32_0 = arith.constant 0 : i32
    %c0_i32_1 = arith.constant 0 : i32
    %c0_i32_2 = arith.constant 0 : i32
    return %c0_i32, %c0_i32_0, %c0_i32_1 : i32, i32, i32
  }
  func.func @transform_14(%arg0: i32) -> (i32, i32) {
    %c0_i32 = arith.constant 0 : i32
    %c0_i32_0 = arith.constant 0 : i32
    %c0_i32_1 = arith.constant 0 : i32
    return %c0_i32, %c0_i32_0 : i32, i32
  }
  func.func @transform_15(%arg0: i32) -> (i32, i32, i32) {
    %c0_i32 = arith.constant 0 : i32
    %c0_i32_0 = arith.constant 0 : i32
    %c0_i32_1 = arith.constant 0 : i32
    %c0_i32_2 = arith.constant 0 : i32
    return %c0_i32, %c0_i32_0, %c0_i32_1 : i32, i32, i32
  }
  func.func @transform_16(%arg0: i32) -> (i32, i32, i32) {
    %c0_i32 = arith.constant 0 : i32
    %c0_i32_0 = arith.constant 0 : i32
    %c0_i32_1 = arith.constant 0 : i32
    return %arg0, %c0_i32, %c0_i32_0 : i32, i32, i32
  }
}

</mosaic_0001>

<bundles_post_ra>
// kernel: forward.1
= control target key start
LH: loop header
LB: loop body
LE: loop exit
PB: predicated region body
PF: predicated region fallthrough
CT: control target
= control target key end

     0   :  { %s8424_s0 = inlined_call_operand.vmem [shape: f32[1,10,16], index: 0, kind: input, shape index: {}]   ;;  %s8425_s1 = inlined_call_operand.hbm [shape: bf16[16,32], index: 1, kind: input, shape index: {}]   ;;  %s8426_s2 = inlined_call_operand.hbm [shape: f32[18,10], index: 2, kind: input, shape index: {}]   ;;  %s8427_s3 = inlined_call_operand.hbm [shape: f32[18,32], index: 3, kind: input, shape index: {}]   ;;  %s8428_s4 = inlined_call_operand.hbm [shape: f32[18,18], index: 4, kind: input, shape index: {}]   ;;  %s8429_s5 = inlined_call_operand.hbm [shape: f32[20,18], index: 5, kind: input, shape index: {}]   ;;  %s8430_s6 = inlined_call_operand.hbm [shape: f32[20,32], index: 6, kind: input, shape index: {}]   ;;  %s8431_s7 = inlined_call_operand.hbm [shape: f32[20,20], index: 7, kind: input, shape index: {}]   ;;  %s8432_s8 = inlined_call_operand.vmem [shape: f32[16,20], index: 8, kind: input, shape index: {}]   ;;  %s8433_s9 = inlined_call_operand.hbm [shape: f32[28,32], index: 9, kind: input, shape index: {}]   ;;  %s8434_s10 = inlined_call_operand.hbm [shape: bf16[24,32,16], index: 10, kind: input, shape index: {}]   ;;  %s8435_s11 = inlined_call_operand.hbm [shape: f32[8,16], index: 11, kind: input, shape index: {}]   ;;  %s8436_s12 = inlined_call_operand.hbm [shape: bf16[8,16,32], index: 12, kind: input, shape index: {}]   ;;  %s8437_s13 = inlined_call_operand.hbm [shape: bf16[5,32,128], index: 13, kind: input, shape index: {}]   ;;  %s8438_s14 = inlined_call_operand.hbm [shape: f32[5,128], index: 14, kind: input, shape index: {}]   ;;  %s8439_s15 = inlined_call_operand.vmem [shape: bf16[4,128,32], index: 15, kind: input, shape index: {}]   ;;  %s8440_s16 = inlined_call_operand.vmem [shape: f32[1,16,128], index: 16, kind: output, shape index: {}]  }
   0x1   :  { %8442 = sst [smem:[#allocation29_spill]] %s8424_s0 }
   0x2   :  { %21 = vsyncpa [#allocation3], 0 }
   0x3   :  { %22 = vsyncpa [#allocation5], 0 }
   0x4   :  { %23 = vsyncpa [#allocation8], 0 }
   0x5   :  { %24 = vsyncpa [#allocation11], 0 }
   0x6   :  { %25 = vsyncpa [#allocation14], 0 }
   0x7   :  { %26 = vsyncpa [#allocation17], 0 }
   0x8   :  { %27 = vsyncpa [#allocation20], 0  ;;  %s7531_s21 = smov [#allocation4]  }
   0x9   :  { %s47_s22 = sshll.u32 %s7531_s21, 4  ;;  %s48_s22 = int_to_ptr.vmem [resolvable:$true] %s47_s22 }
   0xa   :  { %s7265_s23 = scalar_lea.vmem %s48_s22, 384  ;;  %p7270_p1 = scmp.lt.s32.totalorder %s48_s22, %s48_s22 }
   0xb   :  { %p7266_p0 = scmp.ne.s32.totalorder %s48_s22, %s7265_s23  ;;  %p7271_p2 = scmp.lt.s32.totalorder %s7265_s23, %s7265_s23 }
   0xd   :  { %p7272_p3 = por %p7271_p2, %p7270_p1 }
   0xf   :  { %p7273_p4 = pnand %p7272_p3, %p7266_p0 }
  0x11   :  { %7276 = shalt.err (!%p7273_p4)
}
  0x12   :  { %s7532_s24 = smov 128   ;;  %s7533_s25 = smov 8  }
  0x13   :  { %53 = dma.hbm_to_vmem [thread:$0]  %s8426_s2, 384, %s48_s22, [#allocation5], %s7532_s24, %s7532_s24, %s7533_s25  }
  0x14   :  { %s7534_s28 = smov [#allocation7]   ;;  %s7535_s30 = smov [#allocation10]  }
  0x15   :  { %s71_s29 = sshll.u32 %s7534_s28, 4  ;;  %s95_s0 = sshll.u32 %s7535_s30, 4  ;;  %s72_s29 = int_to_ptr.vmem [resolvable:$true] %s71_s29  ;;  %s96_s0 = int_to_ptr.vmem [resolvable:$true] %s95_s0 }
  0x16   :  { %s7285_s17 = scalar_lea.vmem %s72_s29, 384  ;;  %p7290_p6 = scmp.lt.s32.totalorder %s72_s29, %s72_s29 }
  0x17   :  { %p7286_p5 = scmp.ne.s32.totalorder %s72_s29, %s7285_s17  ;;  %p7291_p7 = scmp.lt.s32.totalorder %s7285_s17, %s7285_s17 }
  0x19   :  { %p7292_p8 = por %p7291_p7, %p7290_p6 }
  0x1b   :  { %p7293_p9 = pnand %p7292_p8, %p7286_p5 }
  0x1d   :  { %7296 = shalt.err (!%p7293_p9)
}
  0x1e   :  { %77 = dma.hbm_to_vmem [thread:$0]  %s8428_s4, 384, %s72_s29, [#allocation8], %s7532_s24, %s7532_s24, %s7533_s25  }
  0x1f   :  { %s7305_s2 = scalar_lea.vmem %s96_s0, 384  ;;  %p7310_p11 = scmp.lt.s32.totalorder %s96_s0, %s96_s0 }
  0x20   :  { %p7306_p10 = scmp.ne.s32.totalorder %s96_s0, %s7305_s2  ;;  %p7311_p12 = scmp.lt.s32.totalorder %s7305_s2, %s7305_s2 }
  0x22   :  { %p7312_p13 = por %p7311_p12, %p7310_p11 }
  0x24   :  { %p7313_p0 = pnand %p7312_p13, %p7306_p10 }
  0x26   :  { %7316 = shalt.err (!%p7313_p0)
}
  0x27   :  { %101 = dma.hbm_to_vmem [thread:$0]  %s8430_s6, 384, %s96_s0, [#allocation11], %s7532_s24, %s7532_s24, %s7533_s25  }
  0x28   :  { %s7536_s22 = smov [#allocation13]   ;;  %s7537_s26 = smov [#allocation16]  }
  0x29   :  { %s121_s23 = sshll.u32 %s7536_s22, 4  ;;  %s146_s4 = sshll.u32 %s7537_s26, 4  ;;  %s122_s23 = int_to_ptr.vmem [resolvable:$true] %s121_s23  ;;  %s147_s4 = int_to_ptr.vmem [resolvable:$true] %s146_s4 }
  0x2a   :  { %s7325_s27 = scalar_lea.vmem %s122_s23, 512  ;;  %p7330_p2 = scmp.lt.s32.totalorder %s122_s23, %s122_s23 }
  0x2b   :  { %p7326_p1 = scmp.ne.s32.totalorder %s122_s23, %s7325_s27  ;;  %p7331_p3 = scmp.lt.s32.totalorder %s7325_s27, %s7325_s27 }
  0x2d   :  { %p7332_p4 = por %p7331_p3, %p7330_p2 }
  0x2f   :  { %p7333_p5 = pnand %p7332_p4, %p7326_p1 }
  0x31   :  { %7336 = shalt.err (!%p7333_p5)
}
  0x32   :  { %127 = dma.hbm_to_vmem [thread:$0]  %s8433_s9, 512, %s122_s23, [#allocation14], %s7532_s24, %s7532_s24, %s7533_s25  }
  0x33   :  { %s7345_s6 = scalar_lea.vmem %s147_s4, 128  ;;  %p7350_p7 = scmp.lt.s32.totalorder %s147_s4, %s147_s4 }
  0x34   :  { %p7346_p6 = scmp.ne.s32.totalorder %s147_s4, %s7345_s6  ;;  %p7351_p8 = scmp.lt.s32.totalorder %s7345_s6, %s7345_s6 }
  0x36   :  { %p7352_p9 = por %p7351_p8, %p7350_p7 }
  0x38   :  { %p7353_p10 = pnand %p7352_p9, %p7346_p6 }
  0x3a   :  { %7356 = shalt.err (!%p7353_p10)
}
  0x3b   :  { %149 = dma.hbm_to_vmem [thread:$0]  %s8435_s11, 128, %s147_s4, [#allocation17]  }
  0x3c   :  { %s7538_s17 = smov [#allocation19]   ;;  %s7539_s19 = smov [#allocation2]  }
  0x3d   :  { %s167_s18 = sshll.u32 %s7538_s17, 4  ;;  %s35_s2 = sshll.u32 %s7539_s19, 4  ;;  %s168_s18 = int_to_ptr.vmem [resolvable:$true] %s167_s18  ;;  %s36_s2 = int_to_ptr.vmem [resolvable:$true] %s35_s2 }
  0x3e   :  { %s7365_s20 = scalar_lea.vmem %s168_s18, 1280  ;;  %p7370_p12 = scmp.lt.s32.totalorder %s168_s18, %s168_s18 }
  0x3f   :  { %p7366_p11 = scmp.ne.s32.totalorder %s168_s18, %s7365_s20  ;;  %p7371_p13 = scmp.lt.s32.totalorder %s7365_s20, %s7365_s20 }
  0x41   :  { %p7372_p0 = por %p7371_p13, %p7370_p12 }
  0x43   :  { %p7373_p1 = pnand %p7372_p0, %p7366_p11 }
  0x45   :  { %7376 = shalt.err (!%p7373_p1)
}
  0x46   :  { %s7540_s9 = smov 64   ;;  %s7541_s21 = smov 4  }
  0x47   :  { %173 = dma.hbm_to_vmem [thread:$0]  %s8437_s13, 1280, %s168_s18, [#allocation20], %s7540_s9, %s7540_s9, %s7541_s21  }
  0x48   :  { %s7385_s11 = scalar_lea.vmem %s36_s2, 128  ;;  %p7390_p3 = scmp.lt.s32.totalorder %s36_s2, %s36_s2 }
  0x49   :  { %p7386_p2 = scmp.ne.s32.totalorder %s36_s2, %s7385_s11  ;;  %p7391_p4 = scmp.lt.s32.totalorder %s7385_s11, %s7385_s11 }
  0x4b   :  { %p7392_p5 = por %p7391_p4, %p7390_p3 }
  0x4d   :  { %p7393_p6 = pnand %p7392_p5, %p7386_p2 }
  0x4f   :  { %7396 = shalt.err (!%p7393_p6)
}
  0x50   :  { %41 = dma.hbm_to_vmem [thread:$0]  %s8425_s1, 128, %s36_s2, [#allocation3], %s7540_s9, %s7540_s9, %s7541_s21  }
  0x51   :  { %s7542_s27 = smov [#allocation6]   ;;  %s7543_s29 = smov [#allocation9]  }
  0x52   :  { %s59_s28 = sshll.u32 %s7542_s27, 4  ;;  %s83_s13 = sshll.u32 %s7543_s29, 4  ;;  %s60_s28 = int_to_ptr.vmem [resolvable:$true] %s59_s28  ;;  %s84_s13 = int_to_ptr.vmem [resolvable:$true] %s83_s13 }
  0x53   :  { %s7405_s6 = scalar_lea.vmem %s60_s28, 384  ;;  %p7410_p8 = scmp.lt.s32.totalorder %s60_s28, %s60_s28 }
  0x54   :  { %p7406_p7 = scmp.ne.s32.totalorder %s60_s28, %s7405_s6  ;;  %p7411_p9 = scmp.lt.s32.totalorder %s7405_s6, %s7405_s6 }
  0x56   :  { %p7412_p10 = por %p7411_p9, %p7410_p8 }
  0x58   :  { %p7413_p11 = pnand %p7412_p10, %p7406_p7 }
  0x5a   :  { %7416 = shalt.err (!%p7413_p11)
}
  0x5b   :  { %65 = dma.hbm_to_vmem [thread:$0]  %s8427_s3, 384, %s60_s28, [#allocation5], %s7532_s24, %s7532_s24, %s7533_s25  }
  0x5c   :  { %s7425_s1 = scalar_lea.vmem %s84_s13, 384  ;;  %p7430_p13 = scmp.lt.s32.totalorder %s84_s13, %s84_s13 }
  0x5d   :  { %p7426_p12 = scmp.ne.s32.totalorder %s84_s13, %s7425_s1  ;;  %p7431_p0 = scmp.lt.s32.totalorder %s7425_s1, %s7425_s1 }
  0x5f   :  { %p7432_p1 = por %p7431_p0, %p7430_p13 }
  0x61   :  { %p7433_p2 = pnand %p7432_p1, %p7426_p12 }
  0x63   :  { %7436 = shalt.err (!%p7433_p2)
}
  0x64   :  { %89 = dma.hbm_to_vmem [thread:$0]  %s8429_s5, 384, %s84_s13, [#allocation8], %s7532_s24, %s7532_s24, %s7533_s25  }
  0x65   :  { %s7544_s19 = smov [#allocation12]   ;;  %s7545_s20 = smov [#allocation15]  }
  0x66   :  { %s107_s2 = sshll.u32 %s7544_s19, 4  ;;  %s133_s3 = sshll.u32 %s7545_s20, 4  ;;  %s108_s2 = int_to_ptr.vmem [resolvable:$true] %s107_s2  ;;  %s134_s3 = int_to_ptr.vmem [resolvable:$true] %s133_s3 }
  0x67   :  { %s7445_s22 = scalar_lea.vmem %s108_s2, 384  ;;  %p7450_p4 = scmp.lt.s32.totalorder %s108_s2, %s108_s2 }
  0x68   :  { %p7446_p3 = scmp.ne.s32.totalorder %s108_s2, %s7445_s22  ;;  %p7451_p5 = scmp.lt.s32.totalorder %s7445_s22, %s7445_s22 }
  0x6a   :  { %p7452_p6 = por %p7451_p5, %p7450_p4 }
  0x6c   :  { %p7453_p7 = pnand %p7452_p6, %p7446_p3 }
  0x6e   :  { %7456 = shalt.err (!%p7453_p7)
}
  0x6f   :  { %113 = dma.hbm_to_vmem [thread:$0]  %s8431_s7, 384, %s108_s2, [#allocation11], %s7532_s24, %s7532_s24, %s7533_s25  }
  0x70   :  { %s7465_s5 = scalar_lea.vmem %s134_s3, 6144  ;;  %p7470_p9 = scmp.lt.s32.totalorder %s134_s3, %s134_s3 }
  0x71   :  { %p7466_p8 = scmp.ne.s32.totalorder %s134_s3, %s7465_s5  ;;  %p7471_p10 = scmp.lt.s32.totalorder %s7465_s5, %s7465_s5 }
  0x73   :  { %p7472_p11 = por %p7471_p10, %p7470_p9 }
  0x75   :  { %p7473_p12 = pnand %p7472_p11, %p7466_p8 }
  0x77   :  { %7476 = shalt.err (!%p7473_p12)
}
  0x78   :  { %139 = dma.hbm_to_vmem [thread:$0]  %s8434_s10, 6144, %s134_s3, [#allocation14], %s7540_s9, %s7540_s9, %s7541_s21  }
  0x79   :  { %s7546_s27 = smov [#allocation18]   ;;  %s7547_s29 = smov [#allocation21]  }
  0x7a   :  { %s155_s28 = sshll.u32 %s7546_s27, 4  ;;  %s180_s7 = sshll.u32 %s7547_s29, 4  ;;  %s156_s28 = int_to_ptr.vmem [resolvable:$true] %s155_s28  ;;  %s181_s7 = int_to_ptr.vmem [resolvable:$true] %s180_s7 }
  0x7b   :  { %s7485_s24 = scalar_lea.vmem %s156_s28, 1024  ;;  %p7490_p0 = scmp.lt.s32.totalorder %s156_s28, %s156_s28 }
  0x7c   :  { %p7486_p13 = scmp.ne.s32.totalorder %s156_s28, %s7485_s24  ;;  %p7491_p1 = scmp.lt.s32.totalorder %s7485_s24, %s7485_s24 }
  0x7e   :  { %p7492_p2 = por %p7491_p1, %p7490_p0 }
  0x80   :  { %p7493_p3 = pnand %p7492_p2, %p7486_p13 }
  0x82   :  { %7496 = shalt.err (!%p7493_p3)
}
  0x83   :  { %161 = dma.hbm_to_vmem [thread:$0]  %s8436_s12, 1024, %s156_s28, [#allocation17], %s7540_s9, %s7540_s9, %s7541_s21  }
  0x84   :  { %s7505_s10 = scalar_lea.vmem %s181_s7, 128  ;;  %p7510_p5 = scmp.lt.s32.totalorder %s181_s7, %s181_s7 }
  0x85   :  { %p7506_p4 = scmp.ne.s32.totalorder %s181_s7, %s7505_s10  ;;  %p7511_p6 = scmp.lt.s32.totalorder %s7505_s10, %s7505_s10 }
  0x87   :  { %p7512_p7 = por %p7511_p6, %p7510_p5 }
  0x89   :  { %p7513_p8 = pnand %p7512_p7, %p7506_p4 }
  0x8b   :  { %7516 = shalt.err (!%p7513_p8)
}
  0x8c   :  { %183 = dma.hbm_to_vmem [thread:$0]  %s8438_s14, 128, %s181_s7, [#allocation20]  }
  0x8d   :  { %7517 = dma.done.wait [#allocation3], 128  }
  0x8e   :  { %7518 = vsyncadd [#allocation3], 4294967168 }
  0x8f   :  { %7519 = dma.done.wait [#allocation5], 768  }
  0x90   :  { %7520 = vsyncadd [#allocation5], 4294966528 }
  0x91   :  { %7521 = dma.done.wait [#allocation8], 768  }
  0x92   :  { %7522 = vsyncadd [#allocation8], 4294966528 }
  0x93   :  { %7523 = dma.done.wait [#allocation11], 768  }
  0x94   :  { %7524 = vsyncadd [#allocation11], 4294966528 }
  0x95   :  { %7525 = dma.done.wait [#allocation14], 6656  }
  0x96   :  { %7526 = vsyncadd [#allocation14], 4294960640 }
  0x97   :  { %7527 = dma.done.wait [#allocation17], 1152  }
  0x98   :  { %7528 = vsyncadd [#allocation17], 4294966144 }
  0x99   :  { %7529 = dma.done.wait [#allocation20], 1408  }
  0x9a   :  { %7530 = vsyncadd [#allocation20], 4294965888  ;;  %v7548_v0 = vmov 0.0   ;;  %vm7549_vm0 = vmmov 0   ;;  %v6948_v1 = vld [vmem:[#allocation2] sm:$0xff]   ;;  %s8443_s9 = sld [smem:[#allocation29_spill]] }
  0x9b   :  { %6374 = vmatprep.subr.bf16.mxu0 %v7548_v0  ;;  %6376 = vmatprep.mubr.msk.bf16.mxu0 %vm7549_vm0, %v7548_v0  ;;  %vm243_vm1 = vcmask 130048   ;;  %vm304_vm2 = vcmask 1041408   ;;  %v288_v8 = vld [vmem:[#allocation4] sm:$0xff]  ;;  %vm294_vm3 = vcmask 80896   ;;  %v289_v10 = vld [vmem:[#allocation4 + $0x8] sm:$0xff]  ;;  %v291_v12 = vld [vmem:[#allocation6] sm:$0xff] }
  0x9c   :  { %6380 = vmatprep.subr.mxu1 %v7548_v0  ;;  %6384 = vmatprep.mubr.msk.f32.mxu1 %vm7549_vm0, %v7548_v0  ;;  %v290_v11 = vld [vmem:[#allocation4 + $0x10] sm:$0x3]  ;;  %vm390_vm4 = vcmask 261120   ;;  %v292_v16 = vld [vmem:[#allocation6 + $0x8] sm:$0xff]  ;;  %v293_v21 = vld [vmem:[#allocation6 + $0x10] sm:$0x3] }
  0x9d   :  { %6375 = vmatpush3.bf16.msra.mxu0 %v6948_v1  ;;  %vm397_vm5 = vcmask 254976   ;;  %v6949_v42 = vld [vmem:[#allocation15 + $0x8] sm:$0xff]   ;;  %v6951_v44 = vld [vmem:[#allocation15] sm:$0xff]   ;;  %vm762_vm6 = vcmask 1040384   ;;  %vm717_vm7 = vcmask 146432   ;;  %vm724_vm8 = vcmask 140288  }
  0x9e   :  { %v6950_v43 = vld [vmem:[#allocation15 + $0x48] sm:$0xff]   ;;  %v6952_v45 = vld [vmem:[#allocation15 + $0x40] sm:$0xff]   ;;  %vm3065_vm15 = vcmask 257024  }
  0x9f   :  { %6409 = vmatprep.subr.bf16.mxu0 %v6950_v43  ;;  %v6953_v46 = vld [vmem:[#allocation15 + $0x28] sm:$0xff]   ;;  %v5802_v58 = vld [vmem:[#allocation13] ss:$0 sm:$0xff]  ;;  %v5803_v62 = vld [vmem:[#allocation13 + $0x1] ss:$0 sm:$0xff] }
  0xa0   :  { %v232_v2 = vld [vmem:[%s8443_s9] sm:$0xff]  ;;  %v233_v3 = vld [vmem:[%s8443_s9 + $0x8] sm:$0x3] }
  0xa1   :  { %v236_v4 = vpack.c.bf16 %v233_v3, %v232_v2 }
  0xa3   :  { %6377 = vmatmul.mubr.msk.bf16.vlgmr.msra.gmra.mxu0 %vm243_vm1, %v236_v4 }
  0xa4   :  { %6410 = vmatpush3.bf16.msra.mxu0 %v6950_v43 }
  0xa5   :  { %6411 = vmatprep.subr.bf16.mxu0 %v6952_v45 }
  0xa8   :  { %6412 = vmatpush3.bf16.msra.mxu0 %v6952_v45 }
 0x163   :  { %v281_v5 = vpop.f32.mrf.mxu0 }
 0x165   :  { %v6378_v6 = vpop.f32.mrf.mxu0 }
 0x167   :  { %v284_v7 = vpop.f32.mrf.mxu0 }
 0x168   :  { %6381 = vmatpush3.msk.msra.mxu1 %vm304_vm2, %v284_v7 }
 0x169   :  { %v6379_v9 = vpop.f32.mrf.mxu0  ;;  %6382 = vmatprep.subr.mxu1 %v7548_v0 }
 0x16a   :  { %6383 = vmatpush3.msra.mxu1 %v281_v5  ;;  %v6954_v9 = vld [vmem:[#allocation15 + $0x20] sm:$0xff]  }
 0x16b   :  { %6385 = vmatmul.mubr.msk.f32.vlgmr.msra.gmra.mxu1 %vm294_vm3, %v288_v8  ;;  %6393 = vmatprep.subr.bf16.mxu1 %v6949_v42 }
 0x16c   :  { %6387 = vmatprep.mubr.msk.f32.mxu1 %vm7549_vm0, %v7548_v0  ;;  %6394 = vmatpush3.bf16.msra.mxu1 %v6949_v42  ;;  %v7774_v42 = vld [vmem:[#allocation7 + $0x10] sm:$0x3] }
 0x16d   :  { %6395 = vmatprep.subr.bf16.mxu1 %v6951_v44 }
 0x16f   :  { %6388 = vmatmul.mubr.msk.f32.gmra.mxu1 %vm294_vm3, %v289_v10 }
 0x170   :  { %6390 = vmatprep.mubr.msk.f32.mxu1 %vm7549_vm0, %v7548_v0  ;;  %6396 = vmatpush3.bf16.msra.mxu1 %v6951_v44 }
 0x171   :  { %6401 = vmatprep.subr.bf16.mxu1 %v6953_v46 }
 0x173   :  { %6391 = vmatmul.mubr.msk.f32.gmra.mxu1 %vm294_vm3, %v290_v11  ;;  %vm3385_vm3 = vcmask 162816  }
 0x22b   :  { %v374_v13 = vpop.f32.mrf.mxu1 }
 0x22c   :  { %v7726_v14 = vadd.f32 %v374_v13, %v291_v12 }
 0x22d   :  { %v6386_v15 = vpop.f32.mrf.mxu1 }
 0x22e   :  { %v391_v17 = vsel %vm390_vm4, %v7726_v14, 0.0 }
 0x22f   :  { %392 = vadd.xlane.f32.xlu0 %v391_v17  ;;  %v379_v18 = vpop.f32.mrf.mxu1 }
 0x230   :  { %v7730_v19 = vadd.f32 %v379_v18, %v292_v16 }
 0x231   :  { %v6389_v20 = vpop.f32.mrf.mxu1 }
 0x232   :  { %v394_v22 = vsel %vm390_vm4, %v7730_v19, 0.0  ;;  %v5804_v20 = vld [vmem:[#allocation16] ss:$0 sm:$0xff] }
 0x233   :  { %395 = vadd.xlane.f32.xlu0 %v394_v22  ;;  %v384_v23 = vpop.f32.mrf.mxu1 }
 0x234   :  { %v7734_v24 = vadd.f32 %v384_v23, %v293_v21 }
 0x235   :  { %v6392_v25 = vpop.f32.mrf.mxu1 }
 0x236   :  { %v398_v26 = vsel %vm397_vm5, %v7734_v24, 0.0 }
 0x237   :  { %399 = vadd.xlane.f32.xlu1 %v398_v26 }
 0x2b8   :  { %v393_v27 = vpop.xlane.xlu0 %392 }
 0x2b9   :  { %v402_v28 = vmul.f32 0.03125, %v393_v27 }
 0x2bb   :  { %v405_v29 = vsub.f32 %v7726_v14, %v402_v28 }
 0x2bc   :  { %v396_v30 = vpop.xlane.xlu0 %395 }
 0x2bd   :  { %v403_v31 = vmul.f32 0.03125, %v396_v30  ;;  %v408_v32 = vmul.f32 %v405_v29, %v405_v29 }
 0x2bf   :  { %v406_v33 = vsub.f32 %v7730_v19, %v403_v31  ;;  %v411_v34 = vsel %vm390_vm4, %v408_v32, 0.0 }
 0x2c0   :  { %412 = vadd.xlane.f32.xlu1 %v411_v34  ;;  %v400_v35 = vpop.xlane.xlu1 %399 }
 0x2c1   :  { %v404_v36 = vmul.f32 0.03125, %v400_v35  ;;  %v409_v37 = vmul.f32 %v406_v33, %v406_v33  ;;  %v6955_v35 = vld [vmem:[#allocation15 + $0x38] sm:$0xff]  }
 0x2c3   :  { %v407_v38 = vsub.f32 %v7734_v24, %v404_v36  ;;  %v414_v39 = vsel %vm390_vm4, %v409_v37, 0.0 }
 0x2c4   :  { %415 = vadd.xlane.f32.xlu0 %v414_v39  ;;  %v6956_v39 = vld [vmem:[#allocation15 + $0x30] sm:$0xff]  }
 0x2c5   :  { %v410_v40 = vmul.f32 %v407_v38, %v407_v38 }
 0x2c7   :  { %v417_v41 = vsel %vm397_vm5, %v410_v40, 0.0 }
 0x2c8   :  { %418 = vadd.xlane.f32.xlu1 %v417_v41  ;;  %v7772_v41 = vld [vmem:[#allocation7] sm:$0xff] }
 0x349   :  { %v413_v47 = vpop.xlane.xlu1 %412 }
 0x34a   :  { %v420_v48 = vmul.f32 0.03125, %v413_v47 }
 0x34c   :  { %v423_v49 = vadd.f32 1e-05, %v420_v48 }
 0x34d   :  { %v416_v50 = vpop.xlane.xlu0 %415 }
 0x34e   :  { %7047 = vrsqrt.f32 %v423_v49  ;;  %v421_v51 = vmul.f32 0.03125, %v416_v50 }
 0x350   :  { %v424_v52 = vadd.f32 1e-05, %v421_v51 }
 0x351   :  { %v419_v53 = vpop.xlane.xlu1 %418 }
 0x352   :  { %7049 = vrsqrt.f32 %v424_v52  ;;  %v422_v54 = vmul.f32 0.03125, %v419_v53 }
 0x354   :  { %v425_v55 = vadd.f32 1e-05, %v422_v54 }
 0x356   :  { %7051 = vrsqrt.f32 %v425_v55 }
 0x35b   :  { %v7048_v56 = vpop.eup %7047 }
 0x35c   :  { %v429_v57 = vmul.f32 %v7048_v56, %v405_v29 }
 0x35e   :  { %v436_v60 = vmul.f32 %v5802_v58, %v429_v57 }
 0x35f   :  { %v7050_v59 = vpop.eup %7049 }
 0x360   :  { %v430_v61 = vmul.f32 %v7050_v59, %v406_v33  ;;  %v443_v3 = vadd.f32 %v5803_v62, %v436_v60 }
 0x362   :  { %v437_v63 = vmul.f32 %v5802_v58, %v430_v61 }
 0x363   :  { %v7052_v1 = vpop.eup %7051 }
 0x364   :  { %v431_v2 = vmul.f32 %v7052_v1, %v407_v38  ;;  %v444_v4 = vadd.f32 %v5803_v62, %v437_v63 }
 0x366   :  { %v438_v5 = vmul.f32 %v5802_v58, %v431_v2  ;;  %v7744_v6 = vpack.c.bf16 %v444_v4, %v443_v3 }
 0x368   :  { %6397 = vmatprep.mubr.msk.bf16.mxu1 %vm390_vm4, %v7744_v6  ;;  %6413 = vmatprep.mubr.msk.bf16.mxu0 %vm390_vm4, %v7744_v6  ;;  %v445_v7 = vadd.f32 %v5803_v62, %v438_v5 }
 0x36a   :  { %v7750_v8 = vpack.c.bf16 %v445_v7, %v445_v7 }
 0x36c   :  { %6398 = vmatmul.mubr.msk.bf16.vlgmr.msra.gmra.mxu1 %vm390_vm4, %v7750_v8  ;;  %6414 = vmatmul.mubr.msk.bf16.vlgmr.msra.gmra.mxu0 %vm390_vm4, %v7750_v8 }
 0x36d   :  { %6402 = vmatpush3.bf16.msra.mxu1 %v6953_v46  ;;  %6405 = vmatprep.mubr.msk.bf16.mxu1 %vm390_vm4, %v7744_v6  ;;  %v7777_v46 = vld [vmem:[#allocation7 + $0x8] sm:$0xff] }
 0x36e   :  { %6403 = vmatprep.subr.bf16.mxu1 %v6954_v9 }
 0x371   :  { %6404 = vmatpush3.bf16.msra.mxu1 %v6954_v9 }
 0x374   :  { %6406 = vmatmul.mubr.msk.bf16.vlgmr.msra.gmra.mxu1 %vm390_vm4, %v7750_v8 }
 0x42c   :  { %v6399_v10 = vpop.f32.mrf.mxu1  ;;  %v6415_v11 = vpop.f32.mrf.mxu0 }
 0x42d   :  { %v755_v12 = vpack.c.bf16 %v6415_v11, %v6415_v11  ;;  %v518_v37 = vadd.f32 %v6399_v10, %v5804_v20 }
 0x42e   :  { %v509_v13 = vpop.f32.mrf.mxu1  ;;  %v639_v15 = vpop.f32.mrf.mxu0 }
 0x42f   :  { %v764_v16 = vsel %vm762_vm6, %v755_v12, 0  ;;  %6907 = vmatprep.subr.msk.bf16.mxu0 %vm762_vm6, %v755_v12  ;;  %v510_v23 = vadd.f32 %v5804_v20, %v509_v13  ;;  %v654_v38 = vpack.c.bf16 %v518_v37, %v518_v37 }
 0x430   :  { %v6400_v17 = vpop.f32.mrf.mxu1  ;;  %v6416_v18 = vpop.f32.mrf.mxu0  ;;  %6426 = vmatpush3.bf16.msra.mxu0 %v764_v16  ;;  %v6957_v16 = vld [vmem:[#allocation15 + $0x18] sm:$0xff]  }
 0x432   :  { %v512_v21 = vpop.f32.mrf.mxu1  ;;  %v642_v22 = vpop.f32.mrf.mxu0 }
 0x433   :  { %v513_v25 = vadd.f32 %v5804_v20, %v512_v21  ;;  %v754_v26 = vpack.c.bf16 %v642_v22, %v639_v15 }
 0x434   :  { %v6407_v27 = vpop.f32.mrf.mxu1 }
 0x435   :  { %v653_v28 = vpack.c.bf16 %v513_v25, %v510_v23  ;;  %v656_v29 = vpack.c.bf16 %v6407_v27, %v6407_v27  ;;  %6427 = vmatprep.subr.bf16.mxu0 %v754_v26 }
 0x436   :  { %v574_v30 = vpop.f32.mrf.mxu1  ;;  %6428 = vmatpush3.bf16.msra.mxu0 %v754_v26 }
 0x437   :  { %v667_v31 = vsel %vm243_vm1, %v656_v29, 0  ;;  %6905 = vmatprep.subr.msk.bf16.mxu1 %vm243_vm1, %v656_v29  ;;  %6421 = vmatprep.mubr.msk.bf16.mxu1 %vm243_vm1, %v653_v28 }
 0x438   :  { %v6408_v32 = vpop.f32.mrf.mxu1  ;;  %6418 = vmatpush3.bf16.xpose.msra.mxu1 %v667_v31  ;;  %6433 = vmatprep.subr.bf16.mxu0 %v6957_v16  ;;  %v6959_v31 = vld [vmem:[#allocation15 + $0x58] sm:$0xff]  }
 0x439   :  { %v6960_v32 = vld [vmem:[#allocation15 + $0x50] sm:$0xff]  }
 0x43a   :  { %v577_v33 = vpop.f32.mrf.mxu1 }
 0x43b   :  { %v655_v34 = vpack.c.bf16 %v577_v33, %v574_v30  ;;  %v6958_v30 = vld [vmem:[#allocation15 + $0x10] sm:$0xff]   ;;  %v6961_v33 = vld [vmem:[#allocation18] sm:$0xff]  }
 0x43d   :  { %6906 = vmatprep.subr.msk.bf16.mxu1 %vm243_vm1, %v655_v34  ;;  %v664_v36 = vsel %vm243_vm1, %v655_v34, 0 }
 0x440   :  { %6420 = vmatpush3.bf16.xpose.msra.mxu1 %v664_v36 }
 0x441   :  { %6441 = vmatprep.subr.bf16.mxu1 %v6955_v35 }
 0x447   :  { %6422 = vmatmul.mubr.msk.bf16.vlgmr.msra.gmra.mxu1 %vm243_vm1, %v654_v38 }
 0x448   :  { %6442 = vmatpush3.bf16.msra.mxu1 %v6955_v35  ;;  %6445 = vmatprep.mubr.msk.bf16.mxu1 %vm390_vm4, %v7744_v6 }
 0x449   :  { %6443 = vmatprep.subr.bf16.mxu1 %v6956_v39 }
 0x44c   :  { %6444 = vmatpush3.bf16.msra.mxu1 %v6956_v39 }
 0x44f   :  { %6446 = vmatmul.mubr.msk.bf16.vlgmr.msra.gmra.mxu1 %vm390_vm4, %v7750_v8 }
 0x507   :  { %v6423_v40 = vpop.f32.mrf.mxu1 }
 0x508   :  { %v712_v47 = vadd.f32 %v6423_v40, %v7774_v42  ;;  %v5821_v40 = vld [vmem:[#allocation16 + $0x1] ss:$0 sm:$0xff] }
 0x509   :  { %v703_v43 = vpop.f32.mrf.mxu1 }
 0x50a   :  { %v704_v44 = vadd.f32 %v703_v43, %v7772_v41  ;;  %v725_v54 = vsel %vm724_vm8, %v712_v47, -inf }
 0x50b   :  { %v6424_v45 = vpop.f32.mrf.mxu1 }
 0x50c   :  { %v718_v48 = vsel %vm717_vm7, %v704_v44, -inf }
 0x50d   :  { %v706_v49 = vpop.f32.mrf.mxu1  ;;  %719 = vmax.xlane.f32.xlu0 %v718_v48 }
 0x50e   :  { %v707_v50 = vadd.f32 %v706_v49, %v7777_v46 }
 0x50f   :  { %v6447_v51 = vpop.f32.mrf.mxu1 }
 0x510   :  { %v1021_v52 = vpack.c.bf16 %v6447_v51, %v6447_v51  ;;  %v721_v53 = vsel %vm717_vm7, %v707_v50, -inf }
 0x511   :  { %v939_v55 = vpop.f32.mrf.mxu1  ;;  %722 = vmax.xlane.f32.xlu1 %v721_v53  ;;  %726 = vmax.xlane.f32.xlu0 %v725_v54 }
 0x512   :  { %v1032_v56 = vsel %vm243_vm1, %v1021_v52, 0  ;;  %6908 = vmatprep.subr.msk.bf16.mxu1 %vm243_vm1, %v1021_v52 }
 0x513   :  { %v6448_v57 = vpop.f32.mrf.mxu1  ;;  %6458 = vmatpush3.bf16.xpose.msra.mxu1 %v1032_v56 }
 0x515   :  { %v942_v58 = vpop.f32.mrf.mxu1 }
 0x516   :  { %v1020_v59 = vpack.c.bf16 %v942_v58, %v939_v55 }
 0x518   :  { %6909 = vmatprep.subr.msk.bf16.mxu1 %vm243_vm1, %v1020_v59  ;;  %v1029_v60 = vsel %vm243_vm1, %v1020_v59, 0 }
 0x51b   :  { %6460 = vmatpush3.bf16.xpose.msra.mxu1 %v1029_v60 }
 0x51c   :  { %6479 = vmatprep.subr.bf16.mxu1 %v6961_v33 }
 0x596   :  { %v720_v61 = vpop.xlane.xlu0 %719 }
 0x597   :  { %v728_v62 = vsub.f32 %v704_v44, %v720_v61 }
 0x599   :  { %v731_v63 = vmul.f32 1.442695, %v728_v62 }
 0x59a   :  { %v723_v1 = vpop.xlane.xlu1 %722  ;;  %v727_v2 = vpop.xlane.xlu0 %726 }
 0x59b   :  { %7053 = vpow2.f32 %v731_v63  ;;  %v729_v3 = vsub.f32 %v707_v50, %v723_v1  ;;  %v730_v4 = vsub.f32 %v712_v47, %v727_v2 }
 0x59d   :  { %v733_v5 = vmul.f32 1.442695, %v729_v3  ;;  %v735_v7 = vmul.f32 1.442695, %v730_v4 }
 0x59f   :  { %7055 = vpow2.f32 %v733_v5 }
 0x5a0   :  { %7057 = vpow2.f32 %v735_v7 }
 0x5a8   :  { %v7054_v9 = vpop.eup %7053 }
 0x5a9   :  { %v737_v10 = vsel %vm717_vm7, %v7054_v9, 0.0 }
 0x5aa   :  { %738 = vadd.xlane.f32.xlu1 %v737_v10 }
 0x5ac   :  { %v7056_v11 = vpop.eup %7055 }
 0x5ad   :  { %v7058_v12 = vpop.eup %7057  ;;  %v740_v13 = vsel %vm717_vm7, %v7056_v11, 0.0 }
 0x5ae   :  { %741 = vadd.xlane.f32.xlu0 %v740_v13  ;;  %v743_v15 = vsel %vm724_vm8, %v7058_v12, 0.0 }
 0x5af   :  { %744 = vadd.xlane.f32.xlu1 %v743_v15 }
 0x633   :  { %v739_v17 = vpop.xlane.xlu1 %738 }
 0x634   :  { %7059 = vrcp.f32 %v739_v17 }
 0x637   :  { %v742_v18 = vpop.xlane.xlu0 %741 }
 0x638   :  { %v745_v20 = vpop.xlane.xlu1 %744  ;;  %7061 = vrcp.f32 %v742_v18 }
 0x639   :  { %7063 = vrcp.f32 %v745_v20 }
 0x641   :  { %v7060_v21 = vpop.eup %7059 }
 0x642   :  { %v749_v25 = vmul.f32 %v7060_v21, %v7054_v9 }
 0x645   :  { %v7062_v22 = vpop.eup %7061 }
 0x646   :  { %v7064_v23 = vpop.eup %7063  ;;  %v750_v26 = vmul.f32 %v7062_v22, %v7056_v11 }
 0x647   :  { %v751_v27 = vmul.f32 %v7064_v23, %v7058_v12 }
 0x648   :  { %v752_v28 = vpack.c.bf16 %v750_v26, %v749_v25 }
 0x649   :  { %v753_v29 = vpack.c.bf16 %v751_v27, %v751_v27 }
 0x64a   :  { %6429 = vmatprep.mubr.msk.bf16.mxu0 %vm717_vm7, %v752_v28 }
 0x64b   :  { %6430 = vmatmul.mubr.msk.bf16.vlgmr.msra.gmra.mxu0 %vm717_vm7, %v753_v29 }
 0x64c   :  { %6434 = vmatpush3.bf16.msra.mxu0 %v6957_v16  ;;  %6437 = vmatprep.mubr.msk.bf16.mxu0 %vm390_vm4, %v7744_v6 }
 0x64d   :  { %6435 = vmatprep.subr.bf16.mxu0 %v6958_v30 }
 0x650   :  { %6436 = vmatpush3.bf16.msra.mxu0 %v6958_v30 }
 0x651   :  { %6449 = vmatprep.subr.bf16.mxu0 %v6959_v31 }
 0x653   :  { %6438 = vmatmul.mubr.msk.bf16.vlgmr.msra.gmra.mxu0 %vm390_vm4, %v7750_v8 }
 0x654   :  { %6450 = vmatpush3.bf16.msra.mxu0 %v6959_v31  ;;  %6453 = vmatprep.mubr.msk.bf16.mxu0 %vm390_vm4, %v7744_v6 }
 0x655   :  { %6451 = vmatprep.subr.bf16.mxu0 %v6960_v32 }
 0x658   :  { %6452 = vmatpush3.bf16.msra.mxu0 %v6960_v32 }
 0x65b   :  { %6454 = vmatmul.mubr.msk.bf16.vlgmr.msra.gmra.mxu0 %vm390_vm4, %v7750_v8 }
 0x70b   :  { %v6431_v34 = vpop.f32.mrf.mxu0 }
 0x70c   :  { %v817_v57 = vpack.c.bf16 %v6431_v34, %v6431_v34 }
 0x70d   :  { %v800_v35 = vpop.f32.mrf.mxu0 }
 0x70f   :  { %v6432_v36 = vpop.f32.mrf.mxu0 }
 0x711   :  { %v803_v37 = vpop.f32.mrf.mxu0 }
 0x712   :  { %v816_v8 = vpack.c.bf16 %v803_v37, %v800_v35 }
 0x713   :  { %v6439_v38 = vpop.f32.mrf.mxu0 }
 0x714   :  { %v883_v44 = vadd.f32 %v6439_v38, %v5821_v40 }
 0x715   :  { %v874_v39 = vpop.f32.mrf.mxu0 }
 0x716   :  { %v875_v47 = vadd.f32 %v5821_v40, %v874_v39  ;;  %v1019_v51 = vpack.c.bf16 %v883_v44, %v883_v44  ;;  %v6962_v39 = vld [vmem:[#allocation18 + $0x8] sm:$0xff]  }
 0x717   :  { %v6440_v43 = vpop.f32.mrf.mxu0 }
 0x719   :  { %v877_v45 = vpop.f32.mrf.mxu0 }
 0x71a   :  { %v878_v48 = vadd.f32 %v5821_v40, %v877_v45 }
 0x71b   :  { %v6455_v6 = vpop.f32.mrf.mxu0 }
 0x71c   :  { %v1018_v49 = vpack.c.bf16 %v878_v48, %v875_v47  ;;  %v1118_v50 = vpack.c.bf16 %v6455_v6, %v6455_v6 }
 0x71d   :  { %v1004_v52 = vpop.f32.mrf.mxu0 }
 0x71e   :  { %v1126_v53 = vsel %vm762_vm6, %v1118_v50, 0  ;;  %6461 = vmatprep.mubr.msk.bf16.mxu1 %vm243_vm1, %v1018_v49  ;;  %6910 = vmatprep.subr.msk.bf16.mxu0 %vm762_vm6, %v1118_v50 }
 0x71f   :  { %v6456_v54 = vpop.f32.mrf.mxu0  ;;  %6462 = vmatmul.mubr.msk.bf16.vlgmr.msra.gmra.mxu1 %vm243_vm1, %v1019_v51  ;;  %6466 = vmatpush3.bf16.msra.mxu0 %v1126_v53 }
 0x720   :  { %6481 = vmatprep.mubr.msk.bf16.mxu1 %vm243_vm1, %v816_v8  ;;  %6480 = vmatpush3.bf16.msra.mxu1 %v6961_v33 }
 0x721   :  { %v1007_v55 = vpop.f32.mrf.mxu0 }
 0x722   :  { %v1117_v56 = vpack.c.bf16 %v1007_v55, %v1004_v52  ;;  %v5844_v55 = vld [vmem:[#allocation13 + $0x2] ss:$0 sm:$0xff] }
 0x724   :  { %6467 = vmatprep.subr.bf16.mxu0 %v1117_v56 }
 0x725   :  { %6468 = vmatpush3.bf16.msra.mxu0 %v1117_v56 }
 0x726   :  { %6473 = vmatprep.subr.bf16.mxu0 %v6962_v39 }
 0x727   :  { %6482 = vmatmul.mubr.msk.bf16.vlgmr.msra.gmra.mxu1 %vm243_vm1, %v817_v57 }
 0x7df   :  { %v6463_v58 = vpop.f32.mrf.mxu1 }
 0x7e0   :  { %v1077_v62 = vadd.f32 %v6463_v58, %v7774_v42 }
 0x7e1   :  { %v1068_v59 = vpop.f32.mrf.mxu1 }
 0x7e2   :  { %v1069_v60 = vadd.f32 %v1068_v59, %v7772_v41  ;;  %v1088_v5 = vsel %vm724_vm8, %v1077_v62, -inf }
 0x7e3   :  { %v6464_v61 = vpop.f32.mrf.mxu1 }
 0x7e4   :  { %v1082_v63 = vsel %vm717_vm7, %v1069_v60, -inf }
 0x7e5   :  { %v1071_v1 = vpop.f32.mrf.mxu1  ;;  %1083 = vmax.xlane.f32.xlu0 %v1082_v63 }
 0x7e6   :  { %v1072_v2 = vadd.f32 %v1071_v1, %v7777_v46 }
 0x7e7   :  { %v6483_v3 = vpop.f32.mrf.mxu1 }
 0x7e8   :  { %v1085_v4 = vsel %vm717_vm7, %v1072_v2, -inf }
 0x7e9   :  { %1086 = vmax.xlane.f32.xlu1 %v1085_v4  ;;  %1089 = vmax.xlane.f32.xlu0 %v1088_v5  ;;  %v1287_v7 = vpop.f32.mrf.mxu1 }
 0x7eb   :  { %v6484_v9 = vpop.f32.mrf.mxu1 }
 0x7ed   :  { %v1290_v54 = vpop.f32.mrf.mxu1 }
 0x86e   :  { %v1084_v10 = vpop.xlane.xlu0 %1083 }
 0x86f   :  { %v1091_v11 = vsub.f32 %v1069_v60, %v1084_v10 }
 0x871   :  { %v1094_v12 = vmul.f32 1.442695, %v1091_v11 }
 0x872   :  { %v1087_v13 = vpop.xlane.xlu1 %1086  ;;  %v1090_v15 = vpop.xlane.xlu0 %1089 }
 0x873   :  { %7065 = vpow2.f32 %v1094_v12  ;;  %v1092_v16 = vsub.f32 %v1072_v2, %v1087_v13  ;;  %v1093_v17 = vsub.f32 %v1077_v62, %v1090_v15 }
 0x875   :  { %v1096_v18 = vmul.f32 1.442695, %v1092_v16  ;;  %v1098_v20 = vmul.f32 1.442695, %v1093_v17  ;;  %v6963_v17 = vld [vmem:[#allocation19 + $0x8] sm:$0xff]  }
 0x877   :  { %7067 = vpow2.f32 %v1096_v18  ;;  %v6964_v18 = vld [vmem:[#allocation19] sm:$0xff]  }
 0x878   :  { %7069 = vpow2.f32 %v1098_v20 }
 0x880   :  { %v7066_v21 = vpop.eup %7065 }
 0x881   :  { %v1100_v22 = vsel %vm717_vm7, %v7066_v21, 0.0 }
 0x882   :  { %1101 = vadd.xlane.f32.xlu1 %v1100_v22 }
 0x884   :  { %v7068_v23 = vpop.eup %7067 }
 0x885   :  { %v7070_v25 = vpop.eup %7069  ;;  %v1103_v26 = vsel %vm717_vm7, %v7068_v23, 0.0 }
 0x886   :  { %1104 = vadd.xlane.f32.xlu0 %v1103_v26  ;;  %v1106_v27 = vsel %vm724_vm8, %v7070_v25, 0.0 }
 0x887   :  { %1107 = vadd.xlane.f32.xlu1 %v1106_v27 }
 0x90b   :  { %v1102_v28 = vpop.xlane.xlu1 %1101 }
 0x90c   :  { %7071 = vrcp.f32 %v1102_v28 }
 0x90f   :  { %v1105_v29 = vpop.xlane.xlu0 %1104 }
 0x910   :  { %v1108_v30 = vpop.xlane.xlu1 %1107  ;;  %7073 = vrcp.f32 %v1105_v29 }
 0x911   :  { %7075 = vrcp.f32 %v1108_v30 }
 0x919   :  { %v7072_v31 = vpop.eup %7071 }
 0x91a   :  { %v1112_v34 = vmul.f32 %v7072_v31, %v7066_v21 }
 0x91d   :  { %v7074_v32 = vpop.eup %7073 }
 0x91e   :  { %v7076_v33 = vpop.eup %7075  ;;  %v1113_v35 = vmul.f32 %v7074_v32, %v7068_v23  ;;  %v5845_v32 = vld [vmem:[#allocation13 + $0x3] ss:$0 sm:$0xff] }
 0x91f   :  { %v1114_v36 = vmul.f32 %v7076_v33, %v7070_v25 }
 0x920   :  { %v1115_v37 = vpack.c.bf16 %v1113_v35, %v1112_v34 }
 0x921   :  { %v1116_v38 = vpack.c.bf16 %v1114_v36, %v1114_v36 }
 0x922   :  { %6469 = vmatprep.mubr.msk.bf16.mxu0 %vm717_vm7, %v1115_v37 }
 0x923   :  { %6470 = vmatmul.mubr.msk.bf16.vlgmr.msra.gmra.mxu0 %vm717_vm7, %v1116_v38  ;;  %v5846_v38 = vld [vmem:[#allocation13 + $0x4] ss:$0 sm:$0xff] }
 0x924   :  { %6474 = vmatpush3.bf16.msra.mxu0 %v6962_v39 }
 0x925   :  { %6485 = vmatprep.subr.bf16.mxu0 %v6963_v17 }
 0x9e3   :  { %v6471_v40 = vpop.f32.mrf.mxu0 }
 0x9e4   :  { %v1180_v48 = vpack.c.bf16 %v6471_v40, %v6471_v40 }
 0x9e5   :  { %v1162_v43 = vpop.f32.mrf.mxu0 }
 0x9e7   :  { %v6472_v44 = vpop.f32.mrf.mxu0 }
 0x9e9   :  { %v1165_v45 = vpop.f32.mrf.mxu0 }
 0x9ea   :  { %v1179_v47 = vpack.c.bf16 %v1165_v45, %v1162_v43 }
 0x9ec   :  { %6475 = vmatprep.mubr.msk.bf16.mxu0 %vm243_vm1, %v1179_v47 }
 0x9ed   :  { %6476 = vmatmul.mubr.msk.bf16.vlgmr.msra.gmra.mxu0 %vm243_vm1, %v1180_v48 }
 0x9ee   :  { %6486 = vmatpush3.bf16.msra.mxu0 %v6963_v17 }
 0x9ef   :  { %6487 = vmatprep.subr.bf16.mxu0 %v6964_v18 }
 0x9f2   :  { %6488 = vmatpush3.bf16.msra.mxu0 %v6964_v18 }
 0xaad   :  { %v6477_v6 = vpop.f32.mrf.mxu0 }
 0xaae   :  { %v1296_v49 = vadd.f32 %v6483_v3, %v6477_v6  ;;  %v6965_v6 = vld [vmem:[%s8439_s15 + $0x38] sm:$0xff]  }
 0xaaf   :  { %v1227_v50 = vpop.f32.mrf.mxu0  ;;  %6493 = vmatprep.subr.bf16.mxu1 %v6965_v6 }
 0xab0   :  { %v1288_v51 = vadd.f32 %v1287_v7, %v1227_v50  ;;  %v1303_v8 = vadd.f32 %v1296_v49, %v7734_v24  ;;  %6494 = vmatpush3.bf16.msra.mxu1 %v6965_v6  ;;  %v6966_v49 = vld [vmem:[%s8439_s15 + $0x30] sm:$0xff]   ;;  %v6967_v50 = vld [vmem:[%s8439_s15 + $0x28] sm:$0xff]  }
 0xab1   :  { %v6478_v52 = vpop.f32.mrf.mxu0  ;;  %6495 = vmatprep.subr.bf16.mxu1 %v6966_v49 }
 0xab2   :  { %v1301_v53 = vadd.f32 %v1288_v51, %v7726_v14  ;;  %v7824_v59 = vadd.f32 %v5844_v55, %v1303_v8  ;;  %v6968_v51 = vld [vmem:[%s8439_s15 + $0x20] sm:$0xff]   ;;  %v6969_v52 = vld [vmem:[%s8439_s15 + $0x18] sm:$0xff]   ;;  %v6970_v8 = vld [vmem:[%s8439_s15 + $0x10] sm:$0xff]  }
 0xab3   :  { %v1230_v56 = vpop.f32.mrf.mxu0 }
 0xab4   :  { %v7822_v57 = vadd.f32 %v5844_v55, %v1301_v53  ;;  %v1291_v58 = vadd.f32 %v1290_v54, %v1230_v56  ;;  %v1320_v14 = vsel %vm397_vm5, %v7824_v59, 0.0  ;;  %6496 = vmatpush3.bf16.msra.mxu1 %v6966_v49  ;;  %v6971_v53 = vld [vmem:[%s8439_s15 + $0x8] sm:$0xff]   ;;  %v6972_v54 = vld [vmem:[%s8439_s15] sm:$0xff]  }
 0xab5   :  { %6497 = vmatprep.subr.bf16.mxu1 %v6967_v50 }
 0xab6   :  { %v1302_v60 = vadd.f32 %v1291_v58, %v7730_v19  ;;  %v1314_v61 = vsel %vm390_vm4, %v7822_v57, 0.0 }
 0xab7   :  { %1315 = vadd.xlane.f32.xlu0 %v1314_v61 }
 0xab8   :  { %v7829_v62 = vadd.f32 %v5844_v55, %v1302_v60  ;;  %6498 = vmatpush3.bf16.msra.mxu1 %v6967_v50  ;;  %v5847_v55 = vld [vmem:[#allocation21] ss:$0 sm:$0xff] }
 0xab9   :  { %6499 = vmatprep.subr.bf16.mxu1 %v6968_v51 }
 0xaba   :  { %v1317_v24 = vsel %vm390_vm4, %v7829_v62, 0.0 }
 0xabb   :  { %1318 = vadd.xlane.f32.xlu1 %v1317_v24  ;;  %1321 = vadd.xlane.f32.xlu0 %v1320_v14 }
 0xabc   :  { %6500 = vmatpush3.bf16.msra.mxu1 %v6968_v51 }
 0xabd   :  { %6501 = vmatprep.subr.bf16.mxu1 %v6969_v52 }
 0xac0   :  { %6502 = vmatpush3.bf16.msra.mxu1 %v6969_v52 }
 0xac1   :  { %6503 = vmatprep.subr.bf16.mxu1 %v6970_v8 }
 0xac4   :  { %6504 = vmatpush3.bf16.msra.mxu1 %v6970_v8 }
 0xac5   :  { %6505 = vmatprep.subr.bf16.mxu1 %v6971_v53 }
 0xac8   :  { %6506 = vmatpush3.bf16.msra.mxu1 %v6971_v53 }
 0xac9   :  { %6507 = vmatprep.subr.bf16.mxu1 %v6972_v54 }
 0xacc   :  { %6508 = vmatpush3.bf16.msra.mxu1 %v6972_v54 }
 0xb40   :  { %v1316_v63 = vpop.xlane.xlu0 %1315 }
 0xb41   :  { %v1323_v1 = vmul.f32 0.03125, %v1316_v63 }
 0xb43   :  { %v1326_v2 = vsub.f32 %v7822_v57, %v1323_v1 }
 0xb44   :  { %v1319_v3 = vpop.xlane.xlu1 %1318  ;;  %v1322_v19 = vpop.xlane.xlu0 %1321 }
 0xb45   :  { %v1324_v4 = vmul.f32 0.03125, %v1319_v3  ;;  %v1325_v5 = vmul.f32 0.03125, %v1322_v19  ;;  %v1329_v7 = vmul.f32 %v1326_v2, %v1326_v2 }
 0xb47   :  { %v1327_v9 = vsub.f32 %v7829_v62, %v1324_v4  ;;  %v1328_v10 = vsub.f32 %v7824_v59, %v1325_v5  ;;  %v1332_v11 = vsel %vm390_vm4, %v1329_v7, 0.0 }
 0xb48   :  { %1333 = vadd.xlane.f32.xlu1 %v1332_v11 }
 0xb49   :  { %v1330_v12 = vmul.f32 %v1327_v9, %v1327_v9  ;;  %v1331_v13 = vmul.f32 %v1328_v10, %v1328_v10 }
 0xb4b   :  { %v1335_v15 = vsel %vm390_vm4, %v1330_v12, 0.0  ;;  %v1338_v16 = vsel %vm397_vm5, %v1331_v13, 0.0 }
 0xb4c   :  { %1336 = vadd.xlane.f32.xlu0 %v1335_v15  ;;  %1339 = vadd.xlane.f32.xlu1 %v1338_v16 }
 0xbd1   :  { %v1334_v20 = vpop.xlane.xlu1 %1333 }
 0xbd2   :  { %v1341_v21 = vmul.f32 0.03125, %v1334_v20 }
 0xbd4   :  { %v1344_v22 = vadd.f32 1e-05, %v1341_v21 }
 0xbd5   :  { %v1340_v23 = vpop.xlane.xlu1 %1339  ;;  %v1337_v25 = vpop.xlane.xlu0 %1336 }
 0xbd6   :  { %7077 = vrsqrt.f32 %v1344_v22  ;;  %v1343_v26 = vmul.f32 0.03125, %v1340_v23  ;;  %v1342_v27 = vmul.f32 0.03125, %v1337_v25 }
 0xbd8   :  { %v1346_v28 = vadd.f32 1e-05, %v1343_v26  ;;  %v1345_v29 = vadd.f32 1e-05, %v1342_v27 }
 0xbda   :  { %7079 = vrsqrt.f32 %v1346_v28 }
 0xbdb   :  { %7081 = vrsqrt.f32 %v1345_v29 }
 0xbe3   :  { %v7078_v30 = vpop.eup %7077 }
 0xbe4   :  { %v1350_v31 = vmul.f32 %v7078_v30, %v1326_v2 }
 0xbe6   :  { %v1357_v37 = vmul.f32 %v5845_v32, %v1350_v31 }
 0xbe7   :  { %v7080_v33 = vpop.eup %7079 }
 0xbe8   :  { %v7082_v34 = vpop.eup %7081  ;;  %v1352_v35 = vmul.f32 %v7080_v33, %v1328_v10  ;;  %v1364_v44 = vadd.f32 %v5846_v38, %v1357_v37 }
 0xbe9   :  { %v1351_v36 = vmul.f32 %v7082_v34, %v1327_v9 }
 0xbea   :  { %v1359_v39 = vmul.f32 %v5845_v32, %v1352_v35 }
 0xbeb   :  { %v1358_v40 = vmul.f32 %v5845_v32, %v1351_v36 }
 0xbec   :  { %v1366_v43 = vadd.f32 %v5846_v38, %v1359_v39 }
 0xbed   :  { %v1365_v45 = vadd.f32 %v5846_v38, %v1358_v40 }
 0xbee   :  { %v1372_v47 = vpack.c.bf16 %v1366_v43, %v1366_v43 }
 0xbef   :  { %v1371_v48 = vpack.c.bf16 %v1365_v45, %v1364_v44 }
 0xbf1   :  { %6489 = vmatprep.mubr.msk.bf16.mxu0 %vm390_vm4, %v1371_v48 }
 0xbf2   :  { %6490 = vmatmul.mubr.msk.bf16.vlgmr.msra.gmra.mxu0 %vm390_vm4, %v1372_v47 }
 0xcb2   :  { %v6491_v56 = vpop.f32.mrf.mxu0 }
 0xcb3   :  { %v7867_v58 = vadd.f32 %v6491_v56, %v5847_v55 }
 0xcb4   :  { %v1430_v60 = vpop.f32.mrf.mxu0 }
 0xcb5   :  { %v7870_v61 = vmul.f32 0.70710677, %v7867_v58  ;;  %v7872_v24 = vadd.f32 %v5847_v55, %v1430_v60 }
 0xcb6   :  { %v6492_v14 = vpop.f32.mrf.mxu0 }
 0xcb7   :  { %v1449_v63 = vand.u32 2147483647, %v7870_v61  ;;  %v7876_v1 = vmul.f32 0.70710677, %v7872_v24  ;;  %vm1506_vm9 = vcmp.ge.f32.partialorder %v7870_v61, 0.0  ;;  %v1516_v61 = vmul.f32 0.5, %v7872_v24 }
 0xcb8   :  { %v1433_v2 = vpop.f32.mrf.mxu0 }
 0xcb9   :  { %v1452_v3 = vmul.f32 0.3275911, %v1449_v63  ;;  %v1447_v19 = vand.u32 2147483647, %v7876_v1  ;;  %v7879_v4 = vadd.f32 %v5847_v55, %v1433_v2  ;;  %v1491_v15 = vsub.f32 0.0, %v1449_v63 }
 0xcba   :  { %vm1504_vm10 = vcmp.ge.f32.partialorder %v7876_v1, 0.0 }
 0xcbb   :  { %v1455_v5 = vadd.f32 1.0, %v1452_v3  ;;  %v1450_v7 = vmul.f32 0.3275911, %v1447_v19  ;;  %v7882_v9 = vmul.f32 0.70710677, %v7879_v4  ;;  %v1489_v16 = vsub.f32 0.0, %v1447_v19 }
 0xcbc   :  { %v1494_v17 = vmul.f32 %v1491_v15, %v1449_v63 }
 0xcbd   :  { %7083 = vrcp.f32 %v1455_v5  ;;  %v1453_v10 = vadd.f32 1.0, %v1450_v7  ;;  %v1448_v11 = vand.u32 2147483647, %v7882_v9  ;;  %v1492_v20 = vmul.f32 %v1489_v16, %v1447_v19 }
 0xcbe   :  { %v1499_v23 = vmul.f32 1.442695, %v1494_v17  ;;  %vm1505_vm11 = vcmp.ge.f32.partialorder %v7882_v9, 0.0 }
 0xcbf   :  { %7085 = vrcp.f32 %v1453_v10  ;;  %v1451_v12 = vmul.f32 0.3275911, %v1448_v11  ;;  %v1490_v21 = vsub.f32 0.0, %v1448_v11  ;;  %v1495_v28 = vmul.f32 1.442695, %v1492_v20 }
 0xcc0   :  { %v1518_v20 = vmul.f32 0.5, %v7867_v58 }
 0xcc1   :  { %v1454_v13 = vadd.f32 1.0, %v1451_v12  ;;  %v1493_v29 = vmul.f32 %v1490_v21, %v1448_v11 }
 0xcc3   :  { %7087 = vrcp.f32 %v1454_v13  ;;  %v1497_v36 = vmul.f32 1.442695, %v1493_v29 }
 0xcc4   :  { %7089 = vpow2.f32 %v1499_v23 }
 0xcc5   :  { %7091 = vpow2.f32 %v1495_v28 }
 0xcc6   :  { %7093 = vpow2.f32 %v1497_v36 }
 0xcca   :  { %v7084_v18 = vpop.eup %7083 }
 0xccb   :  { %v1464_v22 = vmul.f32 1.0614054, %v7084_v18 }
 0xccc   :  { %v7086_v25 = vpop.eup %7085 }
 0xccd   :  { %v1467_v26 = vadd.f32 -1.4531521, %v1464_v22  ;;  %v1462_v27 = vmul.f32 1.0614054, %v7086_v25  ;;  %v1517_v22 = vmul.f32 0.5, %v7879_v4 }
 0xccf   :  { %v1470_v30 = vmul.f32 %v7084_v18, %v1467_v26  ;;  %v1465_v31 = vadd.f32 -1.4531521, %v1462_v27 }
 0xcd0   :  { %v7088_v32 = vpop.eup %7087 }
 0xcd1   :  { %v1473_v33 = vadd.f32 1.4214138, %v1470_v30  ;;  %v1468_v34 = vmul.f32 %v7086_v25, %v1465_v31  ;;  %v1463_v35 = vmul.f32 1.0614054, %v7088_v32  ;;  %v7090_v52 = vpop.eup %7089  ;;  %v5855_v30 = vld [vmem:[#allocation13 + $0x5] ss:$0 sm:$0xff] }
 0xcd2   :  { %v7092_v60 = vpop.eup %7091 }
 0xcd3   :  { %v1476_v37 = vmul.f32 %v7084_v18, %v1473_v33  ;;  %v1471_v38 = vadd.f32 1.4214138, %v1468_v34  ;;  %v1466_v39 = vadd.f32 -1.4531521, %v1463_v35  ;;  %v7094_v10 = vpop.eup %7093 }
 0xcd5   :  { %v1479_v40 = vadd.f32 -0.28449672, %v1476_v37  ;;  %v1474_v43 = vmul.f32 %v7086_v25, %v1471_v38  ;;  %v1469_v44 = vmul.f32 %v7088_v32, %v1466_v39 }
 0xcd7   :  { %v1482_v45 = vmul.f32 %v7084_v18, %v1479_v40  ;;  %v1477_v47 = vadd.f32 -0.28449672, %v1474_v43  ;;  %v1472_v48 = vadd.f32 1.4214138, %v1469_v44 }
 0xcd9   :  { %v1485_v6 = vadd.f32 0.2548296, %v1482_v45  ;;  %v1480_v49 = vmul.f32 %v7086_v25, %v1477_v47  ;;  %v1475_v50 = vmul.f32 %v7088_v32, %v1472_v48 }
 0xcdb   :  { %v1488_v51 = vmul.f32 %v7084_v18, %v1485_v6  ;;  %v1483_v8 = vadd.f32 0.2548296, %v1480_v49  ;;  %v1478_v53 = vadd.f32 -0.28449672, %v1475_v50 }
 0xcdd   :  { %v1503_v54 = vmul.f32 %v7090_v52, %v1488_v51  ;;  %v1486_v55 = vmul.f32 %v7086_v25, %v1483_v8  ;;  %v1481_v56 = vmul.f32 %v7088_v32, %v1478_v53  ;;  %v6973_v8 = vld [vmem:[#allocation15 + $0x68] sm:$0xff]   ;;  %v6974_v53 = vld [vmem:[#allocation15 + $0x60] sm:$0xff]  }
 0xcde   :  { %6513 = vmatprep.subr.bf16.mxu0 %v6973_v8 }
 0xcdf   :  { %v1509_v14 = vsub.f32 1.0, %v1503_v54  ;;  %v5854_v63 = vadd.f32 -1.0, %v1503_v54  ;;  %v1501_v2 = vmul.f32 %v7092_v60, %v1486_v55  ;;  %v1484_v3 = vadd.f32 0.2548296, %v1481_v56  ;;  %6514 = vmatpush3.bf16.msra.mxu0 %v6973_v8  ;;  %v6975_v54 = vld [vmem:[#allocation15 + $0x88] sm:$0xff]   ;;  %v6980_v8 = vld [vmem:[#allocation15 + $0x90] sm:$0xff]  }
 0xce0   :  { %6515 = vmatprep.subr.bf16.mxu0 %v6974_v53 }
 0xce1   :  { %v1507_v19 = vsub.f32 1.0, %v1501_v2  ;;  %v5852_v5 = vadd.f32 -1.0, %v1501_v2  ;;  %v1487_v7 = vmul.f32 %v7088_v32, %v1484_v3  ;;  %v1515_v11 = vsel %vm1506_vm9, %v1509_v14, %v5854_v63 }
 0xce2   :  { %v1521_v15 = vadd.f32 1.0, %v1515_v11  ;;  %v5864_v11 = vld [vmem:[#allocation13 + $0x6] ss:$0 sm:$0xff] }
 0xce3   :  { %v1513_v12 = vsel %vm1504_vm10, %v1507_v19, %v5852_v5  ;;  %v1502_v13 = vmul.f32 %v7094_v10, %v1487_v7  ;;  %6516 = vmatpush3.bf16.msra.mxu0 %v6974_v53  ;;  %vm5637_vm10 = vcmask 1043456  }
 0xce4   :  { %v1519_v18 = vadd.f32 1.0, %v1513_v12  ;;  %v1524_v25 = vmul.f32 %v1521_v15, %v1518_v20  ;;  %6521 = vmatprep.subr.bf16.mxu0 %v6975_v54  ;;  %v5865_v20 = vld [vmem:[#allocation13 + $0x7] ss:$0 sm:$0xff] }
 0xce5   :  { %v1508_v16 = vsub.f32 1.0, %v1502_v13  ;;  %v5853_v17 = vadd.f32 -1.0, %v1502_v13 }
 0xce6   :  { %v1522_v26 = vmul.f32 %v1519_v18, %v1516_v61  ;;  %v1542_v28 = vpack.c.bf16 %v1524_v25, %v1524_v25 }
 0xce7   :  { %v1514_v21 = vsel %vm1505_vm11, %v1508_v16, %v5853_v17 }
 0xce8   :  { %v1520_v23 = vadd.f32 1.0, %v1514_v21 }
 0xcea   :  { %v1523_v27 = vmul.f32 %v1520_v23, %v1517_v22 }
 0xcec   :  { %v1541_v1 = vpack.c.bf16 %v1523_v27, %v1522_v26  ;;  %v6976_v27 = vld [vmem:[#allocation15 + $0x80] sm:$0xff]  }
 0xcee   :  { %6509 = vmatprep.mubr.bf16.mxu1 %v1541_v1  ;;  %v6977_v1 = vld [vmem:[#allocation15 + $0xa8] sm:$0xff]  }
 0xcef   :  { %6510 = vmatmul.mubr.bf16.vlgmr.msra.gmra.mxu1 %v1542_v28  ;;  %v6978_v28 = vld [vmem:[#allocation15 + $0xa0] sm:$0xff]  }
 0xdaf   :  { %v6511_v29 = vpop.f32.mrf.mxu1 }
 0xdb0   :  { %v1639_v32 = vadd.f32 %v6511_v29, %v5855_v30 }
 0xdb1   :  { %v1630_v31 = vpop.f32.mrf.mxu1 }
 0xdb2   :  { %v1631_v9 = vadd.f32 %v5855_v30, %v1630_v31  ;;  %v7895_v4 = vadd.f32 %v1639_v32, %v7824_v59  ;;  %v5866_v32 = vld [vmem:[#allocation16 + $0x2] ss:$0 sm:$0xff] }
 0xdb3   :  { %v6512_v33 = vpop.f32.mrf.mxu1 }
 0xdb4   :  { %v7892_v58 = vadd.f32 %v1631_v9, %v7822_v57  ;;  %v1655_v38 = vsel %vm397_vm5, %v7895_v4, 0.0 }
 0xdb5   :  { %v1633_v24 = vpop.f32.mrf.mxu1 }
 0xdb6   :  { %v1634_v34 = vadd.f32 %v5855_v30, %v1633_v24  ;;  %v1649_v35 = vsel %vm390_vm4, %v7892_v58, 0.0 }
 0xdb7   :  { %1650 = vadd.xlane.f32.xlu0 %v1649_v35 }
 0xdb8   :  { %v7900_v36 = vadd.f32 %v1634_v34, %v7829_v62 }
 0xdba   :  { %v1652_v37 = vsel %vm390_vm4, %v7900_v36, 0.0 }
 0xdbb   :  { %1653 = vadd.xlane.f32.xlu1 %v1652_v37  ;;  %1656 = vadd.xlane.f32.xlu0 %v1655_v38 }
 0xe40   :  { %v1651_v57 = vpop.xlane.xlu0 %1650 }
 0xe41   :  { %v1658_v39 = vmul.f32 0.03125, %v1651_v57 }
 0xe43   :  { %v1661_v59 = vsub.f32 %v7892_v58, %v1658_v39 }
 0xe44   :  { %v1654_v40 = vpop.xlane.xlu1 %1653  ;;  %v1657_v43 = vpop.xlane.xlu0 %1656 }
 0xe45   :  { %v1659_v44 = vmul.f32 0.03125, %v1654_v40  ;;  %v1660_v45 = vmul.f32 0.03125, %v1657_v43  ;;  %v1664_v47 = vmul.f32 %v1661_v59, %v1661_v59 }
 0xe47   :  { %v1662_v62 = vsub.f32 %v7900_v36, %v1659_v44  ;;  %v1663_v48 = vsub.f32 %v7895_v4, %v1660_v45  ;;  %v1667_v6 = vsel %vm390_vm4, %v1664_v47, 0.0  ;;  %v6979_v45 = vld [vmem:[#allocation15 + $0x98] sm:$0xff]  }
 0xe48   :  { %1668 = vadd.xlane.f32.xlu1 %v1667_v6 }
 0xe49   :  { %v1665_v49 = vmul.f32 %v1662_v62, %v1662_v62  ;;  %v1666_v50 = vmul.f32 %v1663_v48, %v1663_v48 }
 0xe4b   :  { %v1670_v51 = vsel %vm390_vm4, %v1665_v49, 0.0  ;;  %v1673_v52 = vsel %vm397_vm5, %v1666_v50, 0.0 }
 0xe4c   :  { %1671 = vadd.xlane.f32.xlu0 %v1670_v51  ;;  %1674 = vadd.xlane.f32.xlu1 %v1673_v52 }
 0xed1   :  { %v1669_v55 = vpop.xlane.xlu1 %1668 }
 0xed2   :  { %v1676_v56 = vmul.f32 0.03125, %v1669_v55 }
 0xed4   :  { %v1679_v60 = vadd.f32 1e-05, %v1676_v56 }
 0xed5   :  { %v1675_v14 = vpop.xlane.xlu1 %1674  ;;  %v1672_v63 = vpop.xlane.xlu0 %1671 }
 0xed6   :  { %7095 = vrsqrt.f32 %v1679_v60  ;;  %v1678_v2 = vmul.f32 0.03125, %v1675_v14  ;;  %v1677_v3 = vmul.f32 0.03125, %v1672_v63 }
 0xed8   :  { %v1681_v19 = vadd.f32 1e-05, %v1678_v2  ;;  %v1680_v5 = vadd.f32 1e-05, %v1677_v3 }
 0xeda   :  { %7097 = vrsqrt.f32 %v1681_v19 }
 0xedb   :  { %7099 = vrsqrt.f32 %v1680_v5 }
 0xee3   :  { %v7096_v7 = vpop.eup %7095 }
 0xee4   :  { %v1685_v10 = vmul.f32 %v7096_v7, %v1661_v59 }
 0xee6   :  { %v1692_v16 = vmul.f32 %v5864_v11, %v1685_v10 }
 0xee7   :  { %v7098_v12 = vpop.eup %7097 }
 0xee8   :  { %v7100_v13 = vpop.eup %7099  ;;  %v1687_v15 = vmul.f32 %v7098_v12, %v1663_v48  ;;  %v1699_v22 = vadd.f32 %v5865_v20, %v1692_v16 }
 0xee9   :  { %v1686_v17 = vmul.f32 %v7100_v13, %v1662_v62 }
 0xeea   :  { %v1694_v18 = vmul.f32 %v5864_v11, %v1687_v15 }
 0xeeb   :  { %v1693_v21 = vmul.f32 %v5864_v11, %v1686_v17 }
 0xeec   :  { %v1701_v61 = vadd.f32 %v5865_v20, %v1694_v18 }
 0xeed   :  { %v1700_v23 = vadd.f32 %v5865_v20, %v1693_v21 }
 0xeee   :  { %v7912_v25 = vpack.c.bf16 %v1701_v61, %v1701_v61 }
 0xeef   :  { %v7914_v26 = vpack.c.bf16 %v1700_v23, %v1699_v22 }
 0xef1   :  { %6517 = vmatprep.mubr.msk.bf16.mxu0 %vm390_vm4, %v7914_v26 }
 0xef2   :  { %6518 = vmatmul.mubr.msk.bf16.vlgmr.msra.gmra.mxu0 %vm390_vm4, %v7912_v25 }
 0xef3   :  { %6522 = vmatpush3.bf16.msra.mxu0 %v6975_v54  ;;  %6525 = vmatprep.mubr.msk.bf16.mxu0 %vm390_vm4, %v7914_v26 }
 0xef4   :  { %6523 = vmatprep.subr.bf16.mxu0 %v6976_v27 }
 0xef7   :  { %6524 = vmatpush3.bf16.msra.mxu0 %v6976_v27 }
 0xef8   :  { %6529 = vmatprep.subr.bf16.mxu0 %v6977_v1 }
 0xefa   :  { %6526 = vmatmul.mubr.msk.bf16.vlgmr.msra.gmra.mxu0 %vm390_vm4, %v7912_v25 }
 0xefb   :  { %6530 = vmatpush3.bf16.msra.mxu0 %v6977_v1  ;;  %6533 = vmatprep.mubr.msk.bf16.mxu0 %vm390_vm4, %v7914_v26 }
 0xefc   :  { %6531 = vmatprep.subr.bf16.mxu0 %v6978_v28 }
 0xeff   :  { %6532 = vmatpush3.bf16.msra.mxu0 %v6978_v28 }
 0xf02   :  { %6534 = vmatmul.mubr.msk.bf16.vlgmr.msra.gmra.mxu0 %vm390_vm4, %v7912_v25 }
 0xfb2   :  { %v6519_v29 = vpop.f32.mrf.mxu0 }
 0xfb3   :  { %v1775_v49 = vadd.f32 %v6519_v29, %v5866_v32 }
 0xfb4   :  { %v1766_v30 = vpop.f32.mrf.mxu0 }
 0xfb5   :  { %v1767_v33 = vadd.f32 %v5866_v32, %v1766_v30  ;;  %v1911_v52 = vpack.c.bf16 %v1775_v49, %v1775_v49 }
 0xfb6   :  { %v6520_v31 = vpop.f32.mrf.mxu0 }
 0xfb7   :  { %v6981_v31 = vld [vmem:[#allocation15 + $0x78] sm:$0xff]  }
 0xfb8   :  { %v1769_v9 = vpop.f32.mrf.mxu0 }
 0xfb9   :  { %v1770_v24 = vadd.f32 %v5866_v32, %v1769_v9 }
 0xfba   :  { %v6527_v34 = vpop.f32.mrf.mxu0 }
 0xfbb   :  { %v1910_v35 = vpack.c.bf16 %v1770_v24, %v1767_v33  ;;  %v1913_v37 = vpack.c.bf16 %v6527_v34, %v6527_v34 }
 0xfbc   :  { %v1831_v38 = vpop.f32.mrf.mxu0 }
 0xfbd   :  { %v1924_v57 = vsel %vm243_vm1, %v1913_v37, 0  ;;  %6911 = vmatprep.subr.msk.bf16.mxu0 %vm243_vm1, %v1913_v37  ;;  %6541 = vmatprep.mubr.msk.bf16.mxu0 %vm243_vm1, %v1910_v35 }
 0xfbe   :  { %v6528_v39 = vpop.f32.mrf.mxu0  ;;  %6538 = vmatpush3.bf16.xpose.msra.mxu0 %v1924_v57 }
 0xfc0   :  { %v1834_v59 = vpop.f32.mrf.mxu0 }
 0xfc1   :  { %v1912_v40 = vpack.c.bf16 %v1834_v59, %v1831_v38 }
 0xfc2   :  { %v6535_v43 = vpop.f32.mrf.mxu0 }
 0xfc3   :  { %v2010_v44 = vpack.c.bf16 %v6535_v43, %v6535_v43  ;;  %6912 = vmatprep.subr.msk.bf16.mxu0 %vm243_vm1, %v1912_v40  ;;  %v1921_v62 = vsel %vm243_vm1, %v1912_v40, 0  ;;  %v6982_v40 = vld [vmem:[#allocation15 + $0x70] sm:$0xff]   ;;  %v6983_v43 = vld [vmem:[#allocation15 + $0xb8] sm:$0xff]  }
 0xfc4   :  { %v1896_v47 = vpop.f32.mrf.mxu0 }
 0xfc5   :  { %v2018_v48 = vsel %vm762_vm6, %v2010_v44, 0  ;;  %6913 = vmatprep.subr.msk.bf16.mxu1 %vm762_vm6, %v2010_v44  ;;  %v6984_v44 = vld [vmem:[#allocation15 + $0xb0] sm:$0xff]  }
 0xfc6   :  { %v6536_v6 = vpop.f32.mrf.mxu0  ;;  %6540 = vmatpush3.bf16.xpose.msra.mxu0 %v1921_v62  ;;  %6546 = vmatpush3.bf16.msra.mxu1 %v2018_v48 }
 0xfc7   :  { %6561 = vmatprep.subr.bf16.mxu0 %v6979_v45 }
 0xfc8   :  { %v1899_v50 = vpop.f32.mrf.mxu0 }
 0xfc9   :  { %v2009_v51 = vpack.c.bf16 %v1899_v50, %v1896_v47 }
 0xfcb   :  { %6547 = vmatprep.subr.bf16.mxu1 %v2009_v51 }
 0xfcc   :  { %6548 = vmatpush3.bf16.msra.mxu1 %v2009_v51  ;;  %v5883_v51 = vld [vmem:[#allocation16 + $0x3] ss:$0 sm:$0xff] }
 0xfcd   :  { %6542 = vmatmul.mubr.msk.bf16.vlgmr.msra.gmra.mxu0 %vm243_vm1, %v1911_v52  ;;  %6553 = vmatprep.subr.bf16.mxu1 %v6981_v31 }
 0xfce   :  { %6562 = vmatpush3.bf16.msra.mxu0 %v6979_v45  ;;  %6565 = vmatprep.mubr.msk.bf16.mxu0 %vm390_vm4, %v7914_v26  ;;  %v6985_v45 = vld [vmem:[#allocation18 + $0x10] sm:$0xff]  }
 0xfcf   :  { %6563 = vmatprep.subr.bf16.mxu0 %v6980_v8 }
 0xfd2   :  { %6564 = vmatpush3.bf16.msra.mxu0 %v6980_v8 }
 0xfd5   :  { %6566 = vmatmul.mubr.msk.bf16.vlgmr.msra.gmra.mxu0 %vm390_vm4, %v7912_v25 }
0x108d   :  { %v6543_v53 = vpop.f32.mrf.mxu0 }
0x108e   :  { %v1969_v60 = vadd.f32 %v6543_v53, %v7774_v42 }
0x108f   :  { %v1960_v54 = vpop.f32.mrf.mxu0 }
0x1090   :  { %v1961_v55 = vadd.f32 %v1960_v54, %v7772_v41  ;;  %v1980_v7 = vsel %vm724_vm8, %v1969_v60, -inf }
0x1091   :  { %v6544_v56 = vpop.f32.mrf.mxu0 }
0x1092   :  { %v1974_v14 = vsel %vm717_vm7, %v1961_v55, -inf }
0x1093   :  { %v1963_v63 = vpop.f32.mrf.mxu0  ;;  %1975 = vmax.xlane.f32.xlu0 %v1974_v14 }
0x1094   :  { %v1964_v2 = vadd.f32 %v1963_v63, %v7777_v46 }
0x1095   :  { %v6567_v3 = vpop.f32.mrf.mxu0 }
0x1096   :  { %v2276_v19 = vpack.c.bf16 %v6567_v3, %v6567_v3  ;;  %v1977_v5 = vsel %vm717_vm7, %v1964_v2, -inf }
0x1097   :  { %v2194_v10 = vpop.f32.mrf.mxu0  ;;  %1978 = vmax.xlane.f32.xlu1 %v1977_v5  ;;  %1981 = vmax.xlane.f32.xlu0 %v1980_v7 }
0x1098   :  { %v2287_v41 = vsel %vm243_vm1, %v2276_v19, 0  ;;  %6914 = vmatprep.subr.msk.bf16.mxu0 %vm243_vm1, %v2276_v19 }
0x1099   :  { %v6568_v42 = vpop.f32.mrf.mxu0  ;;  %6578 = vmatpush3.bf16.xpose.msra.mxu0 %v2287_v41 }
0x109a   :  { %v7251_v42 = vld [vmem:[#allocation7] sm:$0xff] }
0x109b   :  { %v2197_v11 = vpop.f32.mrf.mxu0 }
0x109c   :  { %v2275_v12 = vpack.c.bf16 %v2197_v11, %v2194_v10 }
0x109e   :  { %6915 = vmatprep.subr.msk.bf16.mxu0 %vm243_vm1, %v2275_v12  ;;  %v2284_v46 = vsel %vm243_vm1, %v2275_v12, 0 }
0x10a1   :  { %6580 = vmatpush3.bf16.xpose.msra.mxu0 %v2284_v46  ;;  %v7252_v46 = vld [vmem:[#allocation7 + $0x10] sm:$0x3] }
0x10a2   :  { %6599 = vmatprep.subr.bf16.mxu0 %v6985_v45 }
0x111c   :  { %v1976_v13 = vpop.xlane.xlu0 %1975 }
0x111d   :  { %v1983_v15 = vsub.f32 %v1961_v55, %v1976_v13 }
0x111f   :  { %v1986_v16 = vmul.f32 1.442695, %v1983_v15 }
0x1120   :  { %v1979_v17 = vpop.xlane.xlu1 %1978  ;;  %v1982_v18 = vpop.xlane.xlu0 %1981 }
0x1121   :  { %7101 = vpow2.f32 %v1986_v16  ;;  %v1984_v20 = vsub.f32 %v1964_v2, %v1979_v17  ;;  %v1985_v21 = vsub.f32 %v1969_v60, %v1982_v18  ;;  %v7253_v17 = vld [vmem:[#allocation7 + $0x8] sm:$0xff] }
0x1123   :  { %v1988_v61 = vmul.f32 1.442695, %v1984_v20  ;;  %v1990_v22 = vmul.f32 1.442695, %v1985_v21 }
0x1125   :  { %7103 = vpow2.f32 %v1988_v61 }
0x1126   :  { %7105 = vpow2.f32 %v1990_v22 }
0x112e   :  { %v7102_v23 = vpop.eup %7101 }
0x112f   :  { %v1992_v27 = vsel %vm717_vm7, %v7102_v23, 0.0 }
0x1130   :  { %1993 = vadd.xlane.f32.xlu1 %v1992_v27 }
0x1132   :  { %v7104_v1 = vpop.eup %7103 }
0x1133   :  { %v7106_v28 = vpop.eup %7105  ;;  %v1995_v29 = vsel %vm717_vm7, %v7104_v1, 0.0 }
0x1134   :  { %1996 = vadd.xlane.f32.xlu0 %v1995_v29  ;;  %v1998_v30 = vsel %vm724_vm8, %v7106_v28, 0.0 }
0x1135   :  { %1999 = vadd.xlane.f32.xlu1 %v1998_v30 }
0x11b9   :  { %v1994_v32 = vpop.xlane.xlu1 %1993 }
0x11ba   :  { %7107 = vrcp.f32 %v1994_v32 }
0x11bd   :  { %v1997_v9 = vpop.xlane.xlu0 %1996 }
0x11be   :  { %v2000_v33 = vpop.xlane.xlu1 %1999  ;;  %7109 = vrcp.f32 %v1997_v9 }
0x11bf   :  { %7111 = vrcp.f32 %v2000_v33 }
0x11c7   :  { %v7108_v24 = vpop.eup %7107 }
0x11c8   :  { %v2004_v37 = vmul.f32 %v7108_v24, %v7102_v23 }
0x11cb   :  { %v7110_v34 = vpop.eup %7109 }
0x11cc   :  { %v7112_v35 = vpop.eup %7111  ;;  %v2005_v38 = vmul.f32 %v7110_v34, %v7104_v1 }
0x11cd   :  { %v2006_v57 = vmul.f32 %v7112_v35, %v7106_v28 }
0x11ce   :  { %v2007_v39 = vpack.c.bf16 %v2005_v38, %v2004_v37 }
0x11cf   :  { %v2008_v59 = vpack.c.bf16 %v2006_v57, %v2006_v57 }
0x11d0   :  { %6549 = vmatprep.mubr.msk.bf16.mxu1 %vm717_vm7, %v2007_v39 }
0x11d1   :  { %6550 = vmatmul.mubr.msk.bf16.vlgmr.msra.gmra.mxu1 %vm717_vm7, %v2008_v59 }
0x11d2   :  { %6554 = vmatpush3.bf16.msra.mxu1 %v6981_v31  ;;  %6557 = vmatprep.mubr.msk.bf16.mxu1 %vm390_vm4, %v7914_v26 }
0x11d3   :  { %6555 = vmatprep.subr.bf16.mxu1 %v6982_v40 }
0x11d6   :  { %6556 = vmatpush3.bf16.msra.mxu1 %v6982_v40 }
0x11d7   :  { %6569 = vmatprep.subr.bf16.mxu1 %v6983_v43 }
0x11d9   :  { %6558 = vmatmul.mubr.msk.bf16.vlgmr.msra.gmra.mxu1 %vm390_vm4, %v7912_v25 }
0x11da   :  { %6570 = vmatpush3.bf16.msra.mxu1 %v6983_v43  ;;  %6573 = vmatprep.mubr.msk.bf16.mxu1 %vm390_vm4, %v7914_v26 }
0x11db   :  { %6571 = vmatprep.subr.bf16.mxu1 %v6984_v44 }
0x11de   :  { %6572 = vmatpush3.bf16.msra.mxu1 %v6984_v44 }
0x11e1   :  { %6574 = vmatmul.mubr.msk.bf16.vlgmr.msra.gmra.mxu1 %vm390_vm4, %v7912_v25 }
0x1291   :  { %v6551_v47 = vpop.f32.mrf.mxu1 }
0x1292   :  { %v2072_v7 = vpack.c.bf16 %v6551_v47, %v6551_v47 }
0x1293   :  { %v2054_v62 = vpop.f32.mrf.mxu1 }
0x1295   :  { %v6552_v48 = vpop.f32.mrf.mxu1 }
0x1297   :  { %v2057_v6 = vpop.f32.mrf.mxu1 }
0x1298   :  { %v2071_v25 = vpack.c.bf16 %v2057_v6, %v2054_v62 }
0x1299   :  { %v6559_v49 = vpop.f32.mrf.mxu1 }
0x129a   :  { %v2138_v8 = vadd.f32 %v6559_v49, %v5883_v51 }
0x129b   :  { %v2129_v50 = vpop.f32.mrf.mxu1 }
0x129c   :  { %v2130_v54 = vadd.f32 %v5883_v51, %v2129_v50  ;;  %v2274_v14 = vpack.c.bf16 %v2138_v8, %v2138_v8  ;;  %v6986_v50 = vld [vmem:[#allocation18 + $0x18] sm:$0xff]  }
0x129d   :  { %v6560_v52 = vpop.f32.mrf.mxu1 }
0x129f   :  { %v2132_v53 = vpop.f32.mrf.mxu1 }
0x12a0   :  { %v2133_v55 = vadd.f32 %v5883_v51, %v2132_v53 }
0x12a1   :  { %v6575_v26 = vpop.f32.mrf.mxu1 }
0x12a2   :  { %v2273_v56 = vpack.c.bf16 %v2133_v55, %v2130_v54  ;;  %v2373_v60 = vpack.c.bf16 %v6575_v26, %v6575_v26 }
0x12a3   :  { %v2259_v63 = vpop.f32.mrf.mxu1 }
0x12a4   :  { %v2381_v2 = vsel %vm762_vm6, %v2373_v60, 0  ;;  %6581 = vmatprep.mubr.msk.bf16.mxu0 %vm243_vm1, %v2273_v56  ;;  %6916 = vmatprep.subr.msk.bf16.mxu1 %vm762_vm6, %v2373_v60 }
0x12a5   :  { %v6576_v3 = vpop.f32.mrf.mxu1  ;;  %6582 = vmatmul.mubr.msk.bf16.vlgmr.msra.gmra.mxu0 %vm243_vm1, %v2274_v14  ;;  %6586 = vmatpush3.bf16.msra.mxu1 %v2381_v2 }
0x12a6   :  { %6601 = vmatprep.mubr.msk.bf16.mxu0 %vm243_vm1, %v2071_v25  ;;  %6600 = vmatpush3.bf16.msra.mxu0 %v6985_v45 }
0x12a7   :  { %v2262_v19 = vpop.f32.mrf.mxu1 }
0x12a8   :  { %v2372_v5 = vpack.c.bf16 %v2262_v19, %v2259_v63  ;;  %v5906_v19 = vld [vmem:[#allocation13 + $0x8] ss:$0 sm:$0xff] }
0x12aa   :  { %6587 = vmatprep.subr.bf16.mxu1 %v2372_v5 }
0x12ab   :  { %6588 = vmatpush3.bf16.msra.mxu1 %v2372_v5 }
0x12ac   :  { %6593 = vmatprep.subr.bf16.mxu1 %v6986_v50 }
0x12ad   :  { %6602 = vmatmul.mubr.msk.bf16.vlgmr.msra.gmra.mxu0 %vm243_vm1, %v2072_v7 }
0x1365   :  { %v6583_v10 = vpop.f32.mrf.mxu0 }
0x1366   :  { %v2332_v13 = vadd.f32 %v7252_v46, %v6583_v10 }
0x1367   :  { %v2323_v41 = vpop.f32.mrf.mxu0 }
0x1368   :  { %v2324_v11 = vadd.f32 %v7251_v42, %v2323_v41  ;;  %v2343_v61 = vsel %vm724_vm8, %v2332_v13, -inf }
0x1369   :  { %v6584_v12 = vpop.f32.mrf.mxu0 }
0x136a   :  { %v2337_v15 = vsel %vm717_vm7, %v2324_v11, -inf }
0x136b   :  { %v2326_v16 = vpop.f32.mrf.mxu0  ;;  %2338 = vmax.xlane.f32.xlu0 %v2337_v15 }
0x136c   :  { %v2327_v18 = vadd.f32 %v7253_v17, %v2326_v16 }
0x136d   :  { %v6603_v20 = vpop.f32.mrf.mxu0 }
0x136e   :  { %v2340_v21 = vsel %vm717_vm7, %v2327_v18, -inf }
0x136f   :  { %2341 = vmax.xlane.f32.xlu1 %v2340_v21  ;;  %2344 = vmax.xlane.f32.xlu0 %v2343_v61  ;;  %v2542_v22 = vpop.f32.mrf.mxu0 }
0x1371   :  { %v6604_v23 = vpop.f32.mrf.mxu0 }
0x1373   :  { %v2545_v3 = vpop.f32.mrf.mxu0 }
0x13f4   :  { %v2339_v27 = vpop.xlane.xlu0 %2338 }
0x13f5   :  { %v2346_v1 = vsub.f32 %v2324_v11, %v2339_v27 }
0x13f7   :  { %v2349_v28 = vmul.f32 1.442695, %v2346_v1 }
0x13f8   :  { %v2342_v29 = vpop.xlane.xlu1 %2341  ;;  %v2345_v30 = vpop.xlane.xlu0 %2344 }
0x13f9   :  { %7113 = vpow2.f32 %v2349_v28  ;;  %v2347_v31 = vsub.f32 %v2327_v18, %v2342_v29  ;;  %v2348_v32 = vsub.f32 %v2332_v13, %v2345_v30  ;;  %v6987_v29 = vld [vmem:[#allocation19 + $0x18] sm:$0xff]   ;;  %v6988_v30 = vld [vmem:[#allocation19 + $0x10] sm:$0xff]  }
0x13fb   :  { %v2351_v9 = vmul.f32 1.442695, %v2347_v31  ;;  %v2353_v33 = vmul.f32 1.442695, %v2348_v32 }
0x13fd   :  { %7115 = vpow2.f32 %v2351_v9 }
0x13fe   :  { %7117 = vpow2.f32 %v2353_v33 }
0x1406   :  { %v7114_v24 = vpop.eup %7113 }
0x1407   :  { %v2355_v34 = vsel %vm717_vm7, %v7114_v24, 0.0 }
0x1408   :  { %2356 = vadd.xlane.f32.xlu1 %v2355_v34 }
0x140a   :  { %v7116_v35 = vpop.eup %7115 }
0x140b   :  { %v7118_v37 = vpop.eup %7117  ;;  %v2358_v38 = vsel %vm717_vm7, %v7116_v35, 0.0 }
0x140c   :  { %2359 = vadd.xlane.f32.xlu0 %v2358_v38  ;;  %v2361_v57 = vsel %vm724_vm8, %v7118_v37, 0.0 }
0x140d   :  { %2362 = vadd.xlane.f32.xlu1 %v2361_v57 }
0x1491   :  { %v2357_v39 = vpop.xlane.xlu1 %2356 }
0x1492   :  { %7119 = vrcp.f32 %v2357_v39 }
0x1495   :  { %v2360_v59 = vpop.xlane.xlu0 %2359 }
0x1496   :  { %v2363_v40 = vpop.xlane.xlu1 %2362  ;;  %7121 = vrcp.f32 %v2360_v59  ;;  %v5907_v59 = vld [vmem:[#allocation13 + $0x9] ss:$0 sm:$0xff] }
0x1497   :  { %7123 = vrcp.f32 %v2363_v40 }
0x149f   :  { %v7120_v43 = vpop.eup %7119 }
0x14a0   :  { %v2367_v47 = vmul.f32 %v7120_v43, %v7114_v24 }
0x14a3   :  { %v7122_v44 = vpop.eup %7121 }
0x14a4   :  { %v7124_v45 = vpop.eup %7123  ;;  %v2368_v62 = vmul.f32 %v7122_v44, %v7116_v35 }
0x14a5   :  { %v2369_v48 = vmul.f32 %v7124_v45, %v7118_v37 }
0x14a6   :  { %v2370_v6 = vpack.c.bf16 %v2368_v62, %v2367_v47  ;;  %v5908_v62 = vld [vmem:[#allocation13 + $0xa] ss:$0 sm:$0xff] }
0x14a7   :  { %v2371_v49 = vpack.c.bf16 %v2369_v48, %v2369_v48 }
0x14a8   :  { %6589 = vmatprep.mubr.msk.bf16.mxu1 %vm717_vm7, %v2370_v6 }
0x14a9   :  { %6590 = vmatmul.mubr.msk.bf16.vlgmr.msra.gmra.mxu1 %vm717_vm7, %v2371_v49 }
0x14aa   :  { %6594 = vmatpush3.bf16.msra.mxu1 %v6986_v50 }
0x14ab   :  { %6605 = vmatprep.subr.bf16.mxu1 %v6987_v29 }
0x1569   :  { %v6591_v51 = vpop.f32.mrf.mxu1 }
0x156a   :  { %v2435_v55 = vpack.c.bf16 %v6591_v51, %v6591_v51 }
0x156b   :  { %v2417_v52 = vpop.f32.mrf.mxu1 }
0x156d   :  { %v6592_v8 = vpop.f32.mrf.mxu1 }
0x156f   :  { %v2420_v53 = vpop.f32.mrf.mxu1 }
0x1570   :  { %v2434_v54 = vpack.c.bf16 %v2420_v53, %v2417_v52  ;;  %v6989_v53 = vld [vmem:[%s8439_s15 + $0x78] sm:$0xff]  }
0x1571   :  { %6613 = vmatprep.subr.bf16.mxu0 %v6989_v53 }
0x1572   :  { %6595 = vmatprep.mubr.msk.bf16.mxu1 %vm243_vm1, %v2434_v54  ;;  %6614 = vmatpush3.bf16.msra.mxu0 %v6989_v53  ;;  %v6990_v54 = vld [vmem:[%s8439_s15 + $0x70] sm:$0xff]  }
0x1573   :  { %6596 = vmatmul.mubr.msk.bf16.vlgmr.msra.gmra.mxu1 %vm243_vm1, %v2435_v55  ;;  %6615 = vmatprep.subr.bf16.mxu0 %v6990_v54  ;;  %v6991_v55 = vld [vmem:[%s8439_s15 + $0x68] sm:$0xff]  }
0x1574   :  { %6606 = vmatpush3.bf16.msra.mxu1 %v6987_v29 }
0x1575   :  { %6607 = vmatprep.subr.bf16.mxu1 %v6988_v30 }
0x1576   :  { %6616 = vmatpush3.bf16.msra.mxu0 %v6990_v54 }
0x1577   :  { %6617 = vmatprep.subr.bf16.mxu0 %v6991_v55 }
0x1578   :  { %6608 = vmatpush3.bf16.msra.mxu1 %v6988_v30 }
0x1579   :  { %6633 = vmatprep.subr.mxu1 %v7548_v0 }
0x157a   :  { %6618 = vmatpush3.bf16.msra.mxu0 %v6991_v55 }
0x1633   :  { %v6597_v26 = vpop.f32.mrf.mxu1 }
0x1634   :  { %v2551_v56 = vadd.f32 %v6603_v20, %v6597_v26  ;;  %v6992_v26 = vld [vmem:[%s8439_s15 + $0x60] sm:$0xff]  }
0x1635   :  { %v2482_v60 = vpop.f32.mrf.mxu1  ;;  %6619 = vmatprep.subr.bf16.mxu0 %v6992_v26 }
0x1636   :  { %v2543_v14 = vadd.f32 %v2542_v22, %v2482_v60  ;;  %v2558_v25 = vadd.f32 %v2551_v56, %v7895_v4  ;;  %6620 = vmatpush3.bf16.msra.mxu0 %v6992_v26  ;;  %v6993_v56 = vld [vmem:[%s8439_s15 + $0x58] sm:$0xff]   ;;  %v6994_v60 = vld [vmem:[%s8439_s15 + $0x50] sm:$0xff]  }
0x1637   :  { %v6598_v63 = vpop.f32.mrf.mxu1  ;;  %6621 = vmatprep.subr.bf16.mxu0 %v6993_v56 }
0x1638   :  { %v2556_v2 = vadd.f32 %v2543_v14, %v7892_v58  ;;  %v7983_v41 = vadd.f32 %v5906_v19, %v2558_v25  ;;  %v6995_v14 = vld [vmem:[%s8439_s15 + $0x48] sm:$0xff]   ;;  %v6996_v63 = vld [vmem:[%s8439_s15 + $0x40] sm:$0xff]   ;;  %v5909_v25 = vld [vmem:[#allocation21 + $0x1] ss:$0 sm:$0xff] }
0x1639   :  { %v2485_v5 = vpop.f32.mrf.mxu1 }
0x163a   :  { %v7981_v7 = vadd.f32 %v5906_v19, %v2556_v2  ;;  %v2546_v10 = vadd.f32 %v2545_v3, %v2485_v5  ;;  %v2575_v58 = vsel %vm397_vm5, %v7983_v41, 0.0  ;;  %6622 = vmatpush3.bf16.msra.mxu0 %v6993_v56 }
0x163b   :  { %6623 = vmatprep.subr.bf16.mxu0 %v6994_v60 }
0x163c   :  { %v2557_v42 = vadd.f32 %v2546_v10, %v7900_v36  ;;  %v2569_v11 = vsel %vm390_vm4, %v7981_v7, 0.0 }
0x163d   :  { %2570 = vadd.xlane.f32.xlu0 %v2569_v11 }
0x163e   :  { %v7988_v12 = vadd.f32 %v5906_v19, %v2557_v42  ;;  %6624 = vmatpush3.bf16.msra.mxu0 %v6994_v60 }
0x163f   :  { %6625 = vmatprep.subr.bf16.mxu0 %v6995_v14 }
0x1640   :  { %v2572_v4 = vsel %vm390_vm4, %v7988_v12, 0.0 }
0x1641   :  { %2573 = vadd.xlane.f32.xlu1 %v2572_v4  ;;  %2576 = vadd.xlane.f32.xlu0 %v2575_v58 }
0x1642   :  { %6626 = vmatpush3.bf16.msra.mxu0 %v6995_v14 }
0x1643   :  { %6627 = vmatprep.subr.bf16.mxu0 %v6996_v63 }
0x1646   :  { %6628 = vmatpush3.bf16.msra.mxu0 %v6996_v63 }
0x16c6   :  { %v2571_v46 = vpop.xlane.xlu0 %2570 }
0x16c7   :  { %v2578_v13 = vmul.f32 0.03125, %v2571_v46 }
0x16c9   :  { %v2581_v15 = vsub.f32 %v7981_v7, %v2578_v13 }
0x16ca   :  { %v2574_v16 = vpop.xlane.xlu1 %2573  ;;  %v2577_v36 = vpop.xlane.xlu0 %2576 }
0x16cb   :  { %v2579_v17 = vmul.f32 0.03125, %v2574_v16  ;;  %v2580_v18 = vmul.f32 0.03125, %v2577_v36  ;;  %v2584_v20 = vmul.f32 %v2581_v15, %v2581_v15 }
0x16cd   :  { %v2582_v21 = vsub.f32 %v7988_v12, %v2579_v17  ;;  %v2583_v61 = vsub.f32 %v7983_v41, %v2580_v18  ;;  %v2587_v22 = vsel %vm390_vm4, %v2584_v20, 0.0 }
0x16ce   :  { %2588 = vadd.xlane.f32.xlu1 %v2587_v22 }
0x16cf   :  { %v2585_v23 = vmul.f32 %v2582_v21, %v2582_v21  ;;  %v2586_v27 = vmul.f32 %v2583_v61, %v2583_v61 }
0x16d1   :  { %v2590_v1 = vsel %vm390_vm4, %v2585_v23, 0.0  ;;  %v2593_v28 = vsel %vm397_vm5, %v2586_v27, 0.0 }
0x16d2   :  { %2591 = vadd.xlane.f32.xlu0 %v2590_v1  ;;  %2594 = vadd.xlane.f32.xlu1 %v2593_v28 }
0x1757   :  { %v2589_v31 = vpop.xlane.xlu1 %2588 }
0x1758   :  { %v2596_v32 = vmul.f32 0.03125, %v2589_v31 }
0x175a   :  { %v2599_v9 = vadd.f32 1e-05, %v2596_v32 }
0x175b   :  { %v2595_v33 = vpop.xlane.xlu1 %2594  ;;  %v2592_v24 = vpop.xlane.xlu0 %2591 }
0x175c   :  { %7125 = vrsqrt.f32 %v2599_v9  ;;  %v2598_v34 = vmul.f32 0.03125, %v2595_v33  ;;  %v2597_v35 = vmul.f32 0.03125, %v2592_v24 }
0x175e   :  { %v2601_v37 = vadd.f32 1e-05, %v2598_v34  ;;  %v2600_v38 = vadd.f32 1e-05, %v2597_v35 }
0x1760   :  { %7127 = vrsqrt.f32 %v2601_v37 }
0x1761   :  { %7129 = vrsqrt.f32 %v2600_v38 }
0x1769   :  { %v7126_v57 = vpop.eup %7125 }
0x176a   :  { %v2605_v39 = vmul.f32 %v7126_v57, %v2581_v15 }
0x176c   :  { %v2612_v47 = vmul.f32 %v5907_v59, %v2605_v39 }
0x176d   :  { %v7128_v40 = vpop.eup %7127 }
0x176e   :  { %v7130_v43 = vpop.eup %7129  ;;  %v2607_v44 = vmul.f32 %v7128_v40, %v2583_v61  ;;  %v2619_v50 = vadd.f32 %v5908_v62, %v2612_v47 }
0x176f   :  { %v2606_v45 = vmul.f32 %v7130_v43, %v2582_v21 }
0x1770   :  { %v2614_v48 = vmul.f32 %v5907_v59, %v2607_v44 }
0x1771   :  { %v2613_v6 = vmul.f32 %v5907_v59, %v2606_v45 }
0x1772   :  { %v2621_v49 = vadd.f32 %v5908_v62, %v2614_v48 }
0x1773   :  { %v2620_v51 = vadd.f32 %v5908_v62, %v2613_v6 }
0x1774   :  { %v2628_v52 = vpack.c.bf16 %v2621_v49, %v2621_v49 }
0x1775   :  { %v2627_v8 = vpack.c.bf16 %v2620_v51, %v2619_v50 }
0x1777   :  { %6609 = vmatprep.mubr.msk.bf16.mxu1 %vm390_vm4, %v2627_v8 }
0x1778   :  { %6610 = vmatmul.mubr.msk.bf16.vlgmr.msra.gmra.mxu1 %vm390_vm4, %v2628_v52 }
0x1779   :  { %6639 = vmatprep.mubr.msk.f32.mxu1 %vm7549_vm0, %v7548_v0 }
0x1838   :  { %v6611_v2 = vpop.f32.mrf.mxu1 }
0x1839   :  { %v8029_v3 = vadd.f32 %v6611_v2, %v5909_v25 }
0x183a   :  { %v2686_v19 = vpop.f32.mrf.mxu1 }
0x183b   :  { %v8032_v5 = vmul.f32 0.70710677, %v8029_v3  ;;  %v8034_v10 = vadd.f32 %v5909_v25, %v2686_v19 }
0x183c   :  { %v6612_v42 = vpop.f32.mrf.mxu1 }
0x183d   :  { %v2705_v11 = vand.u32 2147483647, %v8032_v5  ;;  %v8038_v4 = vmul.f32 0.70710677, %v8034_v10  ;;  %vm2762_vm12 = vcmp.ge.f32.partialorder %v8032_v5, 0.0  ;;  %v2772_v5 = vmul.f32 0.5, %v8034_v10 }
0x183e   :  { %v2689_v58 = vpop.f32.mrf.mxu1 }
0x183f   :  { %v2708_v46 = vmul.f32 0.3275911, %v2705_v11  ;;  %v2703_v13 = vand.u32 2147483647, %v8038_v4  ;;  %v8041_v15 = vadd.f32 %v5909_v25, %v2689_v58  ;;  %v2747_v22 = vsub.f32 0.0, %v2705_v11 }
0x1840   :  { %vm2760_vm13 = vcmp.ge.f32.partialorder %v8038_v4, 0.0 }
0x1841   :  { %v2711_v16 = vadd.f32 1.0, %v2708_v46  ;;  %v2706_v36 = vmul.f32 0.3275911, %v2703_v13  ;;  %v8044_v17 = vmul.f32 0.70710677, %v8041_v15  ;;  %v2745_v23 = vsub.f32 0.0, %v2703_v13 }
0x1842   :  { %v2750_v27 = vmul.f32 %v2747_v22, %v2705_v11 }
0x1843   :  { %7131 = vrcp.f32 %v2711_v16  ;;  %v2709_v18 = vadd.f32 1.0, %v2706_v36  ;;  %v2704_v20 = vand.u32 2147483647, %v8044_v17  ;;  %v2748_v28 = vmul.f32 %v2745_v23, %v2703_v13 }
0x1844   :  { %v2755_v31 = vmul.f32 1.442695, %v2750_v27  ;;  %vm2761_vm14 = vcmp.ge.f32.partialorder %v8044_v17, 0.0  ;;  %v2774_v23 = vmul.f32 0.5, %v8029_v3 }
0x1845   :  { %7133 = vrcp.f32 %v2709_v18  ;;  %v2707_v21 = vmul.f32 0.3275911, %v2704_v20  ;;  %v2746_v29 = vsub.f32 0.0, %v2704_v20  ;;  %v2751_v24 = vmul.f32 1.442695, %v2748_v28 }
0x1847   :  { %v2710_v61 = vadd.f32 1.0, %v2707_v21  ;;  %v2749_v34 = vmul.f32 %v2746_v29, %v2704_v20 }
0x1849   :  { %7135 = vrcp.f32 %v2710_v61  ;;  %v2753_v40 = vmul.f32 1.442695, %v2749_v34 }
0x184a   :  { %7137 = vpow2.f32 %v2755_v31 }
0x184b   :  { %7139 = vpow2.f32 %v2751_v24 }
0x184c   :  { %7141 = vpow2.f32 %v2753_v40 }
0x1850   :  { %v7132_v1 = vpop.eup %7131 }
0x1851   :  { %v2720_v30 = vmul.f32 1.0614054, %v7132_v1 }
0x1852   :  { %v7134_v32 = vpop.eup %7133 }
0x1853   :  { %v2723_v9 = vadd.f32 -1.4531521, %v2720_v30  ;;  %v2718_v33 = vmul.f32 1.0614054, %v7134_v32 }
0x1855   :  { %v2726_v35 = vmul.f32 %v7132_v1, %v2723_v9  ;;  %v2721_v37 = vadd.f32 -1.4531521, %v2718_v33  ;;  %v5933_v9 = vld [vmem:[#allocation13 + $0xb] ss:$0 sm:$0xff] }
0x1856   :  { %v7136_v38 = vpop.eup %7135 }
0x1857   :  { %v2729_v57 = vadd.f32 1.4214138, %v2726_v35  ;;  %v2724_v39 = vmul.f32 %v7134_v32, %v2721_v37  ;;  %v2719_v59 = vmul.f32 1.0614054, %v7136_v38  ;;  %v7138_v54 = vpop.eup %7137 }
0x1858   :  { %v7140_v63 = vpop.eup %7139 }
0x1859   :  { %v2732_v43 = vmul.f32 %v7132_v1, %v2729_v57  ;;  %v2727_v44 = vadd.f32 1.4214138, %v2724_v39  ;;  %v2722_v45 = vadd.f32 -1.4531521, %v2719_v59  ;;  %v7142_v13 = vpop.eup %7141 }
0x185b   :  { %v2735_v47 = vadd.f32 -0.28449672, %v2732_v43  ;;  %v2730_v62 = vmul.f32 %v7134_v32, %v2727_v44  ;;  %v2725_v48 = vmul.f32 %v7136_v38, %v2722_v45 }
0x185d   :  { %v2738_v6 = vmul.f32 %v7132_v1, %v2735_v47  ;;  %v2733_v49 = vadd.f32 -0.28449672, %v2730_v62  ;;  %v2728_v50 = vadd.f32 1.4214138, %v2725_v48 }
0x185f   :  { %v2741_v51 = vadd.f32 0.2548296, %v2738_v6  ;;  %v2736_v52 = vmul.f32 %v7134_v32, %v2733_v49  ;;  %v2731_v8 = vmul.f32 %v7136_v38, %v2728_v50 }
0x1861   :  { %v2744_v53 = vmul.f32 %v7132_v1, %v2741_v51  ;;  %v2739_v55 = vadd.f32 0.2548296, %v2736_v52  ;;  %v2734_v26 = vadd.f32 -0.28449672, %v2731_v8  ;;  %v2773_v1 = vmul.f32 0.5, %v8041_v15 }
0x1863   :  { %v2759_v56 = vmul.f32 %v7138_v54, %v2744_v53  ;;  %v2742_v60 = vmul.f32 %v7134_v32, %v2739_v55  ;;  %v2737_v14 = vmul.f32 %v7136_v38, %v2734_v26 }
0x1865   :  { %v2765_v25 = vsub.f32 1.0, %v2759_v56  ;;  %v5916_v2 = vadd.f32 -1.0, %v2759_v56  ;;  %v2757_v19 = vmul.f32 %v7140_v63, %v2742_v60  ;;  %v2740_v42 = vadd.f32 0.2548296, %v2737_v14 }
0x1867   :  { %v2763_v11 = vsub.f32 1.0, %v2757_v19  ;;  %v5914_v58 = vadd.f32 -1.0, %v2757_v19  ;;  %v2743_v46 = vmul.f32 %v7136_v38, %v2740_v42  ;;  %v2771_v16 = vsel %vm2762_vm12, %v2765_v25, %v5916_v2  ;;  %v5942_v2 = vld [vmem:[#allocation13 + $0x18] ss:$0 sm:$0xff]  ;;  %v5943_v42 = vld [vmem:[#allocation13 + $0x19] ss:$0 sm:$0xff] }
0x1868   :  { %v2777_v20 = vadd.f32 1.0, %v2771_v16 }
0x1869   :  { %v2769_v36 = vsel %vm2760_vm13, %v2763_v11, %v5914_v58  ;;  %v2758_v18 = vmul.f32 %v7142_v13, %v2743_v46 }
0x186a   :  { %v2775_v22 = vadd.f32 1.0, %v2769_v36  ;;  %v2780_v29 = vmul.f32 %v2777_v20, %v2774_v23  ;;  %v2960_v23 = vld [vmem:[#allocation9 + $0x8] sm:$0xff] }
0x186b   :  { %v2764_v21 = vsub.f32 1.0, %v2758_v18  ;;  %v5915_v61 = vadd.f32 -1.0, %v2758_v18 }
0x186c   :  { %v2778_v30 = vmul.f32 %v2775_v22, %v2772_v5  ;;  %v2799_v32 = vpack.c.bf16 %v2780_v29, %v2780_v29  ;;  %v2959_v22 = vld [vmem:[#allocation9] sm:$0xff]  ;;  %v2962_v5 = vld [vmem:[#allocation10] sm:$0xff] }
0x186d   :  { %v2770_v27 = vsel %vm2761_vm14, %v2764_v21, %v5915_v61 }
0x186e   :  { %v2776_v28 = vadd.f32 1.0, %v2770_v27  ;;  %v2961_v27 = vld [vmem:[#allocation9 + $0x10] sm:$0xf] }
0x1870   :  { %v2779_v31 = vmul.f32 %v2776_v28, %v2773_v1 }
0x1872   :  { %v2798_v4 = vpack.c.bf16 %v2779_v31, %v2778_v30  ;;  %v2963_v30 = vld [vmem:[#allocation10 + $0x8] sm:$0xff] }
0x1874   :  { %6629 = vmatprep.mubr.bf16.mxu0 %v2798_v4 }
0x1875   :  { %6630 = vmatmul.mubr.bf16.vlgmr.msra.gmra.mxu0 %v2799_v32 }
0x1935   :  { %v6631_v33 = vpop.f32.mrf.mxu0 }
0x1936   :  { %v2896_v24 = vadd.f32 %v6631_v33, %v5933_v9  ;;  %v2964_v33 = vld [vmem:[#allocation10 + $0x10] sm:$0xf] }
0x1937   :  { %v2887_v34 = vpop.f32.mrf.mxu0 }
0x1938   :  { %v2888_v17 = vadd.f32 %v5933_v9, %v2887_v34  ;;  %v2903_v3 = vadd.f32 %v2896_v24, %v7983_v41 }
0x1939   :  { %v6632_v35 = vpop.f32.mrf.mxu0 }
0x193a   :  { %v2912_v10 = vsel %vm397_vm5, %v2903_v3, 0.0  ;;  %v2901_v15 = vadd.f32 %v2888_v17, %v7981_v7 }
0x193b   :  { %2913 = vadd.xlane.f32.xlu0 %v2912_v10  ;;  %v2890_v37 = vpop.f32.mrf.mxu0 }
0x193c   :  { %v2891_v38 = vadd.f32 %v5933_v9, %v2890_v37  ;;  %v2906_v57 = vsel %vm390_vm4, %v2901_v15, 0.0 }
0x193e   :  { %v2902_v39 = vadd.f32 %v2891_v38, %v7988_v12 }
0x193f   :  { %2907 = vadd.xlane.f32.xlu0 %v2906_v57 }
0x1940   :  { %v2909_v59 = vsel %vm390_vm4, %v2902_v39, 0.0 }
0x1941   :  { %2910 = vadd.xlane.f32.xlu1 %v2909_v59 }
0x19c4   :  { %v2914_v40 = vpop.xlane.xlu0 %2913 }
0x19c5   :  { %v2917_v43 = vmul.f32 0.03125, %v2914_v40 }
0x19c7   :  { %v2920_v44 = vsub.f32 %v2903_v3, %v2917_v43 }
0x19c8   :  { %v2908_v41 = vpop.xlane.xlu0 %2907 }
0x19c9   :  { %v2915_v45 = vmul.f32 0.03125, %v2908_v41  ;;  %v2923_v47 = vmul.f32 %v2920_v44, %v2920_v44 }
0x19ca   :  { %v2911_v62 = vpop.xlane.xlu1 %2910 }
0x19cb   :  { %v2918_v48 = vsub.f32 %v2901_v15, %v2915_v45  ;;  %v2916_v7 = vmul.f32 0.03125, %v2911_v62  ;;  %v2930_v6 = vsel %vm397_vm5, %v2923_v47, 0.0  ;;  %vm3392_vm5 = vcmask 158720  }
0x19cc   :  { %2931 = vadd.xlane.f32.xlu1 %v2930_v6  ;;  %v6998_v6 = vld [vmem:[#allocation15 + $0x108] sm:$0xff]  }
0x19cd   :  { %v2919_v49 = vsub.f32 %v2902_v39, %v2916_v7  ;;  %v2921_v50 = vmul.f32 %v2918_v48, %v2918_v48  ;;  %v6997_v7 = vld [vmem:[#allocation15 + $0xc8] sm:$0xff]   ;;  %6664 = vmatprep.subr.bf16.mxu0 %v6998_v6 }
0x19ce   :  { %6665 = vmatpush3.bf16.msra.mxu0 %v6998_v6 }
0x19cf   :  { %v2924_v12 = vsel %vm390_vm4, %v2921_v50, 0.0  ;;  %v2922_v51 = vmul.f32 %v2919_v49, %v2919_v49  ;;  %v7000_v50 = vld [vmem:[#allocation15 + $0x100] sm:$0xff]  }
0x19d0   :  { %2925 = vadd.xlane.f32.xlu1 %v2924_v12  ;;  %6666 = vmatprep.subr.bf16.mxu0 %v7000_v50  ;;  %v7001_v12 = vld [vmem:[#allocation15 + $0xe8] sm:$0xff]  }
0x19d1   :  { %v2927_v52 = vsel %vm390_vm4, %v2922_v51, 0.0 }
0x19d2   :  { %2928 = vadd.xlane.f32.xlu0 %v2927_v52  ;;  %6667 = vmatpush3.bf16.msra.mxu0 %v7000_v50 }
0x1a55   :  { %v2932_v8 = vpop.xlane.xlu1 %2931 }
0x1a56   :  { %v2935_v53 = vmul.f32 0.03125, %v2932_v8 }
0x1a58   :  { %v2938_v54 = vadd.f32 1e-05, %v2935_v53 }
0x1a59   :  { %v2926_v55 = vpop.xlane.xlu1 %2925 }
0x1a5a   :  { %7143 = vrsqrt.f32 %v2938_v54  ;;  %v2933_v26 = vmul.f32 0.03125, %v2926_v55 }
0x1a5b   :  { %v2929_v56 = vpop.xlane.xlu0 %2928 }
0x1a5c   :  { %v2936_v60 = vadd.f32 1e-05, %v2933_v26  ;;  %v2934_v14 = vmul.f32 0.03125, %v2929_v56 }
0x1a5e   :  { %7145 = vrsqrt.f32 %v2936_v60  ;;  %v2937_v63 = vadd.f32 1e-05, %v2934_v14 }
0x1a60   :  { %7147 = vrsqrt.f32 %v2937_v63 }
0x1a67   :  { %v7144_v25 = vpop.eup %7143 }
0x1a68   :  { %v2944_v19 = vmul.f32 %v7144_v25, %v2920_v44  ;;  %v5948_v25 = vld [vmem:[#allocation13 + $0xc] ss:$0 sm:$0xff] }
0x1a6a   :  { %v2951_v11 = vmul.f32 %v5942_v2, %v2944_v19 }
0x1a6b   :  { %v7146_v58 = vpop.eup %7145 }
0x1a6c   :  { %v2958_v46 = vadd.f32 %v5943_v42, %v2951_v11  ;;  %v2942_v13 = vmul.f32 %v7146_v58, %v2918_v48  ;;  %v5949_v11 = vld [vmem:[#allocation13 + $0xd] ss:$0 sm:$0xff] }
0x1a6d   :  { %v7148_v16 = vpop.eup %7147 }
0x1a6e   :  { %6634 = vmatpush3.msk.msra.mxu1 %vm304_vm2, %v2958_v46  ;;  %v2943_v36 = vmul.f32 %v7148_v16, %v2919_v49  ;;  %v2949_v20 = vmul.f32 %v5942_v2, %v2942_v13  ;;  %v6999_v49 = vld [vmem:[#allocation15 + $0xc0] sm:$0xff]  }
0x1a6f   :  { %6635 = vmatprep.subr.mxu1 %v7548_v0 }
0x1a70   :  { %v2950_v18 = vmul.f32 %v5942_v2, %v2943_v36  ;;  %v2956_v61 = vadd.f32 %v5943_v42, %v2949_v20 }
0x1a72   :  { %v2957_v21 = vadd.f32 %v5943_v42, %v2950_v18 }
0x1a74   :  { %6636 = vmatpush3.msra.mxu1 %v2957_v21 }
0x1a75   :  { %6637 = vmatprep.subr.mxu1 %v7548_v0 }
0x1a76   :  { %6638 = vmatpush3.msra.mxu1 %v2956_v61 }
0x1a77   :  { %6640 = vmatmul.mubr.msk.f32.vlgmr.msra.gmra.mxu1 %vm717_vm7, %v2959_v22  ;;  %6648 = vmatprep.subr.bf16.mxu1 %v6997_v7  ;;  %v7002_v22 = vld [vmem:[#allocation15 + $0xe0] sm:$0xff]  }
0x1a78   :  { %6642 = vmatprep.mubr.msk.f32.mxu1 %vm7549_vm0, %v7548_v0  ;;  %6649 = vmatpush3.bf16.msra.mxu1 %v6997_v7  ;;  %v8120_v7 = vld [vmem:[#allocation12 + $0x10] sm:$0xf] }
0x1a79   :  { %6650 = vmatprep.subr.bf16.mxu1 %v6999_v49 }
0x1a7b   :  { %6643 = vmatmul.mubr.msk.f32.gmra.mxu1 %vm717_vm7, %v2960_v23 }
0x1a7c   :  { %6645 = vmatprep.mubr.msk.f32.mxu1 %vm7549_vm0, %v7548_v0  ;;  %6651 = vmatpush3.bf16.msra.mxu1 %v6999_v49 }
0x1a7d   :  { %6656 = vmatprep.subr.bf16.mxu1 %v7001_v12 }
0x1a7f   :  { %6646 = vmatmul.mubr.msk.f32.gmra.mxu1 %vm717_vm7, %v2961_v27 }
0x1b37   :  { %v3043_v1 = vpop.f32.mrf.mxu1 }
0x1b38   :  { %v8072_v28 = vadd.f32 %v3043_v1, %v2962_v5 }
0x1b39   :  { %v6641_v29 = vpop.f32.mrf.mxu1 }
0x1b3a   :  { %v3059_v31 = vsel %vm390_vm4, %v8072_v28, 0.0 }
0x1b3b   :  { %3060 = vadd.xlane.f32.xlu0 %v3059_v31  ;;  %v3048_v4 = vpop.f32.mrf.mxu1 }
0x1b3c   :  { %v8076_v32 = vadd.f32 %v3048_v4, %v2963_v30 }
0x1b3d   :  { %v6644_v9 = vpop.f32.mrf.mxu1 }
0x1b3e   :  { %v3062_v24 = vsel %vm390_vm4, %v8076_v32, 0.0  ;;  %v5950_v9 = vld [vmem:[#allocation16 + $0x4] ss:$0 sm:$0xff] }
0x1b3f   :  { %3063 = vadd.xlane.f32.xlu1 %v3062_v24  ;;  %v3053_v34 = vpop.f32.mrf.mxu1 }
0x1b40   :  { %v8080_v17 = vadd.f32 %v3053_v34, %v2964_v33 }
0x1b41   :  { %v6647_v3 = vpop.f32.mrf.mxu1 }
0x1b42   :  { %v3066_v35 = vsel %vm3065_vm15, %v8080_v17, 0.0 }
0x1b43   :  { %3067 = vadd.xlane.f32.xlu0 %v3066_v35 }
0x1bc4   :  { %v3061_v10 = vpop.xlane.xlu0 %3060 }
0x1bc5   :  { %v3069_v15 = vmul.f32 0.03125, %v3061_v10 }
0x1bc7   :  { %v3072_v37 = vsub.f32 %v8072_v28, %v3069_v15 }
0x1bc8   :  { %v3064_v38 = vpop.xlane.xlu1 %3063 }
0x1bc9   :  { %v3070_v57 = vmul.f32 0.03125, %v3064_v38  ;;  %v3075_v39 = vmul.f32 %v3072_v37, %v3072_v37 }
0x1bcb   :  { %v3073_v59 = vsub.f32 %v8076_v32, %v3070_v57  ;;  %v3078_v40 = vsel %vm390_vm4, %v3075_v39, 0.0 }
0x1bcc   :  { %3079 = vadd.xlane.f32.xlu1 %v3078_v40  ;;  %v3068_v43 = vpop.xlane.xlu0 %3067 }
0x1bcd   :  { %v3071_v44 = vmul.f32 0.03125, %v3068_v43  ;;  %v3076_v41 = vmul.f32 %v3073_v59, %v3073_v59  ;;  %v7003_v43 = vld [vmem:[#allocation15 + $0xf8] sm:$0xff]  }
0x1bcf   :  { %v3074_v45 = vsub.f32 %v8080_v17, %v3071_v44  ;;  %v3081_v47 = vsel %vm390_vm4, %v3076_v41, 0.0 }
0x1bd0   :  { %3082 = vadd.xlane.f32.xlu0 %v3081_v47  ;;  %v7004_v47 = vld [vmem:[#allocation15 + $0xf0] sm:$0xff]  }
0x1bd1   :  { %v3077_v62 = vmul.f32 %v3074_v45, %v3074_v45 }
0x1bd3   :  { %v3084_v48 = vsel %vm3065_vm15, %v3077_v62, 0.0 }
0x1bd4   :  { %3085 = vadd.xlane.f32.xlu1 %v3084_v48  ;;  %v8118_v48 = vld [vmem:[#allocation12] sm:$0xff] }
0x1c55   :  { %v3080_v51 = vpop.xlane.xlu1 %3079 }
0x1c56   :  { %v3087_v52 = vmul.f32 0.03125, %v3080_v51 }
0x1c58   :  { %v3090_v8 = vadd.f32 1e-05, %v3087_v52 }
0x1c59   :  { %v3083_v53 = vpop.xlane.xlu0 %3082 }
0x1c5a   :  { %7149 = vrsqrt.f32 %v3090_v8  ;;  %v3088_v54 = vmul.f32 0.03125, %v3083_v53 }
0x1c5c   :  { %v3091_v55 = vadd.f32 1e-05, %v3088_v54 }
0x1c5d   :  { %v3086_v26 = vpop.xlane.xlu1 %3085 }
0x1c5e   :  { %7151 = vrsqrt.f32 %v3091_v55  ;;  %v3089_v56 = vmul.f32 0.03125, %v3086_v26 }
0x1c60   :  { %v3092_v60 = vadd.f32 1e-05, %v3089_v56 }
0x1c62   :  { %7153 = vrsqrt.f32 %v3092_v60 }
0x1c67   :  { %v7150_v14 = vpop.eup %7149 }
0x1c68   :  { %v3096_v63 = vmul.f32 %v7150_v14, %v3072_v37 }
0x1c6a   :  { %v3103_v19 = vmul.f32 %v5948_v25, %v3096_v63 }
0x1c6b   :  { %v7152_v2 = vpop.eup %7151 }
0x1c6c   :  { %v3097_v42 = vmul.f32 %v7152_v2, %v3073_v59  ;;  %v3110_v16 = vadd.f32 %v5949_v11, %v3103_v19 }
0x1c6e   :  { %v3104_v58 = vmul.f32 %v5948_v25, %v3097_v42 }
0x1c6f   :  { %v7154_v46 = vpop.eup %7153 }
0x1c70   :  { %v3098_v13 = vmul.f32 %v7154_v46, %v3074_v45  ;;  %v3111_v36 = vadd.f32 %v5949_v11, %v3104_v58 }
0x1c72   :  { %v3105_v18 = vmul.f32 %v5948_v25, %v3098_v13  ;;  %v8090_v20 = vpack.c.bf16 %v3111_v36, %v3110_v16 }
0x1c74   :  { %6652 = vmatprep.mubr.msk.bf16.mxu1 %vm390_vm4, %v8090_v20  ;;  %6668 = vmatprep.mubr.msk.bf16.mxu0 %vm390_vm4, %v8090_v20  ;;  %v3112_v21 = vadd.f32 %v5949_v11, %v3105_v18 }
0x1c76   :  { %v8096_v61 = vpack.c.bf16 %v3112_v21, %v3112_v21 }
0x1c78   :  { %6653 = vmatmul.mubr.msk.bf16.vlgmr.msra.gmra.mxu1 %vm390_vm4, %v8096_v61  ;;  %6669 = vmatmul.mubr.msk.bf16.vlgmr.msra.gmra.mxu0 %vm390_vm4, %v8096_v61 }
0x1c79   :  { %6657 = vmatpush3.bf16.msra.mxu1 %v7001_v12  ;;  %6660 = vmatprep.mubr.msk.bf16.mxu1 %vm390_vm4, %v8090_v20  ;;  %v8123_v12 = vld [vmem:[#allocation12 + $0x8] sm:$0xff] }
0x1c7a   :  { %6658 = vmatprep.subr.bf16.mxu1 %v7002_v22 }
0x1c7d   :  { %6659 = vmatpush3.bf16.msra.mxu1 %v7002_v22 }
0x1c80   :  { %6661 = vmatmul.mubr.msk.bf16.vlgmr.msra.gmra.mxu1 %vm390_vm4, %v8096_v61 }
0x1d38   :  { %v6654_v23 = vpop.f32.mrf.mxu1  ;;  %v6670_v27 = vpop.f32.mrf.mxu0 }
0x1d39   :  { %v3423_v5 = vpack.c.bf16 %v6670_v27, %v6670_v27  ;;  %v3186_v41 = vadd.f32 %v6654_v23, %v5950_v9 }
0x1d3a   :  { %v3177_v1 = vpop.f32.mrf.mxu1  ;;  %v3307_v29 = vpop.f32.mrf.mxu0 }
0x1d3b   :  { %v3431_v30 = vsel %vm304_vm2, %v3423_v5, 0  ;;  %6919 = vmatprep.subr.msk.bf16.mxu0 %vm304_vm2, %v3423_v5  ;;  %v3178_v34 = vadd.f32 %v5950_v9, %v3177_v1  ;;  %v3322_v45 = vpack.c.bf16 %v3186_v41, %v3186_v41 }
0x1d3c   :  { %v6655_v31 = vpop.f32.mrf.mxu1  ;;  %v6671_v4 = vpop.f32.mrf.mxu0  ;;  %6681 = vmatpush3.bf16.msra.mxu0 %v3431_v30  ;;  %v7005_v30 = vld [vmem:[#allocation15 + $0xd8] sm:$0xff]  }
0x1d3e   :  { %v3180_v33 = vpop.f32.mrf.mxu1  ;;  %v3310_v24 = vpop.f32.mrf.mxu0 }
0x1d3f   :  { %v3181_v3 = vadd.f32 %v5950_v9, %v3180_v33  ;;  %v3422_v35 = vpack.c.bf16 %v3310_v24, %v3307_v29 }
0x1d40   :  { %v6662_v10 = vpop.f32.mrf.mxu1 }
0x1d41   :  { %v3321_v15 = vpack.c.bf16 %v3181_v3, %v3178_v34  ;;  %v3324_v37 = vpack.c.bf16 %v6662_v10, %v6662_v10  ;;  %6682 = vmatprep.subr.bf16.mxu0 %v3422_v35 }
0x1d42   :  { %v3242_v38 = vpop.f32.mrf.mxu1  ;;  %6683 = vmatpush3.bf16.msra.mxu0 %v3422_v35 }
0x1d43   :  { %v3335_v57 = vsel %vm243_vm1, %v3324_v37, 0  ;;  %6917 = vmatprep.subr.msk.bf16.mxu1 %vm243_vm1, %v3324_v37  ;;  %6676 = vmatprep.mubr.msk.bf16.mxu1 %vm243_vm1, %v3321_v15 }
0x1d44   :  { %v6663_v39 = vpop.f32.mrf.mxu1  ;;  %6673 = vmatpush3.bf16.xpose.msra.mxu1 %v3335_v57  ;;  %6688 = vmatprep.subr.bf16.mxu0 %v7005_v30  ;;  %v7007_v57 = vld [vmem:[#allocation15 + $0x118] sm:$0xff]  }
0x1d45   :  { %v7008_v39 = vld [vmem:[#allocation15 + $0x110] sm:$0xff]  }
0x1d46   :  { %v3245_v59 = vpop.f32.mrf.mxu1 }
0x1d47   :  { %v3323_v40 = vpack.c.bf16 %v3245_v59, %v3242_v38  ;;  %v7006_v38 = vld [vmem:[#allocation15 + $0xd0] sm:$0xff]   ;;  %v7009_v59 = vld [vmem:[#allocation18 + $0x20] sm:$0xff]  }
0x1d49   :  { %6918 = vmatprep.subr.msk.bf16.mxu1 %vm243_vm1, %v3323_v40  ;;  %v3332_v44 = vsel %vm243_vm1, %v3323_v40, 0 }
0x1d4c   :  { %6675 = vmatpush3.bf16.xpose.msra.mxu1 %v3332_v44 }
0x1d4d   :  { %6696 = vmatprep.subr.bf16.mxu1 %v7003_v43 }
0x1d53   :  { %6677 = vmatmul.mubr.msk.bf16.vlgmr.msra.gmra.mxu1 %vm243_vm1, %v3322_v45 }
0x1d54   :  { %6697 = vmatpush3.bf16.msra.mxu1 %v7003_v43  ;;  %6700 = vmatprep.mubr.msk.bf16.mxu1 %vm390_vm4, %v8090_v20 }
0x1d55   :  { %6698 = vmatprep.subr.bf16.mxu1 %v7004_v47 }
0x1d58   :  { %6699 = vmatpush3.bf16.msra.mxu1 %v7004_v47 }
0x1d5b   :  { %6701 = vmatmul.mubr.msk.bf16.vlgmr.msra.gmra.mxu1 %vm390_vm4, %v8096_v61 }
0x1e13   :  { %v6678_v62 = vpop.f32.mrf.mxu1 }
0x1e14   :  { %v3380_v51 = vadd.f32 %v6678_v62, %v8120_v7  ;;  %v5967_v62 = vld [vmem:[#allocation16 + $0x5] ss:$0 sm:$0xff] }
0x1e15   :  { %v3371_v6 = vpop.f32.mrf.mxu1 }
0x1e16   :  { %v3372_v49 = vadd.f32 %v3371_v6, %v8118_v48  ;;  %v3393_v56 = vsel %vm3392_vm5, %v3380_v51, -inf }
0x1e17   :  { %v6679_v50 = vpop.f32.mrf.mxu1 }
0x1e18   :  { %v3386_v52 = vsel %vm3385_vm3, %v3372_v49, -inf }
0x1e19   :  { %v3374_v8 = vpop.f32.mrf.mxu1  ;;  %3387 = vmax.xlane.f32.xlu0 %v3386_v52 }
0x1e1a   :  { %v3375_v53 = vadd.f32 %v3374_v8, %v8123_v12 }
0x1e1b   :  { %v6702_v54 = vpop.f32.mrf.mxu1 }
0x1e1c   :  { %v3689_v55 = vpack.c.bf16 %v6702_v54, %v6702_v54  ;;  %v3389_v26 = vsel %vm3385_vm3, %v3375_v53, -inf }
0x1e1d   :  { %v3607_v60 = vpop.f32.mrf.mxu1  ;;  %3390 = vmax.xlane.f32.xlu1 %v3389_v26  ;;  %3394 = vmax.xlane.f32.xlu0 %v3393_v56 }
0x1e1e   :  { %v3700_v14 = vsel %vm243_vm1, %v3689_v55, 0  ;;  %6920 = vmatprep.subr.msk.bf16.mxu1 %vm243_vm1, %v3689_v55 }
0x1e1f   :  { %v6703_v63 = vpop.f32.mrf.mxu1  ;;  %6713 = vmatpush3.bf16.xpose.msra.mxu1 %v3700_v14 }
0x1e21   :  { %v3610_v25 = vpop.f32.mrf.mxu1 }
0x1e22   :  { %v3688_v2 = vpack.c.bf16 %v3610_v25, %v3607_v60 }
0x1e24   :  { %6921 = vmatprep.subr.msk.bf16.mxu1 %vm243_vm1, %v3688_v2  ;;  %v3697_v19 = vsel %vm243_vm1, %v3688_v2, 0 }
0x1e27   :  { %6715 = vmatpush3.bf16.xpose.msra.mxu1 %v3697_v19 }
0x1e28   :  { %6734 = vmatprep.subr.bf16.mxu1 %v7009_v59 }
0x1ea2   :  { %v3388_v42 = vpop.xlane.xlu0 %3387 }
0x1ea3   :  { %v3396_v11 = vsub.f32 %v3372_v49, %v3388_v42 }
0x1ea5   :  { %v3399_v58 = vmul.f32 1.442695, %v3396_v11 }
0x1ea6   :  { %v3391_v46 = vpop.xlane.xlu1 %3390  ;;  %v3395_v13 = vpop.xlane.xlu0 %3394 }
0x1ea7   :  { %7155 = vpow2.f32 %v3399_v58  ;;  %v3397_v16 = vsub.f32 %v3375_v53, %v3391_v46  ;;  %v3398_v36 = vsub.f32 %v3380_v51, %v3395_v13 }
0x1ea9   :  { %v3401_v18 = vmul.f32 1.442695, %v3397_v16  ;;  %v3403_v21 = vmul.f32 1.442695, %v3398_v36 }
0x1eab   :  { %7157 = vpow2.f32 %v3401_v18 }
0x1eac   :  { %7159 = vpow2.f32 %v3403_v21 }
0x1eb4   :  { %v7156_v22 = vpop.eup %7155 }
0x1eb5   :  { %v3405_v23 = vsel %vm3385_vm3, %v7156_v22, 0.0 }
0x1eb6   :  { %3406 = vadd.xlane.f32.xlu1 %v3405_v23 }
0x1eb8   :  { %v7158_v27 = vpop.eup %7157 }
0x1eb9   :  { %v7160_v5 = vpop.eup %7159  ;;  %v3408_v1 = vsel %vm3385_vm3, %v7158_v27, 0.0 }
0x1eba   :  { %3409 = vadd.xlane.f32.xlu0 %v3408_v1  ;;  %v3411_v29 = vsel %vm3392_vm5, %v7160_v5, 0.0 }
0x1ebb   :  { %3412 = vadd.xlane.f32.xlu1 %v3411_v29 }
0x1f3f   :  { %v3407_v31 = vpop.xlane.xlu1 %3406 }
0x1f40   :  { %7161 = vrcp.f32 %v3407_v31 }
0x1f43   :  { %v3410_v4 = vpop.xlane.xlu0 %3409 }
0x1f44   :  { %v3413_v9 = vpop.xlane.xlu1 %3412  ;;  %7163 = vrcp.f32 %v3410_v4 }
0x1f45   :  { %7165 = vrcp.f32 %v3413_v9 }
0x1f4d   :  { %v7162_v33 = vpop.eup %7161 }
0x1f4e   :  { %v3417_v3 = vmul.f32 %v7162_v33, %v7156_v22 }
0x1f51   :  { %v7164_v24 = vpop.eup %7163 }
0x1f52   :  { %v7166_v34 = vpop.eup %7165  ;;  %v3418_v35 = vmul.f32 %v7164_v24, %v7158_v27 }
0x1f53   :  { %v3419_v10 = vmul.f32 %v7166_v34, %v7160_v5 }
0x1f54   :  { %v3420_v15 = vpack.c.bf16 %v3418_v35, %v3417_v3 }
0x1f55   :  { %v3421_v37 = vpack.c.bf16 %v3419_v10, %v3419_v10 }
0x1f56   :  { %6684 = vmatprep.mubr.msk.bf16.mxu0 %vm3385_vm3, %v3420_v15 }
0x1f57   :  { %6685 = vmatmul.mubr.msk.bf16.vlgmr.msra.gmra.mxu0 %vm3385_vm3, %v3421_v37 }
0x1f58   :  { %6689 = vmatpush3.bf16.msra.mxu0 %v7005_v30  ;;  %6692 = vmatprep.mubr.msk.bf16.mxu0 %vm390_vm4, %v8090_v20 }
0x1f59   :  { %6690 = vmatprep.subr.bf16.mxu0 %v7006_v38 }
0x1f5c   :  { %6691 = vmatpush3.bf16.msra.mxu0 %v7006_v38 }
0x1f5d   :  { %6704 = vmatprep.subr.bf16.mxu0 %v7007_v57 }
0x1f5f   :  { %6693 = vmatmul.mubr.msk.bf16.vlgmr.msra.gmra.mxu0 %vm390_vm4, %v8096_v61 }
0x1f60   :  { %6705 = vmatpush3.bf16.msra.mxu0 %v7007_v57  ;;  %6708 = vmatprep.mubr.msk.bf16.mxu0 %vm390_vm4, %v8090_v20 }
0x1f61   :  { %6706 = vmatprep.subr.bf16.mxu0 %v7008_v39 }
0x1f64   :  { %6707 = vmatpush3.bf16.msra.mxu0 %v7008_v39 }
0x1f67   :  { %6709 = vmatmul.mubr.msk.bf16.vlgmr.msra.gmra.mxu0 %vm390_vm4, %v8096_v61 }
0x2017   :  { %v6686_v40 = vpop.f32.mrf.mxu0 }
0x2018   :  { %v3485_v63 = vpack.c.bf16 %v6686_v40, %v6686_v40 }
0x2019   :  { %v3467_v43 = vpop.f32.mrf.mxu0 }
0x201b   :  { %v6687_v44 = vpop.f32.mrf.mxu0 }
0x201d   :  { %v3470_v41 = vpop.f32.mrf.mxu0 }
0x201e   :  { %v3484_v61 = vpack.c.bf16 %v3470_v41, %v3467_v43 }
0x201f   :  { %v6694_v45 = vpop.f32.mrf.mxu0 }
0x2020   :  { %v3551_v49 = vadd.f32 %v6694_v45, %v5967_v62 }
0x2021   :  { %v3542_v47 = vpop.f32.mrf.mxu0 }
0x2022   :  { %v3543_v51 = vadd.f32 %v5967_v62, %v3542_v47  ;;  %v3687_v54 = vpack.c.bf16 %v3551_v49, %v3551_v49  ;;  %v7010_v47 = vld [vmem:[#allocation18 + $0x28] sm:$0xff]  }
0x2023   :  { %v6695_v6 = vpop.f32.mrf.mxu0 }
0x2025   :  { %v3545_v50 = vpop.f32.mrf.mxu0 }
0x2026   :  { %v3546_v52 = vadd.f32 %v5967_v62, %v3545_v50 }
0x2027   :  { %v6710_v20 = vpop.f32.mrf.mxu0 }
0x2028   :  { %v3686_v8 = vpack.c.bf16 %v3546_v52, %v3543_v51  ;;  %v3786_v53 = vpack.c.bf16 %v6710_v20, %v6710_v20 }
0x2029   :  { %v3672_v55 = vpop.f32.mrf.mxu0 }
0x202a   :  { %v3794_v26 = vsel %vm304_vm2, %v3786_v53, 0  ;;  %6716 = vmatprep.mubr.msk.bf16.mxu1 %vm243_vm1, %v3686_v8  ;;  %6922 = vmatprep.subr.msk.bf16.mxu0 %vm304_vm2, %v3786_v53 }
0x202b   :  { %v6711_v56 = vpop.f32.mrf.mxu0  ;;  %6717 = vmatmul.mubr.msk.bf16.vlgmr.msra.gmra.mxu1 %vm243_vm1, %v3687_v54  ;;  %6721 = vmatpush3.bf16.msra.mxu0 %v3794_v26 }
0x202c   :  { %6736 = vmatprep.mubr.msk.bf16.mxu1 %vm243_vm1, %v3484_v61  ;;  %6735 = vmatpush3.bf16.msra.mxu1 %v7009_v59 }
0x202d   :  { %v3675_v60 = vpop.f32.mrf.mxu0 }
0x202e   :  { %v3785_v14 = vpack.c.bf16 %v3675_v60, %v3672_v55  ;;  %v5990_v60 = vld [vmem:[#allocation13 + $0xe] ss:$0 sm:$0xff] }
0x2030   :  { %6722 = vmatprep.subr.bf16.mxu0 %v3785_v14 }
0x2031   :  { %6723 = vmatpush3.bf16.msra.mxu0 %v3785_v14 }
0x2032   :  { %6728 = vmatprep.subr.bf16.mxu0 %v7010_v47 }
0x2033   :  { %6737 = vmatmul.mubr.msk.bf16.vlgmr.msra.gmra.mxu1 %vm243_vm1, %v3485_v63 }
0x20eb   :  { %v6718_v25 = vpop.f32.mrf.mxu1 }
0x20ec   :  { %v3745_v11 = vadd.f32 %v6718_v25, %v8120_v7 }
0x20ed   :  { %v3736_v2 = vpop.f32.mrf.mxu1 }
0x20ee   :  { %v3737_v19 = vadd.f32 %v3736_v2, %v8118_v48  ;;  %v3756_v18 = vsel %vm3392_vm5, %v3745_v11, -inf }
0x20ef   :  { %v6719_v42 = vpop.f32.mrf.mxu1 }
0x20f0   :  { %v3750_v58 = vsel %vm3385_vm3, %v3737_v19, -inf }
0x20f1   :  { %v3739_v46 = vpop.f32.mrf.mxu1  ;;  %3751 = vmax.xlane.f32.xlu0 %v3750_v58 }
0x20f2   :  { %v3740_v13 = vadd.f32 %v3739_v46, %v8123_v12 }
0x20f3   :  { %v6738_v16 = vpop.f32.mrf.mxu1 }
0x20f4   :  { %v3753_v36 = vsel %vm3385_vm3, %v3740_v13, -inf }
0x20f5   :  { %3754 = vmax.xlane.f32.xlu1 %v3753_v36  ;;  %3757 = vmax.xlane.f32.xlu0 %v3756_v18  ;;  %v3955_v21 = vpop.f32.mrf.mxu1 }
0x20f7   :  { %v6739_v22 = vpop.f32.mrf.mxu1 }
0x20f9   :  { %v3958_v56 = vpop.f32.mrf.mxu1 }
0x217a   :  { %v3752_v23 = vpop.xlane.xlu0 %3751 }
0x217b   :  { %v3759_v27 = vsub.f32 %v3737_v19, %v3752_v23 }
0x217d   :  { %v3762_v5 = vmul.f32 1.442695, %v3759_v27 }
0x217e   :  { %v3755_v1 = vpop.xlane.xlu1 %3754  ;;  %v3758_v29 = vpop.xlane.xlu0 %3757 }
0x217f   :  { %7167 = vpow2.f32 %v3762_v5  ;;  %v3760_v30 = vsub.f32 %v3740_v13, %v3755_v1  ;;  %v3761_v31 = vsub.f32 %v3745_v11, %v3758_v29 }
0x2181   :  { %v3764_v4 = vmul.f32 1.442695, %v3760_v30  ;;  %v3766_v9 = vmul.f32 1.442695, %v3761_v31  ;;  %v7011_v31 = vld [vmem:[#allocation19 + $0x28] sm:$0xff]  }
0x2183   :  { %7169 = vpow2.f32 %v3764_v4  ;;  %v7012_v4 = vld [vmem:[#allocation19 + $0x20] sm:$0xff]  }
0x2184   :  { %7171 = vpow2.f32 %v3766_v9 }
0x218c   :  { %v7168_v33 = vpop.eup %7167 }
0x218d   :  { %v3768_v24 = vsel %vm3385_vm3, %v7168_v33, 0.0 }
0x218e   :  { %3769 = vadd.xlane.f32.xlu1 %v3768_v24 }
0x2190   :  { %v7170_v34 = vpop.eup %7169 }
0x2191   :  { %v7172_v3 = vpop.eup %7171  ;;  %v3771_v35 = vsel %vm3385_vm3, %v7170_v34, 0.0 }
0x2192   :  { %3772 = vadd.xlane.f32.xlu0 %v3771_v35  ;;  %v3774_v10 = vsel %vm3392_vm5, %v7172_v3, 0.0 }
0x2193   :  { %3775 = vadd.xlane.f32.xlu1 %v3774_v10 }
0x2217   :  { %v3770_v15 = vpop.xlane.xlu1 %3769 }
0x2218   :  { %7173 = vrcp.f32 %v3770_v15 }
0x221b   :  { %v3773_v37 = vpop.xlane.xlu0 %3772 }
0x221c   :  { %v3776_v38 = vpop.xlane.xlu1 %3775  ;;  %7175 = vrcp.f32 %v3773_v37 }
0x221d   :  { %7177 = vrcp.f32 %v3776_v38 }
0x2225   :  { %v7174_v57 = vpop.eup %7173 }
0x2226   :  { %v3780_v40 = vmul.f32 %v7174_v57, %v7168_v33 }
0x2229   :  { %v7176_v39 = vpop.eup %7175 }
0x222a   :  { %v7178_v59 = vpop.eup %7177  ;;  %v3781_v43 = vmul.f32 %v7176_v39, %v7170_v34  ;;  %v5991_v39 = vld [vmem:[#allocation13 + $0xf] ss:$0 sm:$0xff] }
0x222b   :  { %v3782_v44 = vmul.f32 %v7178_v59, %v7172_v3 }
0x222c   :  { %v3783_v41 = vpack.c.bf16 %v3781_v43, %v3780_v40 }
0x222d   :  { %v3784_v45 = vpack.c.bf16 %v3782_v44, %v3782_v44 }
0x222e   :  { %6724 = vmatprep.mubr.msk.bf16.mxu0 %vm3385_vm3, %v3783_v41 }
0x222f   :  { %6725 = vmatmul.mubr.msk.bf16.vlgmr.msra.gmra.mxu0 %vm3385_vm3, %v3784_v45  ;;  %v5992_v45 = vld [vmem:[#allocation13 + $0x10] ss:$0 sm:$0xff] }
0x2230   :  { %6729 = vmatpush3.bf16.msra.mxu0 %v7010_v47 }
0x2231   :  { %6740 = vmatprep.subr.bf16.mxu0 %v7011_v31 }
0x22ef   :  { %v6726_v62 = vpop.f32.mrf.mxu0 }
0x22f0   :  { %v3848_v52 = vpack.c.bf16 %v6726_v62, %v6726_v62 }
0x22f1   :  { %v3830_v6 = vpop.f32.mrf.mxu0 }
0x22f3   :  { %v6727_v49 = vpop.f32.mrf.mxu0 }
0x22f5   :  { %v3833_v50 = vpop.f32.mrf.mxu0 }
0x22f6   :  { %v3847_v51 = vpack.c.bf16 %v3833_v50, %v3830_v6 }
0x22f8   :  { %6730 = vmatprep.mubr.msk.bf16.mxu0 %vm243_vm1, %v3847_v51 }
0x22f9   :  { %6731 = vmatmul.mubr.msk.bf16.vlgmr.msra.gmra.mxu0 %vm243_vm1, %v3848_v52 }
0x22fa   :  { %6741 = vmatpush3.bf16.msra.mxu0 %v7011_v31 }
0x22fb   :  { %6742 = vmatprep.subr.bf16.mxu0 %v7012_v4 }
0x22fe   :  { %6743 = vmatpush3.bf16.msra.mxu0 %v7012_v4 }
0x23b9   :  { %v6732_v20 = vpop.f32.mrf.mxu0 }
0x23ba   :  { %v3964_v8 = vadd.f32 %v6738_v16, %v6732_v20  ;;  %v7013_v20 = vld [vmem:[%s8439_s15 + $0xb8] sm:$0xff]  }
0x23bb   :  { %v3895_v53 = vpop.f32.mrf.mxu0  ;;  %6748 = vmatprep.subr.bf16.mxu1 %v7013_v20 }
0x23bc   :  { %v3956_v54 = vadd.f32 %v3955_v21, %v3895_v53  ;;  %v3971_v61 = vadd.f32 %v3964_v8, %v8080_v17  ;;  %6749 = vmatpush3.bf16.msra.mxu1 %v7013_v20  ;;  %v7014_v8 = vld [vmem:[%s8439_s15 + $0xb0] sm:$0xff]   ;;  %v7015_v53 = vld [vmem:[%s8439_s15 + $0xa8] sm:$0xff]  }
0x23bd   :  { %v6733_v55 = vpop.f32.mrf.mxu0  ;;  %6750 = vmatprep.subr.bf16.mxu1 %v7014_v8 }
0x23be   :  { %v3969_v26 = vadd.f32 %v3956_v54, %v8072_v28  ;;  %v8170_v2 = vadd.f32 %v5990_v60, %v3971_v61  ;;  %v7016_v54 = vld [vmem:[%s8439_s15 + $0xa0] sm:$0xff]   ;;  %v7017_v55 = vld [vmem:[%s8439_s15 + $0x98] sm:$0xff]   ;;  %v7018_v61 = vld [vmem:[%s8439_s15 + $0x90] sm:$0xff]  }
0x23bf   :  { %v3898_v14 = vpop.f32.mrf.mxu0 }
0x23c0   :  { %v8168_v63 = vadd.f32 %v5990_v60, %v3969_v26  ;;  %v3959_v25 = vadd.f32 %v3958_v56, %v3898_v14  ;;  %v3988_v28 = vsel %vm3065_vm15, %v8170_v2, 0.0  ;;  %6751 = vmatpush3.bf16.msra.mxu1 %v7014_v8  ;;  %v7019_v26 = vld [vmem:[%s8439_s15 + $0x88] sm:$0xff]   ;;  %v7020_v56 = vld [vmem:[%s8439_s15 + $0x80] sm:$0xff]  }
0x23c1   :  { %6752 = vmatprep.subr.bf16.mxu1 %v7015_v53 }
0x23c2   :  { %v3970_v19 = vadd.f32 %v3959_v25, %v8076_v32  ;;  %v3982_v42 = vsel %vm390_vm4, %v8168_v63, 0.0 }
0x23c3   :  { %3983 = vadd.xlane.f32.xlu0 %v3982_v42 }
0x23c4   :  { %v8175_v11 = vadd.f32 %v5990_v60, %v3970_v19  ;;  %6753 = vmatpush3.bf16.msra.mxu1 %v7015_v53  ;;  %v5993_v60 = vld [vmem:[#allocation21 + $0x2] ss:$0 sm:$0xff] }
0x23c5   :  { %6754 = vmatprep.subr.bf16.mxu1 %v7016_v54 }
0x23c6   :  { %v3985_v17 = vsel %vm390_vm4, %v8175_v11, 0.0 }
0x23c7   :  { %3986 = vadd.xlane.f32.xlu1 %v3985_v17  ;;  %3989 = vadd.xlane.f32.xlu0 %v3988_v28 }
0x23c8   :  { %6755 = vmatpush3.bf16.msra.mxu1 %v7016_v54 }
0x23c9   :  { %6756 = vmatprep.subr.bf16.mxu1 %v7017_v55 }
0x23cc   :  { %6757 = vmatpush3.bf16.msra.mxu1 %v7017_v55 }
0x23cd   :  { %6758 = vmatprep.subr.bf16.mxu1 %v7018_v61 }
0x23d0   :  { %6759 = vmatpush3.bf16.msra.mxu1 %v7018_v61 }
0x23d1   :  { %6760 = vmatprep.subr.bf16.mxu1 %v7019_v26 }
0x23d4   :  { %6761 = vmatpush3.bf16.msra.mxu1 %v7019_v26 }
0x23d5   :  { %6762 = vmatprep.subr.bf16.mxu1 %v7020_v56 }
0x23d8   :  { %6763 = vmatpush3.bf16.msra.mxu1 %v7020_v56 }
0x244c   :  { %v3984_v58 = vpop.xlane.xlu0 %3983 }
0x244d   :  { %v3991_v46 = vmul.f32 0.03125, %v3984_v58 }
0x244f   :  { %v3994_v13 = vsub.f32 %v8168_v63, %v3991_v46 }
0x2450   :  { %v3987_v16 = vpop.xlane.xlu1 %3986  ;;  %v3990_v32 = vpop.xlane.xlu0 %3989 }
0x2451   :  { %v3992_v36 = vmul.f32 0.03125, %v3987_v16  ;;  %v3993_v18 = vmul.f32 0.03125, %v3990_v32  ;;  %v3997_v21 = vmul.f32 %v3994_v13, %v3994_v13 }
0x2453   :  { %v3995_v22 = vsub.f32 %v8175_v11, %v3992_v36  ;;  %v3996_v23 = vsub.f32 %v8170_v2, %v3993_v18  ;;  %v4000_v27 = vsel %vm390_vm4, %v3997_v21, 0.0 }
0x2454   :  { %4001 = vadd.xlane.f32.xlu1 %v4000_v27 }
0x2455   :  { %v3998_v5 = vmul.f32 %v3995_v22, %v3995_v22  ;;  %v3999_v1 = vmul.f32 %v3996_v23, %v3996_v23 }
0x2457   :  { %v4003_v29 = vsel %vm390_vm4, %v3998_v5, 0.0  ;;  %v4006_v30 = vsel %vm3065_vm15, %v3999_v1, 0.0 }
0x2458   :  { %4004 = vadd.xlane.f32.xlu0 %v4003_v29  ;;  %4007 = vadd.xlane.f32.xlu1 %v4006_v30 }
0x24dd   :  { %v4002_v9 = vpop.xlane.xlu1 %4001 }
0x24de   :  { %v4009_v33 = vmul.f32 0.03125, %v4002_v9 }
0x24e0   :  { %v4012_v24 = vadd.f32 1e-05, %v4009_v33 }
0x24e1   :  { %v4008_v34 = vpop.xlane.xlu1 %4007  ;;  %v4005_v3 = vpop.xlane.xlu0 %4004 }
0x24e2   :  { %7179 = vrsqrt.f32 %v4012_v24  ;;  %v4011_v35 = vmul.f32 0.03125, %v4008_v34  ;;  %v4010_v10 = vmul.f32 0.03125, %v4005_v3 }
0x24e4   :  { %v4014_v15 = vadd.f32 1e-05, %v4011_v35  ;;  %v4013_v37 = vadd.f32 1e-05, %v4010_v10 }
0x24e6   :  { %7181 = vrsqrt.f32 %v4014_v15 }
0x24e7   :  { %7183 = vrsqrt.f32 %v4013_v37 }
0x24ef   :  { %v7180_v38 = vpop.eup %7179 }
0x24f0   :  { %v4018_v57 = vmul.f32 %v7180_v38, %v3994_v13 }
0x24f2   :  { %v4025_v41 = vmul.f32 %v5991_v39, %v4018_v57 }
0x24f3   :  { %v7182_v59 = vpop.eup %7181 }
0x24f4   :  { %v7184_v40 = vpop.eup %7183  ;;  %v4020_v43 = vmul.f32 %v7182_v59, %v3996_v23  ;;  %v4032_v49 = vadd.f32 %v5992_v45, %v4025_v41 }
0x24f5   :  { %v4019_v44 = vmul.f32 %v7184_v40, %v3995_v22 }
0x24f6   :  { %v4027_v47 = vmul.f32 %v5991_v39, %v4020_v43 }
0x24f7   :  { %v4026_v62 = vmul.f32 %v5991_v39, %v4019_v44 }
0x24f8   :  { %v4034_v6 = vadd.f32 %v5992_v45, %v4027_v47 }
0x24f9   :  { %v4033_v50 = vadd.f32 %v5992_v45, %v4026_v62 }
0x24fa   :  { %v4041_v51 = vpack.c.bf16 %v4034_v6, %v4034_v6 }
0x24fb   :  { %v4040_v52 = vpack.c.bf16 %v4033_v50, %v4032_v49 }
0x24fd   :  { %6744 = vmatprep.mubr.msk.bf16.mxu0 %vm390_vm4, %v4040_v52 }
0x24fe   :  { %6745 = vmatmul.mubr.msk.bf16.vlgmr.msra.gmra.mxu0 %vm390_vm4, %v4041_v51 }
0x25be   :  { %v6746_v14 = vpop.f32.mrf.mxu0 }
0x25bf   :  { %v8213_v25 = vadd.f32 %v6746_v14, %v5993_v60 }
0x25c0   :  { %v4099_v19 = vpop.f32.mrf.mxu0 }
0x25c1   :  { %v8216_v42 = vmul.f32 0.70710677, %v8213_v25  ;;  %v8218_v17 = vadd.f32 %v5993_v60, %v4099_v19 }
0x25c2   :  { %v6747_v28 = vpop.f32.mrf.mxu0 }
0x25c3   :  { %v4118_v58 = vand.u32 2147483647, %v8216_v42  ;;  %v8222_v46 = vmul.f32 0.70710677, %v8218_v17  ;;  %vm4175_vm6 = vcmp.ge.f32.partialorder %v8216_v42, 0.0  ;;  %v4185_v42 = vmul.f32 0.5, %v8218_v17 }
0x25c4   :  { %v4102_v13 = vpop.f32.mrf.mxu0 }
0x25c5   :  { %v4121_v16 = vmul.f32 0.3275911, %v4118_v58  ;;  %v4116_v32 = vand.u32 2147483647, %v8222_v46  ;;  %v8225_v36 = vadd.f32 %v5993_v60, %v4102_v13  ;;  %v4160_v29 = vsub.f32 0.0, %v4118_v58 }
0x25c6   :  { %vm4173_vm7 = vcmp.ge.f32.partialorder %v8222_v46, 0.0 }
0x25c7   :  { %v4124_v18 = vadd.f32 1.0, %v4121_v16  ;;  %v4119_v21 = vmul.f32 0.3275911, %v4116_v32  ;;  %v8228_v22 = vmul.f32 0.70710677, %v8225_v36  ;;  %v4158_v30 = vsub.f32 0.0, %v4116_v32 }
0x25c8   :  { %v4163_v31 = vmul.f32 %v4160_v29, %v4118_v58 }
0x25c9   :  { %7185 = vrcp.f32 %v4124_v18  ;;  %v4122_v23 = vadd.f32 1.0, %v4119_v21  ;;  %v4117_v27 = vand.u32 2147483647, %v8228_v22  ;;  %v4161_v9 = vmul.f32 %v4158_v30, %v4116_v32 }
0x25ca   :  { %v4168_v34 = vmul.f32 1.442695, %v4163_v31  ;;  %vm4174_vm8 = vcmp.ge.f32.partialorder %v8228_v22, 0.0 }
0x25cb   :  { %7187 = vrcp.f32 %v4122_v23  ;;  %v4120_v5 = vmul.f32 0.3275911, %v4117_v27  ;;  %v4159_v33 = vsub.f32 0.0, %v4117_v27  ;;  %v4164_v15 = vmul.f32 1.442695, %v4161_v9 }
0x25cc   :  { %v4187_v9 = vmul.f32 0.5, %v8213_v25 }
0x25cd   :  { %v4123_v1 = vadd.f32 1.0, %v4120_v5  ;;  %v4162_v37 = vmul.f32 %v4159_v33, %v4117_v27 }
0x25cf   :  { %7189 = vrcp.f32 %v4123_v1  ;;  %v4166_v44 = vmul.f32 1.442695, %v4162_v37 }
0x25d0   :  { %7191 = vpow2.f32 %v4168_v34 }
0x25d1   :  { %7193 = vpow2.f32 %v4164_v15 }
0x25d2   :  { %7195 = vpow2.f32 %v4166_v44 }
0x25d6   :  { %v7186_v4 = vpop.eup %7185 }
0x25d7   :  { %v4133_v24 = vmul.f32 1.0614054, %v7186_v4 }
0x25d8   :  { %v7188_v3 = vpop.eup %7187 }
0x25d9   :  { %v4136_v35 = vadd.f32 -1.4531521, %v4133_v24  ;;  %v4131_v10 = vmul.f32 1.0614054, %v7188_v3  ;;  %v4186_v24 = vmul.f32 0.5, %v8225_v36 }
0x25db   :  { %v4139_v38 = vmul.f32 %v7186_v4, %v4136_v35  ;;  %v4134_v57 = vadd.f32 -1.4531521, %v4131_v10 }
0x25dc   :  { %v7190_v39 = vpop.eup %7189 }
0x25dd   :  { %v4142_v59 = vadd.f32 1.4214138, %v4139_v38  ;;  %v4137_v40 = vmul.f32 %v7188_v3, %v4134_v57  ;;  %v4132_v43 = vmul.f32 1.0614054, %v7190_v39  ;;  %v7192_v55 = vpop.eup %7191  ;;  %v6017_v38 = vld [vmem:[#allocation13 + $0x11] ss:$0 sm:$0xff] }
0x25de   :  { %v7194_v19 = vpop.eup %7193 }
0x25df   :  { %v4145_v41 = vmul.f32 %v7186_v4, %v4142_v59  ;;  %v4140_v45 = vadd.f32 1.4214138, %v4137_v40  ;;  %v4135_v47 = vadd.f32 -1.4531521, %v4132_v43  ;;  %v7196_v23 = vpop.eup %7195 }
0x25e1   :  { %v4148_v62 = vadd.f32 -0.28449672, %v4145_v41  ;;  %v4143_v6 = vmul.f32 %v7188_v3, %v4140_v45  ;;  %v4138_v49 = vmul.f32 %v7190_v39, %v4135_v47 }
0x25e3   :  { %v4151_v50 = vmul.f32 %v7186_v4, %v4148_v62  ;;  %v4146_v51 = vadd.f32 -0.28449672, %v4143_v6  ;;  %v4141_v52 = vadd.f32 1.4214138, %v4138_v49 }
0x25e5   :  { %v4154_v20 = vadd.f32 0.2548296, %v4151_v50  ;;  %v4149_v8 = vmul.f32 %v7188_v3, %v4146_v51  ;;  %v4144_v53 = vmul.f32 %v7190_v39, %v4141_v52 }
0x25e7   :  { %v4157_v54 = vmul.f32 %v7186_v4, %v4154_v20  ;;  %v4152_v61 = vadd.f32 0.2548296, %v4149_v8  ;;  %v4147_v26 = vadd.f32 -0.28449672, %v4144_v53 }
0x25e9   :  { %v4172_v56 = vmul.f32 %v7192_v55, %v4157_v54  ;;  %v4155_v60 = vmul.f32 %v7188_v3, %v4152_v61  ;;  %v4150_v14 = vmul.f32 %v7190_v39, %v4147_v26  ;;  %v7021_v61 = vld [vmem:[#allocation15 + $0x128] sm:$0xff]   ;;  %v7022_v26 = vld [vmem:[#allocation15 + $0x120] sm:$0xff]  }
0x25ea   :  { %6768 = vmatprep.subr.bf16.mxu0 %v7021_v61 }
0x25eb   :  { %v4178_v28 = vsub.f32 1.0, %v4172_v56  ;;  %v6000_v58 = vadd.f32 -1.0, %v4172_v56  ;;  %v4170_v13 = vmul.f32 %v7194_v19, %v4155_v60  ;;  %v4153_v16 = vadd.f32 0.2548296, %v4150_v14  ;;  %6769 = vmatpush3.bf16.msra.mxu0 %v7021_v61  ;;  %v7023_v56 = vld [vmem:[#allocation15 + $0x148] sm:$0xff]   ;;  %v7028_v61 = vld [vmem:[#allocation15 + $0x150] sm:$0xff]  }
0x25ec   :  { %6770 = vmatprep.subr.bf16.mxu0 %v7022_v26 }
0x25ed   :  { %v4176_v32 = vsub.f32 1.0, %v4170_v13  ;;  %v5998_v18 = vadd.f32 -1.0, %v4170_v13  ;;  %v4156_v21 = vmul.f32 %v7190_v39, %v4153_v16  ;;  %v4184_v27 = vsel %vm4175_vm6, %v4178_v28, %v6000_v58 }
0x25ee   :  { %v4190_v29 = vadd.f32 1.0, %v4184_v27  ;;  %v6026_v27 = vld [vmem:[#allocation13 + $0x12] ss:$0 sm:$0xff] }
0x25ef   :  { %v4182_v5 = vsel %vm4173_vm7, %v4176_v32, %v5998_v18  ;;  %v4171_v1 = vmul.f32 %v7196_v23, %v4156_v21  ;;  %6771 = vmatpush3.bf16.msra.mxu0 %v7022_v26 }
0x25f0   :  { %v4188_v4 = vadd.f32 1.0, %v4182_v5  ;;  %v4193_v3 = vmul.f32 %v4190_v29, %v4187_v9  ;;  %6776 = vmatprep.subr.bf16.mxu0 %v7023_v56  ;;  %v6027_v9 = vld [vmem:[#allocation13 + $0x13] ss:$0 sm:$0xff] }
0x25f1   :  { %v4177_v30 = vsub.f32 1.0, %v4171_v1  ;;  %v5999_v31 = vadd.f32 -1.0, %v4171_v1 }
0x25f2   :  { %v4191_v35 = vmul.f32 %v4188_v4, %v4185_v42  ;;  %v4212_v15 = vpack.c.bf16 %v4193_v3, %v4193_v3 }
0x25f3   :  { %v4183_v33 = vsel %vm4174_vm8, %v4177_v30, %v5999_v31 }
0x25f4   :  { %v4189_v34 = vadd.f32 1.0, %v4183_v33 }
0x25f6   :  { %v4192_v10 = vmul.f32 %v4189_v34, %v4186_v24 }
0x25f8   :  { %v4211_v46 = vpack.c.bf16 %v4192_v10, %v4191_v35  ;;  %v7024_v10 = vld [vmem:[#allocation15 + $0x140] sm:$0xff]  }
0x25fa   :  { %6764 = vmatprep.mubr.bf16.mxu1 %v4211_v46  ;;  %v7025_v46 = vld [vmem:[#allocation15 + $0x168] sm:$0xff]  }
0x25fb   :  { %6765 = vmatmul.mubr.bf16.vlgmr.msra.gmra.mxu1 %v4212_v15  ;;  %v7026_v15 = vld [vmem:[#allocation15 + $0x160] sm:$0xff]  }
0x26bb   :  { %v6766_v37 = vpop.f32.mrf.mxu1 }
0x26bc   :  { %v4309_v39 = vadd.f32 %v6766_v37, %v6017_v38 }
0x26bd   :  { %v4300_v57 = vpop.f32.mrf.mxu1 }
0x26be   :  { %v4301_v22 = vadd.f32 %v6017_v38, %v4300_v57  ;;  %v8241_v36 = vadd.f32 %v4309_v39, %v8170_v2  ;;  %v6028_v39 = vld [vmem:[#allocation16 + $0x6] ss:$0 sm:$0xff] }
0x26bf   :  { %v6767_v59 = vpop.f32.mrf.mxu1 }
0x26c0   :  { %v8238_v25 = vadd.f32 %v4301_v22, %v8168_v63  ;;  %v4325_v45 = vsel %vm3065_vm15, %v8241_v36, 0.0 }
0x26c1   :  { %v4303_v17 = vpop.f32.mrf.mxu1 }
0x26c2   :  { %v4304_v40 = vadd.f32 %v6017_v38, %v4303_v17  ;;  %v4319_v43 = vsel %vm390_vm4, %v8238_v25, 0.0 }
0x26c3   :  { %4320 = vadd.xlane.f32.xlu0 %v4319_v43 }
0x26c4   :  { %v8246_v44 = vadd.f32 %v4304_v40, %v8175_v11 }
0x26c6   :  { %v4322_v41 = vsel %vm390_vm4, %v8246_v44, 0.0 }
0x26c7   :  { %4323 = vadd.xlane.f32.xlu1 %v4322_v41  ;;  %4326 = vadd.xlane.f32.xlu0 %v4325_v45 }
0x274c   :  { %v4321_v63 = vpop.xlane.xlu0 %4320 }
0x274d   :  { %v4328_v47 = vmul.f32 0.03125, %v4321_v63 }
0x274f   :  { %v4331_v2 = vsub.f32 %v8238_v25, %v4328_v47 }
0x2750   :  { %v4324_v62 = vpop.xlane.xlu1 %4323  ;;  %v4327_v6 = vpop.xlane.xlu0 %4326 }
0x2751   :  { %v4329_v49 = vmul.f32 0.03125, %v4324_v62  ;;  %v4330_v50 = vmul.f32 0.03125, %v4327_v6  ;;  %v4334_v51 = vmul.f32 %v4331_v2, %v4331_v2 }
0x2753   :  { %v4332_v11 = vsub.f32 %v8246_v44, %v4329_v49  ;;  %v4333_v52 = vsub.f32 %v8241_v36, %v4330_v50  ;;  %v4337_v20 = vsel %vm390_vm4, %v4334_v51, 0.0  ;;  %v7027_v50 = vld [vmem:[#allocation15 + $0x158] sm:$0xff]  }
0x2754   :  { %4338 = vadd.xlane.f32.xlu1 %v4337_v20 }
0x2755   :  { %v4335_v8 = vmul.f32 %v4332_v11, %v4332_v11  ;;  %v4336_v53 = vmul.f32 %v4333_v52, %v4333_v52 }
0x2757   :  { %v4340_v54 = vsel %vm390_vm4, %v4335_v8, 0.0  ;;  %v4343_v55 = vsel %vm3065_vm15, %v4336_v53, 0.0 }
0x2758   :  { %4341 = vadd.xlane.f32.xlu0 %v4340_v54  ;;  %4344 = vadd.xlane.f32.xlu1 %v4343_v55 }
0x27dd   :  { %v4339_v60 = vpop.xlane.xlu1 %4338 }
0x27de   :  { %v4346_v14 = vmul.f32 0.03125, %v4339_v60 }
0x27e0   :  { %v4349_v19 = vadd.f32 1e-05, %v4346_v14 }
0x27e1   :  { %v4345_v28 = vpop.xlane.xlu1 %4344  ;;  %v4342_v58 = vpop.xlane.xlu0 %4341 }
0x27e2   :  { %7197 = vrsqrt.f32 %v4349_v19  ;;  %v4348_v13 = vmul.f32 0.03125, %v4345_v28  ;;  %v4347_v16 = vmul.f32 0.03125, %v4342_v58 }
0x27e4   :  { %v4351_v32 = vadd.f32 1e-05, %v4348_v13  ;;  %v4350_v18 = vadd.f32 1e-05, %v4347_v16 }
0x27e6   :  { %7199 = vrsqrt.f32 %v4351_v32 }
0x27e7   :  { %7201 = vrsqrt.f32 %v4350_v18 }
0x27ef   :  { %v7198_v21 = vpop.eup %7197 }
0x27f0   :  { %v4355_v23 = vmul.f32 %v7198_v21, %v4331_v2 }
0x27f2   :  { %v4362_v30 = vmul.f32 %v6026_v27, %v4355_v23 }
0x27f3   :  { %v7200_v5 = vpop.eup %7199 }
0x27f4   :  { %v7202_v1 = vpop.eup %7201  ;;  %v4357_v29 = vmul.f32 %v7200_v5, %v4333_v52  ;;  %v4369_v24 = vadd.f32 %v6027_v9, %v4362_v30 }
0x27f5   :  { %v4356_v31 = vmul.f32 %v7202_v1, %v4332_v11 }
0x27f6   :  { %v4364_v4 = vmul.f32 %v6026_v27, %v4357_v29 }
0x27f7   :  { %v4363_v33 = vmul.f32 %v6026_v27, %v4356_v31 }
0x27f8   :  { %v4371_v42 = vadd.f32 %v6027_v9, %v4364_v4 }
0x27f9   :  { %v4370_v34 = vadd.f32 %v6027_v9, %v4363_v33 }
0x27fa   :  { %v8258_v3 = vpack.c.bf16 %v4371_v42, %v4371_v42 }
0x27fb   :  { %v8260_v35 = vpack.c.bf16 %v4370_v34, %v4369_v24 }
0x27fd   :  { %6772 = vmatprep.mubr.msk.bf16.mxu0 %vm390_vm4, %v8260_v35 }
0x27fe   :  { %6773 = vmatmul.mubr.msk.bf16.vlgmr.msra.gmra.mxu0 %vm390_vm4, %v8258_v3 }
0x27ff   :  { %6777 = vmatpush3.bf16.msra.mxu0 %v7023_v56  ;;  %6780 = vmatprep.mubr.msk.bf16.mxu0 %vm390_vm4, %v8260_v35 }
0x2800   :  { %6778 = vmatprep.subr.bf16.mxu0 %v7024_v10 }
0x2803   :  { %6779 = vmatpush3.bf16.msra.mxu0 %v7024_v10 }
0x2804   :  { %6784 = vmatprep.subr.bf16.mxu0 %v7025_v46 }
0x2806   :  { %6781 = vmatmul.mubr.msk.bf16.vlgmr.msra.gmra.mxu0 %vm390_vm4, %v8258_v3 }
0x2807   :  { %6785 = vmatpush3.bf16.msra.mxu0 %v7025_v46  ;;  %6788 = vmatprep.mubr.msk.bf16.mxu0 %vm390_vm4, %v8260_v35 }
0x2808   :  { %6786 = vmatprep.subr.bf16.mxu0 %v7026_v15 }
0x280b   :  { %6787 = vmatpush3.bf16.msra.mxu0 %v7026_v15 }
0x280e   :  { %6789 = vmatmul.mubr.msk.bf16.vlgmr.msra.gmra.mxu0 %vm390_vm4, %v8258_v3 }
0x28be   :  { %v6774_v37 = vpop.f32.mrf.mxu0 }
0x28bf   :  { %v4445_v8 = vadd.f32 %v6774_v37, %v6028_v39 }
0x28c0   :  { %v4436_v38 = vpop.f32.mrf.mxu0 }
0x28c1   :  { %v4437_v59 = vadd.f32 %v6028_v39, %v4436_v38  ;;  %v4581_v55 = vpack.c.bf16 %v4445_v8, %v4445_v8 }
0x28c2   :  { %v6775_v57 = vpop.f32.mrf.mxu0 }
0x28c3   :  { %v7029_v57 = vld [vmem:[#allocation15 + $0x138] sm:$0xff]  }
0x28c4   :  { %v4439_v22 = vpop.f32.mrf.mxu0 }
0x28c5   :  { %v4440_v17 = vadd.f32 %v6028_v39, %v4439_v22 }
0x28c6   :  { %v6782_v40 = vpop.f32.mrf.mxu0 }
0x28c7   :  { %v4580_v43 = vpack.c.bf16 %v4440_v17, %v4437_v59  ;;  %v4583_v41 = vpack.c.bf16 %v6782_v40, %v6782_v40 }
0x28c8   :  { %v4501_v45 = vpop.f32.mrf.mxu0 }
0x28c9   :  { %v4594_v63 = vsel %vm243_vm1, %v4583_v41, 0  ;;  %6923 = vmatprep.subr.msk.bf16.mxu0 %vm243_vm1, %v4583_v41  ;;  %6796 = vmatprep.mubr.msk.bf16.mxu0 %vm243_vm1, %v4580_v43 }
0x28ca   :  { %v6783_v47 = vpop.f32.mrf.mxu0  ;;  %6793 = vmatpush3.bf16.xpose.msra.mxu0 %v4594_v63 }
0x28cc   :  { %v4504_v2 = vpop.f32.mrf.mxu0 }
0x28cd   :  { %v4582_v62 = vpack.c.bf16 %v4504_v2, %v4501_v45 }
0x28ce   :  { %v6790_v6 = vpop.f32.mrf.mxu0 }
0x28cf   :  { %v4680_v49 = vpack.c.bf16 %v6790_v6, %v6790_v6  ;;  %6924 = vmatprep.subr.msk.bf16.mxu0 %vm243_vm1, %v4582_v62  ;;  %v4591_v11 = vsel %vm243_vm1, %v4582_v62, 0  ;;  %v7030_v62 = vld [vmem:[#allocation15 + $0x130] sm:$0xff]   ;;  %v7031_v6 = vld [vmem:[#allocation15 + $0x178] sm:$0xff]  }
0x28d0   :  { %v4566_v51 = vpop.f32.mrf.mxu0 }
0x28d1   :  { %v4688_v52 = vsel %vm304_vm2, %v4680_v49, 0  ;;  %6925 = vmatprep.subr.msk.bf16.mxu1 %vm304_vm2, %v4680_v49  ;;  %v7032_v49 = vld [vmem:[#allocation15 + $0x170] sm:$0xff]  }
0x28d2   :  { %v6791_v20 = vpop.f32.mrf.mxu0  ;;  %6795 = vmatpush3.bf16.xpose.msra.mxu0 %v4591_v11  ;;  %6801 = vmatpush3.bf16.msra.mxu1 %v4688_v52 }
0x28d3   :  { %6816 = vmatprep.subr.bf16.mxu0 %v7027_v50 }
0x28d4   :  { %v4569_v53 = vpop.f32.mrf.mxu0 }
0x28d5   :  { %v4679_v54 = vpack.c.bf16 %v4569_v53, %v4566_v51 }
0x28d7   :  { %6802 = vmatprep.subr.bf16.mxu1 %v4679_v54 }
0x28d8   :  { %6803 = vmatpush3.bf16.msra.mxu1 %v4679_v54  ;;  %v6045_v54 = vld [vmem:[#allocation16 + $0x7] ss:$0 sm:$0xff] }
0x28d9   :  { %6797 = vmatmul.mubr.msk.bf16.vlgmr.msra.gmra.mxu0 %vm243_vm1, %v4581_v55  ;;  %6808 = vmatprep.subr.bf16.mxu1 %v7029_v57 }
0x28da   :  { %6817 = vmatpush3.bf16.msra.mxu0 %v7027_v50  ;;  %6820 = vmatprep.mubr.msk.bf16.mxu0 %vm390_vm4, %v8260_v35  ;;  %v7033_v50 = vld [vmem:[#allocation18 + $0x30] sm:$0xff]  }
0x28db   :  { %6818 = vmatprep.subr.bf16.mxu0 %v7028_v61 }
0x28de   :  { %6819 = vmatpush3.bf16.msra.mxu0 %v7028_v61 }
0x28e1   :  { %6821 = vmatmul.mubr.msk.bf16.vlgmr.msra.gmra.mxu0 %vm390_vm4, %v8258_v3 }
0x2999   :  { %v6798_v26 = vpop.f32.mrf.mxu0 }
0x299a   :  { %v4639_v19 = vadd.f32 %v6798_v26, %v8120_v7 }
0x299b   :  { %v4630_v56 = vpop.f32.mrf.mxu0 }
0x299c   :  { %v4631_v60 = vadd.f32 %v4630_v56, %v8118_v48  ;;  %v4650_v21 = vsel %vm3392_vm5, %v4639_v19, -inf }
0x299d   :  { %v6799_v14 = vpop.f32.mrf.mxu0 }
0x299e   :  { %v4644_v28 = vsel %vm3385_vm3, %v4631_v60, -inf }
0x299f   :  { %v4633_v58 = vpop.f32.mrf.mxu0  ;;  %4645 = vmax.xlane.f32.xlu0 %v4644_v28 }
0x29a0   :  { %v4634_v13 = vadd.f32 %v4633_v58, %v8123_v12 }
0x29a1   :  { %v6822_v16 = vpop.f32.mrf.mxu0 }
0x29a2   :  { %v4946_v32 = vpack.c.bf16 %v6822_v16, %v6822_v16  ;;  %v4647_v18 = vsel %vm3385_vm3, %v4634_v13, -inf }
0x29a3   :  { %v4864_v23 = vpop.f32.mrf.mxu0  ;;  %4648 = vmax.xlane.f32.xlu1 %v4647_v18  ;;  %4651 = vmax.xlane.f32.xlu0 %v4650_v21 }
0x29a4   :  { %v4957_v48 = vsel %vm243_vm1, %v4946_v32, 0  ;;  %6926 = vmatprep.subr.msk.bf16.mxu0 %vm243_vm1, %v4946_v32 }
0x29a5   :  { %v6823_v7 = vpop.f32.mrf.mxu0  ;;  %6833 = vmatpush3.bf16.xpose.msra.mxu0 %v4957_v48 }
0x29a6   :  { %v7254_v7 = vld [vmem:[#allocation12] sm:$0xff] }
0x29a7   :  { %v4867_v27 = vpop.f32.mrf.mxu0 }
0x29a8   :  { %v4945_v5 = vpack.c.bf16 %v4867_v27, %v4864_v23 }
0x29aa   :  { %6927 = vmatprep.subr.msk.bf16.mxu0 %vm243_vm1, %v4945_v5  ;;  %v4954_v12 = vsel %vm243_vm1, %v4945_v5, 0 }
0x29ad   :  { %6835 = vmatpush3.bf16.xpose.msra.mxu0 %v4954_v12  ;;  %v7255_v12 = vld [vmem:[#allocation12 + $0x10] sm:$0xf] }
0x29ae   :  { %6854 = vmatprep.subr.bf16.mxu0 %v7033_v50 }
0x2a28   :  { %v4646_v1 = vpop.xlane.xlu0 %4645 }
0x2a29   :  { %v4653_v29 = vsub.f32 %v4631_v60, %v4646_v1 }
0x2a2b   :  { %v4656_v30 = vmul.f32 1.442695, %v4653_v29 }
0x2a2c   :  { %v4649_v31 = vpop.xlane.xlu1 %4648  ;;  %v4652_v4 = vpop.xlane.xlu0 %4651 }
0x2a2d   :  { %7203 = vpow2.f32 %v4656_v30  ;;  %v4654_v9 = vsub.f32 %v4634_v13, %v4649_v31  ;;  %v4655_v33 = vsub.f32 %v4639_v19, %v4652_v4  ;;  %v7256_v31 = vld [vmem:[#allocation12 + $0x8] sm:$0xff] }
0x2a2f   :  { %v4658_v42 = vmul.f32 1.442695, %v4654_v9  ;;  %v4660_v24 = vmul.f32 1.442695, %v4655_v33 }
0x2a31   :  { %7205 = vpow2.f32 %v4658_v42 }
0x2a32   :  { %7207 = vpow2.f32 %v4660_v24 }
0x2a3a   :  { %v7204_v34 = vpop.eup %7203 }
0x2a3b   :  { %v4662_v10 = vsel %vm3385_vm3, %v7204_v34, 0.0 }
0x2a3c   :  { %4663 = vadd.xlane.f32.xlu1 %v4662_v10 }
0x2a3e   :  { %v7206_v46 = vpop.eup %7205 }
0x2a3f   :  { %v7208_v15 = vpop.eup %7207  ;;  %v4665_v37 = vsel %vm3385_vm3, %v7206_v46, 0.0 }
0x2a40   :  { %4666 = vadd.xlane.f32.xlu0 %v4665_v37  ;;  %v4668_v38 = vsel %vm3392_vm5, %v7208_v15, 0.0 }
0x2a41   :  { %4669 = vadd.xlane.f32.xlu1 %v4668_v38 }
0x2ac5   :  { %v4664_v39 = vpop.xlane.xlu1 %4663 }
0x2ac6   :  { %7209 = vrcp.f32 %v4664_v39 }
0x2ac9   :  { %v4667_v22 = vpop.xlane.xlu0 %4666 }
0x2aca   :  { %v4670_v59 = vpop.xlane.xlu1 %4669  ;;  %7211 = vrcp.f32 %v4667_v22 }
0x2acb   :  { %7213 = vrcp.f32 %v4670_v59 }
0x2ad3   :  { %v7210_v17 = vpop.eup %7209 }
0x2ad4   :  { %v4674_v41 = vmul.f32 %v7210_v17, %v7204_v34 }
0x2ad7   :  { %v7212_v40 = vpop.eup %7211 }
0x2ad8   :  { %v7214_v43 = vpop.eup %7213  ;;  %v4675_v45 = vmul.f32 %v7212_v40, %v7206_v46 }
0x2ad9   :  { %v4676_v63 = vmul.f32 %v7214_v43, %v7208_v15 }
0x2ada   :  { %v4677_v47 = vpack.c.bf16 %v4675_v45, %v4674_v41 }
0x2adb   :  { %v4678_v2 = vpack.c.bf16 %v4676_v63, %v4676_v63 }
0x2adc   :  { %6804 = vmatprep.mubr.msk.bf16.mxu1 %vm3385_vm3, %v4677_v47 }
0x2add   :  { %6805 = vmatmul.mubr.msk.bf16.vlgmr.msra.gmra.mxu1 %vm3385_vm3, %v4678_v2 }
0x2ade   :  { %6809 = vmatpush3.bf16.msra.mxu1 %v7029_v57  ;;  %6812 = vmatprep.mubr.msk.bf16.mxu1 %vm390_vm4, %v8260_v35 }
0x2adf   :  { %6810 = vmatprep.subr.bf16.mxu1 %v7030_v62 }
0x2ae2   :  { %6811 = vmatpush3.bf16.msra.mxu1 %v7030_v62 }
0x2ae3   :  { %6824 = vmatprep.subr.bf16.mxu1 %v7031_v6 }
0x2ae5   :  { %6813 = vmatmul.mubr.msk.bf16.vlgmr.msra.gmra.mxu1 %vm390_vm4, %v8258_v3 }
0x2ae6   :  { %6825 = vmatpush3.bf16.msra.mxu1 %v7031_v6  ;;  %6828 = vmatprep.mubr.msk.bf16.mxu1 %vm390_vm4, %v8260_v35 }
0x2ae7   :  { %6826 = vmatprep.subr.bf16.mxu1 %v7032_v49 }
0x2aea   :  { %6827 = vmatpush3.bf16.msra.mxu1 %v7032_v49 }
0x2aed   :  { %6829 = vmatmul.mubr.msk.bf16.vlgmr.msra.gmra.mxu1 %vm390_vm4, %v8258_v3 }
0x2b9d   :  { %v6806_v51 = vpop.f32.mrf.mxu1 }
0x2b9e   :  { %v4742_v21 = vpack.c.bf16 %v6806_v51, %v6806_v51 }
0x2b9f   :  { %v4724_v11 = vpop.f32.mrf.mxu1 }
0x2ba1   :  { %v6807_v52 = vpop.f32.mrf.mxu1 }
0x2ba3   :  { %v4727_v20 = vpop.f32.mrf.mxu1 }
0x2ba4   :  { %v4741_v3 = vpack.c.bf16 %v4727_v20, %v4724_v11 }
0x2ba5   :  { %v6814_v8 = vpop.f32.mrf.mxu1 }
0x2ba6   :  { %v4808_v61 = vadd.f32 %v6814_v8, %v6045_v54 }
0x2ba7   :  { %v4799_v53 = vpop.f32.mrf.mxu1 }
0x2ba8   :  { %v4800_v56 = vadd.f32 %v6045_v54, %v4799_v53  ;;  %v4944_v28 = vpack.c.bf16 %v4808_v61, %v4808_v61  ;;  %v7034_v53 = vld [vmem:[#allocation18 + $0x38] sm:$0xff]  }
0x2ba9   :  { %v6815_v55 = vpop.f32.mrf.mxu1 }
0x2bab   :  { %v4802_v26 = vpop.f32.mrf.mxu1 }
0x2bac   :  { %v4803_v60 = vadd.f32 %v6045_v54, %v4802_v26 }
0x2bad   :  { %v6830_v35 = vpop.f32.mrf.mxu1 }
0x2bae   :  { %v4943_v14 = vpack.c.bf16 %v4803_v60, %v4800_v56  ;;  %v5043_v19 = vpack.c.bf16 %v6830_v35, %v6830_v35 }
0x2baf   :  { %v4929_v58 = vpop.f32.mrf.mxu1 }
0x2bb0   :  { %v5051_v13 = vsel %vm304_vm2, %v5043_v19, 0  ;;  %6836 = vmatprep.mubr.msk.bf16.mxu0 %vm243_vm1, %v4943_v14  ;;  %6928 = vmatprep.subr.msk.bf16.mxu1 %vm304_vm2, %v5043_v19 }
0x2bb1   :  { %v6831_v16 = vpop.f32.mrf.mxu1  ;;  %6837 = vmatmul.mubr.msk.bf16.vlgmr.msra.gmra.mxu0 %vm243_vm1, %v4944_v28  ;;  %6841 = vmatpush3.bf16.msra.mxu1 %v5051_v13 }
0x2bb2   :  { %6856 = vmatprep.mubr.msk.bf16.mxu0 %vm243_vm1, %v4741_v3  ;;  %6855 = vmatpush3.bf16.msra.mxu0 %v7033_v50 }
0x2bb3   :  { %v4932_v32 = vpop.f32.mrf.mxu1 }
0x2bb4   :  { %v5042_v18 = vpack.c.bf16 %v4932_v32, %v4929_v58  ;;  %v6068_v32 = vld [vmem:[#allocation13 + $0x14] ss:$0 sm:$0xff] }
0x2bb6   :  { %6842 = vmatprep.subr.bf16.mxu1 %v5042_v18 }
0x2bb7   :  { %6843 = vmatpush3.bf16.msra.mxu1 %v5042_v18 }
0x2bb8   :  { %6848 = vmatprep.subr.bf16.mxu1 %v7034_v53 }
0x2bb9   :  { %6857 = vmatmul.mubr.msk.bf16.vlgmr.msra.gmra.mxu0 %vm243_vm1, %v4742_v21 }
0x2c71   :  { %v6838_v23 = vpop.f32.mrf.mxu0 }
0x2c72   :  { %v5002_v1 = vadd.f32 %v7255_v12, %v6838_v23 }
0x2c73   :  { %v4993_v48 = vpop.f32.mrf.mxu0 }
0x2c74   :  { %v4994_v27 = vadd.f32 %v7254_v7, %v4993_v48  ;;  %v5013_v42 = vsel %vm3392_vm5, %v5002_v1, -inf }
0x2c75   :  { %v6839_v5 = vpop.f32.mrf.mxu0 }
0x2c76   :  { %v5007_v29 = vsel %vm3385_vm3, %v4994_v27, -inf }
0x2c77   :  { %v4996_v30 = vpop.f32.mrf.mxu0  ;;  %5008 = vmax.xlane.f32.xlu0 %v5007_v29 }
0x2c78   :  { %v4997_v4 = vadd.f32 %v7256_v31, %v4996_v30 }
0x2c79   :  { %v6858_v9 = vpop.f32.mrf.mxu0 }
0x2c7a   :  { %v5010_v33 = vsel %vm3385_vm3, %v4997_v4, -inf }
0x2c7b   :  { %5011 = vmax.xlane.f32.xlu1 %v5010_v33  ;;  %5014 = vmax.xlane.f32.xlu0 %v5013_v42  ;;  %v5212_v24 = vpop.f32.mrf.mxu0 }
0x2c7d   :  { %v6859_v34 = vpop.f32.mrf.mxu0 }
0x2c7f   :  { %v5215_v16 = vpop.f32.mrf.mxu0 }
0x2d00   :  { %v5009_v10 = vpop.xlane.xlu0 %5008 }
0x2d01   :  { %v5016_v46 = vsub.f32 %v4994_v27, %v5009_v10 }
0x2d03   :  { %v5019_v15 = vmul.f32 1.442695, %v5016_v46 }
0x2d04   :  { %v5012_v37 = vpop.xlane.xlu1 %5011  ;;  %v5015_v38 = vpop.xlane.xlu0 %5014 }
0x2d05   :  { %7215 = vpow2.f32 %v5019_v15  ;;  %v5017_v57 = vsub.f32 %v4997_v4, %v5012_v37  ;;  %v5018_v39 = vsub.f32 %v5002_v1, %v5015_v38  ;;  %v7035_v37 = vld [vmem:[#allocation19 + $0x38] sm:$0xff]   ;;  %v7036_v38 = vld [vmem:[#allocation19 + $0x30] sm:$0xff]  }
0x2d07   :  { %v5021_v22 = vmul.f32 1.442695, %v5017_v57  ;;  %v5023_v59 = vmul.f32 1.442695, %v5018_v39 }
0x2d09   :  { %7217 = vpow2.f32 %v5021_v22 }
0x2d0a   :  { %7219 = vpow2.f32 %v5023_v59 }
0x2d12   :  { %v7216_v17 = vpop.eup %7215 }
0x2d13   :  { %v5025_v40 = vsel %vm3385_vm3, %v7216_v17, 0.0 }
0x2d14   :  { %5026 = vadd.xlane.f32.xlu1 %v5025_v40 }
0x2d16   :  { %v7218_v43 = vpop.eup %7217 }
0x2d17   :  { %v7220_v41 = vpop.eup %7219  ;;  %v5028_v45 = vsel %vm3385_vm3, %v7218_v43, 0.0 }
0x2d18   :  { %5029 = vadd.xlane.f32.xlu0 %v5028_v45  ;;  %v5031_v63 = vsel %vm3392_vm5, %v7220_v41, 0.0 }
0x2d19   :  { %5032 = vadd.xlane.f32.xlu1 %v5031_v63 }
0x2d9d   :  { %v5027_v47 = vpop.xlane.xlu1 %5026 }
0x2d9e   :  { %7221 = vrcp.f32 %v5027_v47 }
0x2da1   :  { %v5030_v2 = vpop.xlane.xlu0 %5029 }
0x2da2   :  { %v5033_v62 = vpop.xlane.xlu1 %5032  ;;  %7223 = vrcp.f32 %v5030_v2  ;;  %v6069_v2 = vld [vmem:[#allocation13 + $0x15] ss:$0 sm:$0xff] }
0x2da3   :  { %7225 = vrcp.f32 %v5033_v62 }
0x2dab   :  { %v7222_v6 = vpop.eup %7221 }
0x2dac   :  { %v5037_v51 = vmul.f32 %v7222_v6, %v7216_v17 }
0x2daf   :  { %v7224_v49 = vpop.eup %7223 }
0x2db0   :  { %v7226_v50 = vpop.eup %7225  ;;  %v5038_v11 = vmul.f32 %v7224_v49, %v7218_v43 }
0x2db1   :  { %v5039_v52 = vmul.f32 %v7226_v50, %v7220_v41 }
0x2db2   :  { %v5040_v20 = vpack.c.bf16 %v5038_v11, %v5037_v51  ;;  %v6070_v11 = vld [vmem:[#allocation13 + $0x16] ss:$0 sm:$0xff] }
0x2db3   :  { %v5041_v8 = vpack.c.bf16 %v5039_v52, %v5039_v52 }
0x2db4   :  { %6844 = vmatprep.mubr.msk.bf16.mxu1 %vm3385_vm3, %v5040_v20 }
0x2db5   :  { %6845 = vmatmul.mubr.msk.bf16.vlgmr.msra.gmra.mxu1 %vm3385_vm3, %v5041_v8 }
0x2db6   :  { %6849 = vmatpush3.bf16.msra.mxu1 %v7034_v53 }
0x2db7   :  { %6860 = vmatprep.subr.bf16.mxu1 %v7035_v37 }
0x2e75   :  { %v6846_v54 = vpop.f32.mrf.mxu1 }
0x2e76   :  { %v5105_v60 = vpack.c.bf16 %v6846_v54, %v6846_v54 }
0x2e77   :  { %v5087_v55 = vpop.f32.mrf.mxu1 }
0x2e79   :  { %v6847_v61 = vpop.f32.mrf.mxu1 }
0x2e7b   :  { %v5090_v26 = vpop.f32.mrf.mxu1 }
0x2e7c   :  { %v5104_v56 = vpack.c.bf16 %v5090_v26, %v5087_v55  ;;  %v7037_v26 = vld [vmem:[%s8439_s15 + $0xf8] sm:$0xff]  }
0x2e7d   :  { %6868 = vmatprep.subr.bf16.mxu0 %v7037_v26 }
0x2e7e   :  { %6850 = vmatprep.mubr.msk.bf16.mxu1 %vm243_vm1, %v5104_v56  ;;  %6869 = vmatpush3.bf16.msra.mxu0 %v7037_v26  ;;  %v7038_v56 = vld [vmem:[%s8439_s15 + $0xf0] sm:$0xff]  }
0x2e7f   :  { %6851 = vmatmul.mubr.msk.bf16.vlgmr.msra.gmra.mxu1 %vm243_vm1, %v5105_v60  ;;  %6870 = vmatprep.subr.bf16.mxu0 %v7038_v56  ;;  %v7039_v60 = vld [vmem:[%s8439_s15 + $0xe8] sm:$0xff]  }
0x2e80   :  { %6861 = vmatpush3.bf16.msra.mxu1 %v7035_v37 }
0x2e81   :  { %6862 = vmatprep.subr.bf16.mxu1 %v7036_v38 }
0x2e82   :  { %6871 = vmatpush3.bf16.msra.mxu0 %v7038_v56 }
0x2e83   :  { %6872 = vmatprep.subr.bf16.mxu0 %v7039_v60 }
0x2e84   :  { %6863 = vmatpush3.bf16.msra.mxu1 %v7036_v38 }
0x2e86   :  { %6873 = vmatpush3.bf16.msra.mxu0 %v7039_v60 }
0x2f3f   :  { %v6852_v35 = vpop.f32.mrf.mxu1 }
0x2f40   :  { %v5221_v14 = vadd.f32 %v6858_v9, %v6852_v35  ;;  %v7040_v35 = vld [vmem:[%s8439_s15 + $0xe0] sm:$0xff]  }
0x2f41   :  { %v5152_v19 = vpop.f32.mrf.mxu1  ;;  %6874 = vmatprep.subr.bf16.mxu0 %v7040_v35 }
0x2f42   :  { %v5213_v28 = vadd.f32 %v5212_v24, %v5152_v19  ;;  %v5228_v3 = vadd.f32 %v5221_v14, %v8241_v36  ;;  %6875 = vmatpush3.bf16.msra.mxu0 %v7040_v35  ;;  %v7041_v14 = vld [vmem:[%s8439_s15 + $0xd8] sm:$0xff]   ;;  %v7042_v19 = vld [vmem:[%s8439_s15 + $0xd0] sm:$0xff]  }
0x2f43   :  { %v6853_v58 = vpop.f32.mrf.mxu1  ;;  %6876 = vmatprep.subr.bf16.mxu0 %v7041_v14 }
0x2f44   :  { %v5226_v13 = vadd.f32 %v5213_v28, %v8238_v25  ;;  %v8329_v48 = vadd.f32 %v6068_v32, %v5228_v3  ;;  %v7043_v28 = vld [vmem:[%s8439_s15 + $0xc8] sm:$0xff]   ;;  %v7044_v58 = vld [vmem:[%s8439_s15 + $0xc0] sm:$0xff]   ;;  %v6071_v3 = vld [vmem:[#allocation21 + $0x3] ss:$0 sm:$0xff] }
0x2f45   :  { %v5155_v18 = vpop.f32.mrf.mxu1 }
0x2f46   :  { %v8327_v21 = vadd.f32 %v6068_v32, %v5226_v13  ;;  %v5216_v23 = vadd.f32 %v5215_v16, %v5155_v18  ;;  %v5245_v25 = vsel %vm3065_vm15, %v8329_v48, 0.0  ;;  %6877 = vmatpush3.bf16.msra.mxu0 %v7041_v14 }
0x2f47   :  { %6878 = vmatprep.subr.bf16.mxu0 %v7042_v19 }
0x2f48   :  { %v5227_v7 = vadd.f32 %v5216_v23, %v8246_v44  ;;  %v5239_v27 = vsel %vm390_vm4, %v8327_v21, 0.0 }
0x2f49   :  { %5240 = vadd.xlane.f32.xlu0 %v5239_v27 }
0x2f4a   :  { %v8334_v5 = vadd.f32 %v6068_v32, %v5227_v7  ;;  %6879 = vmatpush3.bf16.msra.mxu0 %v7042_v19 }
0x2f4b   :  { %6880 = vmatprep.subr.bf16.mxu0 %v7043_v28 }
0x2f4c   :  { %v5242_v36 = vsel %vm390_vm4, %v8334_v5, 0.0 }
0x2f4d   :  { %5243 = vadd.xlane.f32.xlu1 %v5242_v36  ;;  %5246 = vadd.xlane.f32.xlu0 %v5245_v25 }
0x2f4e   :  { %6881 = vmatpush3.bf16.msra.mxu0 %v7043_v28 }
0x2f4f   :  { %6882 = vmatprep.subr.bf16.mxu0 %v7044_v58 }
0x2f52   :  { %6883 = vmatpush3.bf16.msra.mxu0 %v7044_v58 }
0x2fd2   :  { %v5241_v12 = vpop.xlane.xlu0 %5240 }
0x2fd3   :  { %v5248_v1 = vmul.f32 0.03125, %v5241_v12 }
0x2fd5   :  { %v5251_v29 = vsub.f32 %v8327_v21, %v5248_v1 }
0x2fd6   :  { %v5244_v30 = vpop.xlane.xlu1 %5243  ;;  %v5247_v44 = vpop.xlane.xlu0 %5246 }
0x2fd7   :  { %v5249_v31 = vmul.f32 0.03125, %v5244_v30  ;;  %v5250_v4 = vmul.f32 0.03125, %v5247_v44  ;;  %v5254_v9 = vmul.f32 %v5251_v29, %v5251_v29 }
0x2fd9   :  { %v5252_v33 = vsub.f32 %v8334_v5, %v5249_v31  ;;  %v5253_v42 = vsub.f32 %v8329_v48, %v5250_v4  ;;  %v5257_v24 = vsel %vm390_vm4, %v5254_v9, 0.0 }
0x2fda   :  { %5258 = vadd.xlane.f32.xlu1 %v5257_v24 }
0x2fdb   :  { %v5255_v34 = vmul.f32 %v5252_v33, %v5252_v33  ;;  %v5256_v10 = vmul.f32 %v5253_v42, %v5253_v42 }
0x2fdd   :  { %v5260_v46 = vsel %vm390_vm4, %v5255_v34, 0.0  ;;  %v5263_v15 = vsel %vm3065_vm15, %v5256_v10, 0.0 }
0x2fde   :  { %5261 = vadd.xlane.f32.xlu0 %v5260_v46  ;;  %5264 = vadd.xlane.f32.xlu1 %v5263_v15 }
0x3063   :  { %v5259_v57 = vpop.xlane.xlu1 %5258 }
0x3064   :  { %v5266_v39 = vmul.f32 0.03125, %v5259_v57 }
0x3066   :  { %v5269_v22 = vadd.f32 1e-05, %v5266_v39 }
0x3067   :  { %v5265_v59 = vpop.xlane.xlu1 %5264  ;;  %v5262_v17 = vpop.xlane.xlu0 %5261 }
0x3068   :  { %7227 = vrsqrt.f32 %v5269_v22  ;;  %v5268_v40 = vmul.f32 0.03125, %v5265_v59  ;;  %v5267_v43 = vmul.f32 0.03125, %v5262_v17 }
0x306a   :  { %v5271_v41 = vadd.f32 1e-05, %v5268_v40  ;;  %v5270_v45 = vadd.f32 1e-05, %v5267_v43 }
0x306c   :  { %7229 = vrsqrt.f32 %v5271_v41 }
0x306d   :  { %7231 = vrsqrt.f32 %v5270_v45 }
0x3075   :  { %v7228_v63 = vpop.eup %7227 }
0x3076   :  { %v5275_v47 = vmul.f32 %v7228_v63, %v5251_v29 }
0x3078   :  { %v5282_v51 = vmul.f32 %v6069_v2, %v5275_v47 }
0x3079   :  { %v7230_v62 = vpop.eup %7229 }
0x307a   :  { %v7232_v6 = vpop.eup %7231  ;;  %v5277_v49 = vmul.f32 %v7230_v62, %v5253_v42  ;;  %v5289_v53 = vadd.f32 %v6070_v11, %v5282_v51 }
0x307b   :  { %v5276_v50 = vmul.f32 %v7232_v6, %v5252_v33 }
0x307c   :  { %v5284_v52 = vmul.f32 %v6069_v2, %v5277_v49 }
0x307d   :  { %v5283_v20 = vmul.f32 %v6069_v2, %v5276_v50 }
0x307e   :  { %v5291_v8 = vadd.f32 %v6070_v11, %v5284_v52 }
0x307f   :  { %v5290_v54 = vadd.f32 %v6070_v11, %v5283_v20 }
0x3080   :  { %v5298_v55 = vpack.c.bf16 %v5291_v8, %v5291_v8 }
0x3081   :  { %v5297_v61 = vpack.c.bf16 %v5290_v54, %v5289_v53 }
0x3083   :  { %6864 = vmatprep.mubr.msk.bf16.mxu1 %vm390_vm4, %v5297_v61 }
0x3084   :  { %6865 = vmatmul.mubr.msk.bf16.vlgmr.msra.gmra.mxu1 %vm390_vm4, %v5298_v55 }
0x3144   :  { %v6866_v13 = vpop.f32.mrf.mxu1 }
0x3145   :  { %v8372_v16 = vadd.f32 %v6866_v13, %v6071_v3 }
0x3146   :  { %v5356_v32 = vpop.f32.mrf.mxu1 }
0x3147   :  { %v8375_v18 = vmul.f32 0.70710677, %v8372_v16  ;;  %v8377_v23 = vadd.f32 %v6071_v3, %v5356_v32 }
0x3148   :  { %v6867_v7 = vpop.f32.mrf.mxu1 }
0x3149   :  { %v5375_v27 = vand.u32 2147483647, %v8375_v18  ;;  %v8381_v36 = vmul.f32 0.70710677, %v8377_v23  ;;  %vm5432_vm1 = vcmp.ge.f32.partialorder %v8375_v18, 0.0  ;;  %v5442_v18 = vmul.f32 0.5, %v8377_v23 }
0x314a   :  { %v5359_v25 = vpop.f32.mrf.mxu1 }
0x314b   :  { %v5378_v12 = vmul.f32 0.3275911, %v5375_v27  ;;  %v5373_v1 = vand.u32 2147483647, %v8381_v36  ;;  %v8384_v29 = vadd.f32 %v6071_v3, %v5359_v25  ;;  %v5417_v24 = vsub.f32 0.0, %v5375_v27 }
0x314c   :  { %vm5430_vm2 = vcmp.ge.f32.partialorder %v8381_v36, 0.0 }
0x314d   :  { %v5381_v30 = vadd.f32 1.0, %v5378_v12  ;;  %v5376_v44 = vmul.f32 0.3275911, %v5373_v1  ;;  %v8387_v31 = vmul.f32 0.70710677, %v8384_v29  ;;  %v5415_v34 = vsub.f32 0.0, %v5373_v1 }
0x314e   :  { %v5420_v10 = vmul.f32 %v5417_v24, %v5375_v27 }
0x314f   :  { %7233 = vrcp.f32 %v5381_v30  ;;  %v5379_v4 = vadd.f32 1.0, %v5376_v44  ;;  %v5374_v9 = vand.u32 2147483647, %v8387_v31  ;;  %v5418_v15 = vmul.f32 %v5415_v34, %v5373_v1 }
0x3150   :  { %v5425_v57 = vmul.f32 1.442695, %v5420_v10  ;;  %vm5431_vm9 = vcmp.ge.f32.partialorder %v8387_v31, 0.0  ;;  %v5444_v34 = vmul.f32 0.5, %v8372_v16 }
0x3151   :  { %7235 = vrcp.f32 %v5379_v4  ;;  %v5377_v33 = vmul.f32 0.3275911, %v5374_v9  ;;  %v5416_v37 = vsub.f32 0.0, %v5374_v9  ;;  %v5421_v17 = vmul.f32 1.442695, %v5418_v15 }
0x3153   :  { %v5380_v42 = vadd.f32 1.0, %v5377_v33  ;;  %v5419_v40 = vmul.f32 %v5416_v37, %v5374_v9 }
0x3155   :  { %7237 = vrcp.f32 %v5380_v42  ;;  %v5423_v62 = vmul.f32 1.442695, %v5419_v40 }
0x3156   :  { %7239 = vpow2.f32 %v5425_v57 }
0x3157   :  { %7241 = vpow2.f32 %v5421_v17 }
0x3158   :  { %7243 = vpow2.f32 %v5423_v62 }
0x315c   :  { %v7234_v46 = vpop.eup %7233 }
0x315d   :  { %v5390_v38 = vmul.f32 1.0614054, %v7234_v46 }
0x315e   :  { %v7236_v39 = vpop.eup %7235 }
0x315f   :  { %v5393_v22 = vadd.f32 -1.4531521, %v5390_v38  ;;  %v5388_v59 = vmul.f32 1.0614054, %v7236_v39 }
0x3161   :  { %v5396_v43 = vmul.f32 %v7234_v46, %v5393_v22  ;;  %v5391_v41 = vadd.f32 -1.4531521, %v5388_v59  ;;  %v6095_v22 = vld [vmem:[#allocation13 + $0x17] ss:$0 sm:$0xff] }
0x3162   :  { %v7238_v45 = vpop.eup %7237 }
0x3163   :  { %v5399_v63 = vadd.f32 1.4214138, %v5396_v43  ;;  %v5394_v47 = vmul.f32 %v7236_v39, %v5391_v41  ;;  %v5389_v2 = vmul.f32 1.0614054, %v7238_v45  ;;  %v7240_v56 = vpop.eup %7239 }
0x3164   :  { %v7242_v58 = vpop.eup %7241 }
0x3165   :  { %v5402_v6 = vmul.f32 %v7234_v46, %v5399_v63  ;;  %v5397_v49 = vadd.f32 1.4214138, %v5394_v47  ;;  %v5392_v50 = vadd.f32 -1.4531521, %v5389_v2  ;;  %v7244_v1 = vpop.eup %7243 }
0x3167   :  { %v5405_v51 = vadd.f32 -0.28449672, %v5402_v6  ;;  %v5400_v11 = vmul.f32 %v7236_v39, %v5397_v49  ;;  %v5395_v52 = vmul.f32 %v7238_v45, %v5392_v50 }
0x3169   :  { %v5408_v20 = vmul.f32 %v7234_v46, %v5405_v51  ;;  %v5403_v8 = vadd.f32 -0.28449672, %v5400_v11  ;;  %v5398_v53 = vadd.f32 1.4214138, %v5395_v52 }
0x316b   :  { %v5411_v54 = vadd.f32 0.2548296, %v5408_v20  ;;  %v5406_v55 = vmul.f32 %v7236_v39, %v5403_v8  ;;  %v5401_v61 = vmul.f32 %v7238_v45, %v5398_v53 }
0x316d   :  { %v5414_v26 = vmul.f32 %v7234_v46, %v5411_v54  ;;  %v5409_v60 = vadd.f32 0.2548296, %v5406_v55  ;;  %v5404_v35 = vadd.f32 -0.28449672, %v5401_v61  ;;  %v5443_v46 = vmul.f32 0.5, %v8384_v29  ;;  %v5629_v61 = vld [vmem:[%s8432_s8] sm:$0xff] }
0x316e   :  { %6894 = vmatprep.mubr.msk.f32.mxu1 %vm3385_vm3, %v5629_v61 }
0x316f   :  { %v5429_v14 = vmul.f32 %v7240_v56, %v5414_v26  ;;  %v5412_v19 = vmul.f32 %v7236_v39, %v5409_v60  ;;  %v5407_v28 = vmul.f32 %v7238_v45, %v5404_v35 }
0x3171   :  { %v5435_v3 = vsub.f32 1.0, %v5429_v14  ;;  %v6078_v13 = vadd.f32 -1.0, %v5429_v14  ;;  %v5427_v32 = vmul.f32 %v7242_v58, %v5412_v19  ;;  %v5410_v7 = vadd.f32 0.2548296, %v5407_v28 }
0x3173   :  { %v5433_v27 = vsub.f32 1.0, %v5427_v32  ;;  %v6076_v25 = vadd.f32 -1.0, %v5427_v32  ;;  %v5413_v12 = vmul.f32 %v7238_v45, %v5410_v7  ;;  %v5441_v30 = vsel %vm5432_vm1, %v5435_v3, %v6078_v13  ;;  %v6104_v32 = vld [vmem:[#allocation13 + $0x1a] ss:$0 sm:$0xff] }
0x3174   :  { %v5447_v9 = vadd.f32 1.0, %v5441_v30 }
0x3175   :  { %v5439_v44 = vsel %vm5430_vm2, %v5433_v27, %v6076_v25  ;;  %v5428_v4 = vmul.f32 %v7244_v1, %v5413_v12  ;;  %v6105_v27 = vld [vmem:[#allocation13 + $0x1b] ss:$0 sm:$0xff] }
0x3176   :  { %v5445_v24 = vadd.f32 1.0, %v5439_v44  ;;  %v5450_v37 = vmul.f32 %v5447_v9, %v5444_v34  ;;  %v5630_v34 = vld [vmem:[%s8432_s8 + $0x8] sm:$0xff] }
0x3177   :  { %v5434_v33 = vsub.f32 1.0, %v5428_v4  ;;  %v6077_v42 = vadd.f32 -1.0, %v5428_v4 }
0x3178   :  { %v5448_v38 = vmul.f32 %v5445_v24, %v5442_v18  ;;  %v5469_v39 = vpack.c.bf16 %v5450_v37, %v5450_v37  ;;  %v7046_v18 = vld [vmem:[#allocation19 + $0x40] sm:$0xff]  }
0x3179   :  { %v5440_v10 = vsel %vm5431_vm9, %v5434_v33, %v6077_v42 }
0x317a   :  { %v5446_v15 = vadd.f32 1.0, %v5440_v10  ;;  %v7045_v10 = vld [vmem:[#allocation19 + $0x48] sm:$0xff]  }
0x317c   :  { %v5449_v57 = vmul.f32 %v5446_v15, %v5443_v46 }
0x317e   :  { %v5468_v36 = vpack.c.bf16 %v5449_v57, %v5448_v38  ;;  %v6109_v38 = vld [vmem:[#allocation21 + $0x4] ss:$0 sm:$0xff] }
0x3180   :  { %6884 = vmatprep.mubr.bf16.mxu0 %v5468_v36 }
0x3181   :  { %6885 = vmatmul.mubr.bf16.vlgmr.msra.gmra.mxu0 %v5469_v39 }
0x3241   :  { %v6886_v59 = vpop.f32.mrf.mxu0 }
0x3242   :  { %v5566_v17 = vadd.f32 %v6886_v59, %v6095_v22 }
0x3243   :  { %v5557_v40 = vpop.f32.mrf.mxu0 }
0x3244   :  { %v5573_v31 = vadd.f32 %v5566_v17, %v8329_v48  ;;  %v5558_v16 = vadd.f32 %v6095_v22, %v5557_v40 }
0x3245   :  { %v6887_v43 = vpop.f32.mrf.mxu0 }
0x3246   :  { %v5571_v23 = vadd.f32 %v5558_v16, %v8327_v21  ;;  %v5582_v29 = vsel %vm3065_vm15, %v5573_v31, 0.0 }
0x3247   :  { %5583 = vadd.xlane.f32.xlu0 %v5582_v29  ;;  %v5560_v41 = vpop.f32.mrf.mxu0 }
0x3248   :  { %v5561_v45 = vadd.f32 %v6095_v22, %v5560_v41  ;;  %v5576_v47 = vsel %vm390_vm4, %v5571_v23, 0.0 }
0x324a   :  { %v5572_v63 = vadd.f32 %v5561_v45, %v8334_v5 }
0x324b   :  { %5577 = vadd.xlane.f32.xlu0 %v5576_v47 }
0x324c   :  { %v5579_v2 = vsel %vm390_vm4, %v5572_v63, 0.0 }
0x324d   :  { %5580 = vadd.xlane.f32.xlu1 %v5579_v2 }
0x32d0   :  { %v5584_v62 = vpop.xlane.xlu0 %5583 }
0x32d1   :  { %v5587_v6 = vmul.f32 0.03125, %v5584_v62 }
0x32d3   :  { %v5590_v48 = vsub.f32 %v5573_v31, %v5587_v6 }
0x32d4   :  { %v5578_v49 = vpop.xlane.xlu0 %5577 }
0x32d5   :  { %v5585_v50 = vmul.f32 0.03125, %v5578_v49  ;;  %v5593_v51 = vmul.f32 %v5590_v48, %v5590_v48 }
0x32d6   :  { %v5581_v21 = vpop.xlane.xlu1 %5580 }
0x32d7   :  { %v5588_v11 = vsub.f32 %v5571_v23, %v5585_v50  ;;  %v5586_v52 = vmul.f32 0.03125, %v5581_v21  ;;  %v5600_v20 = vsel %vm3065_vm15, %v5593_v51, 0.0 }
0x32d8   :  { %5601 = vadd.xlane.f32.xlu1 %v5600_v20 }
0x32d9   :  { %v5589_v8 = vsub.f32 %v5572_v63, %v5586_v52  ;;  %v5591_v5 = vmul.f32 %v5588_v11, %v5588_v11 }
0x32db   :  { %v5594_v53 = vsel %vm390_vm4, %v5591_v5, 0.0  ;;  %v5592_v54 = vmul.f32 %v5589_v8, %v5589_v8 }
0x32dc   :  { %5595 = vadd.xlane.f32.xlu1 %v5594_v53 }
0x32dd   :  { %v5597_v55 = vsel %vm390_vm4, %v5592_v54, 0.0 }
0x32de   :  { %5598 = vadd.xlane.f32.xlu0 %v5597_v55 }
0x3361   :  { %v5602_v26 = vpop.xlane.xlu1 %5601 }
0x3362   :  { %v5605_v56 = vmul.f32 0.03125, %v5602_v26 }
0x3364   :  { %v5608_v60 = vadd.f32 1e-05, %v5605_v56 }
0x3365   :  { %v5596_v35 = vpop.xlane.xlu1 %5595 }
0x3366   :  { %7245 = vrsqrt.f32 %v5608_v60  ;;  %v5603_v14 = vmul.f32 0.03125, %v5596_v35 }
0x3367   :  { %v5599_v19 = vpop.xlane.xlu0 %5598 }
0x3368   :  { %v5606_v28 = vadd.f32 1e-05, %v5603_v14  ;;  %v5604_v58 = vmul.f32 0.03125, %v5599_v19 }
0x336a   :  { %7247 = vrsqrt.f32 %v5606_v28  ;;  %v5607_v3 = vadd.f32 1e-05, %v5604_v58 }
0x336c   :  { %7249 = vrsqrt.f32 %v5607_v3 }
0x3373   :  { %v7246_v13 = vpop.eup %7245 }
0x3374   :  { %v5614_v7 = vmul.f32 %v7246_v13, %v5590_v48 }
0x3376   :  { %v5621_v25 = vmul.f32 %v6104_v32, %v5614_v7 }
0x3377   :  { %v7248_v12 = vpop.eup %7247 }
0x3378   :  { %v5628_v1 = vadd.f32 %v6105_v27, %v5621_v25  ;;  %v5612_v30 = vmul.f32 %v7248_v12, %v5588_v11 }
0x3379   :  { %v7250_v44 = vpop.eup %7249 }
0x337a   :  { %6888 = vmatprep.subr.msk.mxu1 %vm5637_vm10, %v5628_v1  ;;  %v5613_v4 = vmul.f32 %v7250_v44, %v5589_v8  ;;  %v5619_v33 = vmul.f32 %v6104_v32, %v5612_v30 }
0x337b   :  { %6889 = vmatpush3.msk.msra.mxu1 %vm5637_vm10, %v5628_v1 }
0x337c   :  { %v5620_v9 = vmul.f32 %v6104_v32, %v5613_v4  ;;  %v5626_v24 = vadd.f32 %v6105_v27, %v5619_v33 }
0x337e   :  { %v5627_v42 = vadd.f32 %v6105_v27, %v5620_v9 }
0x3380   :  { %6890 = vmatprep.subr.mxu1 %v5627_v42 }
0x3381   :  { %6891 = vmatpush3.msra.mxu1 %v5627_v42 }
0x3382   :  { %6892 = vmatprep.subr.mxu1 %v5626_v24 }
0x3383   :  { %6893 = vmatpush3.msra.mxu1 %v5626_v24 }
0x3384   :  { %6895 = vmatmul.mubr.msk.f32.vlgmr.msra.gmra.mxu1 %vm3385_vm3, %v5630_v34  ;;  %6897 = vmatprep.subr.bf16.mxu1 %v7548_v0 }
0x3385   :  { %6898 = vmatpush3.bf16.msra.mxu1 %v7045_v10  ;;  %6901 = vmatprep.mubr.msk.bf16.mxu1 %vm7549_vm0, %v7548_v0 }
0x3386   :  { %6899 = vmatprep.subr.bf16.mxu1 %v7548_v0 }
0x3389   :  { %6900 = vmatpush3.bf16.msra.mxu1 %v7046_v18 }
0x3444   :  { %v6896_v46 = vpop.f32.mrf.mxu1 }
0x3446   :  { %v5707_v15 = vpop.f32.mrf.mxu1 }
0x3447   :  { %v5721_v37 = vpack.c.bf16 %v6896_v46, %v5707_v15 }
0x3449   :  { %6902 = vmatmul.mubr.msk.bf16.vlgmr.msra.gmra.mxu1 %vm390_vm4, %v5721_v37 }
0x3509   :  { %v5776_v57 = vpop.f32.mrf.mxu1 }
0x350a   :  { %v5777_v36 = vadd.f32 %v6109_v38, %v5776_v57 }
0x350b   :  { %v6903_v39 = vpop.f32.mrf.mxu1 }
0x350c   :  { %5783 = vst [vmem:[%s8440_s16] sm:$0xff] %v5777_v36 }
0x350d   :  { %v5779_v22 = vpop.f32.mrf.mxu1 }
0x350e   :  { %v5780_v59 = vadd.f32 %v6109_v38, %v5779_v22 }
0x350f   :  { %v6904_v17 = vpop.f32.mrf.mxu1 }
0x3510   :  { %5784 = vst [vmem:[%s8440_s16 + $0x8] sm:$0xff] %v5780_v59 }
0x3511   :  { %5789 = vsyncpa [#allocation3], 1 }
0x3512   :  { %5790 = vsyncpa [#allocation5], 1 }
0x3513   :  { %5791 = vsyncpa [#allocation8], 1 }
0x3514   :  { %5792 = vsyncpa [#allocation11], 1 }
0x3515   :  { %5793 = vsyncpa [#allocation14], 1 }
0x3516   :  { %5794 = vsyncpa [#allocation17], 1 }
0x3517   :  { %5795 = vsyncpa [#allocation20], 1 }

</bundles_post_ra>
